<compile_context>
chip_gen: v7x
topology: tpu7x:2x2x1
jax: 0.10.0
libtpu: 0.0.40
codegen_flags: <defaults>
</compile_context>

<pallas_src>
import functools
import math

import jax
import jax.numpy as jnp
from jax.experimental import pallas as pl
from jax.experimental.pallas import tpu as pltpu

MODEL_DIM = 128
NUM_CLASSES = 3
NUM_LAYERS = 3
NHEAD = 4
FFN_DIM = MODEL_DIM * 2
LN_EPS = 1e-5
NEG_INF = -1e30
LANE_PAD = 128          # logits padded to a full 128-lane store


def positional_encoding(max_len, d):
    pos = jnp.arange(max_len, dtype=jnp.float32)[:, None]
    div = jnp.exp(jnp.arange(0, d, 2, dtype=jnp.float32) * (-math.log(10000.0) / d))
    pe = jnp.zeros((max_len, d), jnp.float32)
    pe = pe.at[:, 0::2].set(jnp.sin(pos * div))
    pe = pe.at[:, 1::2].set(jnp.cos(pos * div))
    return pe


def _ln(y, g, b):
    mu = jnp.mean(y, axis=-1, keepdims=True)
    var = jnp.mean((y - mu) ** 2, axis=-1, keepdims=True)
    return (y - mu) * jax.lax.rsqrt(var + LN_EPS) * g + b


# ----------------------------- fused Pallas kernel -----------------------------

def _fused_forward_kernel(
        # activations / constants
        x_ref, mask_ref, pe_ref,
        # input projection (Linear + LayerNorm)
        w_in_ref, b_in_ref, g_in_ref, beta_in_ref,
        # encoder stack (leading NUM_LAYERS axis)
        ln1_g_ref, ln1_b_ref, wqkv_ref, bqkv_ref, wo_ref, bo_ref,
        ln2_g_ref, ln2_b_ref, w1_ref, b1_ref, w2_ref, b2_ref,
        # classifier head + skip connection
        wc1_ref, bc1_ref, gc1_ref, betac1_ref,
        wc2a_ref, bc2a_ref, gc2_ref, betac2_ref, wc2b_ref, bc2b_ref,
        wsk_ref, bsk_ref,
        # output
        o_ref,
        *, num_heads, num_layers):
    """EnhancedGazeTransformer forward for one block of TB batch rows, in VMEM."""
    f32, bf16 = jnp.float32, jnp.bfloat16
    Bb, S, Fin = x_ref.shape
    D = pe_ref.shape[-1]
    N = Bb * S
    dh = D // num_heads

    # ---- input projection: Linear + LayerNorm (bf16 matmul, f32 accumulate) ----
    x2 = x_ref[...].reshape(N, Fin).astype(bf16)
    xp2 = _ln(jnp.dot(x2, w_in_ref[...], preferred_element_type=f32) + b_in_ref[...],
              g_in_ref[...], beta_in_ref[...])                              # (N, D) f32

    # ---- positional encoding (dropout = identity in eval mode) ----
    src = xp2.reshape(Bb, S, D) + pe_ref[...][None, :, :]                   # (Bb, S, D) f32

    # ---- key-padding mask fix-up (fully-masked rows get position 0 unmasked) ----
    m = mask_ref[...].reshape(Bb, S)                                        # {0,1} f32
    any_valid = jnp.max(m, axis=-1, keepdims=True)                          # (Bb, 1)
    col0 = jax.lax.broadcasted_iota(jnp.int32, (Bb, S), 1) == 0
    m = jnp.where(jnp.logical_and(col0, any_valid < 0.5), 1.0, m)
    key_bias = ((1.0 - m) * NEG_INF)[:, None, :]                            # (Bb, 1, S)

    # ---- transformer encoder layers (norm_first=True), fully unrolled ----
    for l in range(num_layers):
        # --- self-attention block ---
        y = _ln(src.reshape(N, D), ln1_g_ref[l], ln1_b_ref[l]).astype(bf16)
        # fused QKV projection; 1/sqrt(dh) is pre-folded into the Q columns.
        qkv = (jnp.dot(y, wqkv_ref[l], preferred_element_type=f32)
               + bqkv_ref[l]).astype(bf16)                                  # (N, 3D)
        q = qkv[:, 0 * D:1 * D].reshape(Bb, S, D)
        k = qkv[:, 1 * D:2 * D].reshape(Bb, S, D)
        v = qkv[:, 2 * D:3 * D].reshape(Bb, S, D)

        heads = []
        for h in range(num_heads):
            sl = slice(h * dh, (h + 1) * dh)
            s = jnp.einsum('bqd,bkd->bqk', q[..., sl], k[..., sl],
                           preferred_element_type=f32) + key_bias
            s = s - jnp.max(s, axis=-1, keepdims=True)
            p = jnp.exp(s)
            p = p * pl.reciprocal(jnp.sum(p, axis=-1, keepdims=True), approx=True)
            heads.append(jnp.einsum('bqk,bkd->bqd', p.astype(bf16), v[..., sl],
                                    preferred_element_type=f32))
        # concat(heads) along lanes is exactly torch's head concat -> one dense
        # (N,128)@(128,128) output-projection matmul per layer.
        ctx = jnp.concatenate(heads, axis=-1).reshape(N, D).astype(bf16)
        attn = jnp.dot(ctx, wo_ref[l], preferred_element_type=f32) + bo_ref[l]
        src = src + attn.reshape(Bb, S, D)                                  # residual

        # --- feed-forward block ---
        y2 = _ln(src.reshape(N, D), ln2_g_ref[l], ln2_b_ref[l]).astype(bf16)
        hid = jnp.maximum(jnp.dot(y2, w1_ref[l], preferred_element_type=f32)
                          + b1_ref[l], 0.0).astype(bf16)
        ff = jnp.dot(hid, w2_ref[l], preferred_element_type=f32) + b2_ref[l]
        src = src + ff.reshape(Bb, S, D)                                    # residual

    # ---- masked mean pooling over the sequence (exact division) ----
    msum = jnp.sum(src * m[:, :, None], axis=1)                             # (Bb, D)
    cnt = jnp.maximum(jnp.sum(m, axis=-1, keepdims=True), 1.0)              # (Bb, 1)
    pooled = msum / cnt

    # ---- skip branch: Linear(mean_S(projected input)) ----
    xmean = jnp.mean(xp2.reshape(Bb, S, D), axis=1).astype(bf16)            # (Bb, D)
    skip = jnp.dot(xmean, wsk_ref[...], preferred_element_type=f32) + bsk_ref[...]

    # ---- classifier head ----
    cls1 = jnp.maximum(
        _ln(jnp.dot(pooled.astype(bf16), wc1_ref[...], preferred_element_type=f32)
            + bc1_ref[...], gc1_ref[...], betac1_ref[...]), 0.0)
    combined = (cls1 + skip).astype(bf16)
    h2 = jnp.maximum(
        _ln(jnp.dot(combined, wc2a_ref[...], preferred_element_type=f32)
            + bc2a_ref[...], gc2_ref[...], betac2_ref[...]), 0.0)
    # wc2b/bc2b are zero-padded to 128 output lanes -> lane-dense single store.
    logits = (jnp.dot(h2.astype(bf16), wc2b_ref[...], preferred_element_type=f32)
              + bc2b_ref[...])                                              # (Bb, 128)
    o_ref[...] = logits[None, :, :]


# ----------------------------- pallas_call wrapper -----------------------------

_WEIGHT_KEYS = (
    'w_in', 'b_in', 'g_in', 'beta_in',
    'ln1_g', 'ln1_b', 'wqkv', 'bqkv', 'wo', 'bo',
    'ln2_g', 'ln2_b', 'w1', 'b1', 'w2', 'b2',
    'wc1', 'bc1', 'gc1', 'betac1',
    'wc2a', 'bc2a', 'gc2', 'betac2', 'wc2b', 'bc2b',
    'wsk', 'bsk',
)

_BF16_KEYS = ('w_in', 'wqkv', 'wo', 'w1', 'w2', 'wc1', 'wc2a', 'wc2b', 'wsk')


def _replicated_spec(arr):
    # Full-array block + constant block index -> DMA'd once, resident across grid steps.
    nd = arr.ndim
    return pl.BlockSpec(arr.shape, lambda i, _nd=nd: (0,) * _nd)


def _prep_weights(params):
    """Fold the attention scale into Q, pad the classifier to 128 lanes, and
    cast matmul weights to bf16 (biases / LayerNorm params stay f32)."""
    D = MODEL_DIM
    scale = 1.0 / math.sqrt(D // NHEAD)
    p = dict(params)
    # fold 1/sqrt(dh) into the Q slice of the fused QKV projection (weights + bias)
    p['wqkv'] = jnp.concatenate([p['wqkv'][..., :D] * scale, p['wqkv'][..., D:]], axis=-1)
    p['bqkv'] = jnp.concatenate([p['bqkv'][..., :D] * scale, p['bqkv'][..., D:]], axis=-1)
    # pad final classifier to a lane-dense 128-wide output (sliced back in wrapper)
    p['wc2b'] = jnp.pad(p['wc2b'], ((0, 0), (0, LANE_PAD - NUM_CLASSES)))
    p['bc2b'] = jnp.pad(p['bc2b'], ((0, 0), (0, LANE_PAD - NUM_CLASSES)))
    for k in _BF16_KEYS:
        p[k] = p[k].astype(jnp.bfloat16)
    return p


@jax.jit
def enhanced_gaze_transformer_forward(params, x, mask):
    """x: (B, S, input_dim) float32; mask: (B, S) bool (True = valid)."""
    B, S, Fin = x.shape
    D = MODEL_DIM

    # ---- batch-block sizing: fill the MXU M dimension (TB*S ~ 256 rows/step)
    # while keeping >= 2 grid steps when B >= 2 (v7x has 2 TensorCores).
    tb = max(1, (256 + S - 1) // S)
    if B >= 2:
        tb = min(tb, (B + 1) // 2)
    tb = min(tb, B)
    nb = (B + tb - 1) // tb
    Bp = nb * tb
    if Bp != B:
        # Padded rows are fully masked (kernel's mask fix-up keeps them NaN-free)
        # and sliced off after the call.
        x = jnp.pad(x, ((0, Bp - B), (0, 0), (0, 0)))
        mask = jnp.pad(mask, ((0, Bp - B), (0, 0)))

    pe = positional_encoding(S, D)                        # (S, D)
    mask_f = mask.astype(jnp.float32).reshape(Bp, 1, S)   # (Bp, 1, S), {0,1}
    prepped = _prep_weights(params)
    weights = [prepped[k] for k in _WEIGHT_KEYS]

    kernel = functools.partial(_fused_forward_kernel,
                               num_heads=NHEAD, num_layers=NUM_LAYERS)

    in_specs = ([pl.BlockSpec((tb, S, Fin), lambda i: (i, 0, 0)),   # TB batch rows / step
                 pl.BlockSpec((tb, 1, S), lambda i: (i, 0, 0)),     # their mask rows
                 _replicated_spec(pe)]
                + [_replicated_spec(w) for w in weights])

    out = pl.pallas_call(
        kernel,
        grid=(nb,),
        in_specs=in_specs,
        out_specs=pl.BlockSpec((1, tb, LANE_PAD), lambda i: (i, 0, 0)),
        out_shape=jax.ShapeDtypeStruct((nb, tb, LANE_PAD), jnp.float32),
        compiler_params=pltpu.CompilerParams(
            dimension_semantics=("parallel",),            # shard batch blocks across TCs
            vmem_limit_bytes=32 * 1024 * 1024),
    )(x, mask_f, pe, *weights)
    return out.reshape(Bp, LANE_PAD)[:B, :NUM_CLASSES]


# ----------------------------- params -----------------------------

def init_params(key, input_dim):
    D = MODEL_DIM
    L = NUM_LAYERS
    ks = iter(jax.random.split(key, 64))

    def dense(din, dout, scale=0.05):
        w = scale * jax.random.normal(next(ks), (din, dout), jnp.float32)
        b = scale * jax.random.normal(next(ks), (1, dout), jnp.float32)
        return w, b

    p = {}
    p['w_in'], p['b_in'] = dense(input_dim, D)
    p['g_in'] = jnp.ones((1, D), jnp.float32)
    p['beta_in'] = jnp.zeros((1, D), jnp.float32)

    wqkv, bqkv, wo, bo, w1, b1, w2, b2 = ([] for _ in range(8))
    for _ in range(L):
        w, b = dense(D, 3 * D); wqkv.append(w); bqkv.append(b)
        w, b = dense(D, D);      wo.append(w);   bo.append(b)
        w, b = dense(D, FFN_DIM); w1.append(w);  b1.append(b)
        w, b = dense(FFN_DIM, D); w2.append(w);  b2.append(b)
    p['wqkv'] = jnp.stack(wqkv); p['bqkv'] = jnp.stack(bqkv)
    p['wo'] = jnp.stack(wo);     p['bo'] = jnp.stack(bo)
    p['w1'] = jnp.stack(w1);     p['b1'] = jnp.stack(b1)
    p['w2'] = jnp.stack(w2);     p['b2'] = jnp.stack(b2)
    p['ln1_g'] = jnp.ones((L, 1, D), jnp.float32)
    p['ln1_b'] = jnp.zeros((L, 1, D), jnp.float32)
    p['ln2_g'] = jnp.ones((L, 1, D), jnp.float32)
    p['ln2_b'] = jnp.zeros((L, 1, D), jnp.float32)

    p['wc1'], p['bc1'] = dense(D, D)
    p['gc1'] = jnp.ones((1, D), jnp.float32)
    p['betac1'] = jnp.zeros((1, D), jnp.float32)
    p['wc2a'], p['bc2a'] = dense(D, D // 2)
    p['gc2'] = jnp.ones((1, D // 2), jnp.float32)
    p['betac2'] = jnp.zeros((1, D // 2), jnp.float32)
    p['wc2b'], p['bc2b'] = dense(D // 2, NUM_CLASSES)
    p['wsk'], p['bsk'] = dense(D, D)
    return p


# ----------------------------- plain-JAX reference -----------------------------

def reference_forward(params, x, mask):
    D = MODEL_DIM

    def ln(y, g, b):
        mu = jnp.mean(y, -1, keepdims=True)
        var = jnp.mean((y - mu) ** 2, -1, keepdims=True)
        return (y - mu) / jnp.sqrt(var + LN_EPS) * g + b

    B, S, Fin = x.shape
    xp = ln(x @ params['w_in'] + params['b_in'], params['g_in'], params['beta_in'])
    src = xp + positional_encoding(S, D)[None]

    all_masked = jnp.logical_not(mask).all(1)
    mask = mask.at[:, 0].set(mask[:, 0] | all_masked)
    mask_f = mask.astype(jnp.float32)
    kb = (1.0 - mask_f) * NEG_INF

    dh = D // NHEAD
    for l in range(NUM_LAYERS):
        y = ln(src, params['ln1_g'][l], params['ln1_b'][l])
        qkv = y @ params['wqkv'][l] + params['bqkv'][l]
        q, k, v = qkv[..., :D], qkv[..., D:2 * D], qkv[..., 2 * D:]
        outs = []
        for h in range(NHEAD):
            qh, kh, vh = (t[..., h * dh:(h + 1) * dh] for t in (q, k, v))
            s = jnp.einsum('bqd,bkd->bqk', qh, kh) / math.sqrt(dh) + kb[:, None, :]
            p = jax.nn.softmax(s, -1)
            outs.append(jnp.einsum('bqk,bkd->bqd', p, vh))
        src = src + (jnp.concatenate(outs, -1) @ params['wo'][l] + params['bo'][l])
        y = ln(src, params['ln2_g'][l], params['ln2_b'][l])
        src = src + (jnp.maximum(y @ params['w1'][l] + params['b1'][l], 0.0)
                     @ params['w2'][l] + params['b2'][l])

    pooled = (src * mask_f[..., None]).sum(1) / jnp.maximum(mask_f.sum(1, keepdims=True), 1.0)
    skip = xp.mean(1) @ params['wsk'] + params['bsk']
    cls1 = jnp.maximum(ln(pooled @ params['wc1'] + params['bc1'],
                          params['gc1'], params['betac1']), 0.0)
    comb = cls1 + skip
    h2 = jnp.maximum(ln(comb @ params['wc2a'] + params['bc2a'],
                        params['gc2'], params['betac2']), 0.0)
    return h2 @ params['wc2b'] + params['bc2b']


# ----------------------------- main -----------------------------

if __name__ == "__main__":
    key = jax.random.PRNGKey(0)
    kx, kp = jax.random.split(key)

    B, S, INPUT_DIM = 2, 8, 8
    x = jax.random.normal(kx, (B, S, INPUT_DIM), jnp.float32)
    lengths = jnp.array([6, 0])                             # second row fully masked
    mask = jnp.arange(S)[None, :] < lengths[:, None]        # (B, S) bool

    params = init_params(kp, INPUT_DIM)

    logits = enhanced_gaze_transformer_forward(params, x, mask)
    logits = jax.block_until_ready(logits)

    ref = reference_forward(params, x, mask)                # f32 reference
    assert logits.shape == (B, NUM_CLASSES)
    # Kernel uses bf16 matmul operands (f32 accumulate); tolerance covers that gap.
    assert jnp.allclose(logits, ref, rtol=3e-2, atol=3e-2), (logits, ref)

    print("KERNEL_OK")
</pallas_src>

<mosaic_0001>
module attributes {stable_mosaic.version = 11 : i64} {
  func.func @_fused_forward_kernel(%arg0: i32, %arg1: memref<1x8x8xf32, #tpu.memory_space<vmem>>, %arg2: memref<1x1x8xf32, #tpu.memory_space<vmem>>, %arg3: memref<8x128xf32, #tpu.memory_space<vmem>>, %arg4: memref<8x128xbf16, #tpu.memory_space<vmem>>, %arg5: memref<1x128xf32, #tpu.memory_space<vmem>>, %arg6: memref<1x128xf32, #tpu.memory_space<vmem>>, %arg7: memref<1x128xf32, #tpu.memory_space<vmem>>, %arg8: memref<3x1x128xf32, #tpu.memory_space<vmem>>, %arg9: memref<3x1x128xf32, #tpu.memory_space<vmem>>, %arg10: memref<3x128x384xbf16, #tpu.memory_space<vmem>>, %arg11: memref<3x1x384xf32, #tpu.memory_space<vmem>>, %arg12: memref<3x128x128xbf16, #tpu.memory_space<vmem>>, %arg13: memref<3x1x128xf32, #tpu.memory_space<vmem>>, %arg14: memref<3x1x128xf32, #tpu.memory_space<vmem>>, %arg15: memref<3x1x128xf32, #tpu.memory_space<vmem>>, %arg16: memref<3x128x256xbf16, #tpu.memory_space<vmem>>, %arg17: memref<3x1x256xf32, #tpu.memory_space<vmem>>, %arg18: memref<3x256x128xbf16, #tpu.memory_space<vmem>>, %arg19: memref<3x1x128xf32, #tpu.memory_space<vmem>>, %arg20: memref<128x128xbf16, #tpu.memory_space<vmem>>, %arg21: memref<1x128xf32, #tpu.memory_space<vmem>>, %arg22: memref<1x128xf32, #tpu.memory_space<vmem>>, %arg23: memref<1x128xf32, #tpu.memory_space<vmem>>, %arg24: memref<128x64xbf16, #tpu.memory_space<vmem>>, %arg25: memref<1x64xf32, #tpu.memory_space<vmem>>, %arg26: memref<1x64xf32, #tpu.memory_space<vmem>>, %arg27: memref<1x64xf32, #tpu.memory_space<vmem>>, %arg28: memref<64x128xbf16, #tpu.memory_space<vmem>>, %arg29: memref<1x128xf32, #tpu.memory_space<vmem>>, %arg30: memref<128x128xbf16, #tpu.memory_space<vmem>>, %arg31: memref<1x128xf32, #tpu.memory_space<vmem>>, %arg32: memref<1x1x128xf32, #tpu.memory_space<vmem>>) attributes {dimension_semantics = [#tpu.dimension_semantics<parallel>], iteration_bounds = array<i64: 2>, scalar_prefetch = 0 : i64, scratch_operands = 0 : i64, tpu.core_type = #tpu.core_type<tc>, window_params = [{transform_indices = @transform_0, window_bounds = array<i64: 1, 8, 8>}, {transform_indices = @transform_1, window_bounds = array<i64: 1, 1, 8>}, {pipeline_mode = #tpu.pipeline_mode<synchronous>, transform_indices = @transform_2, window_bounds = array<i64: 8, 128>}, {pipeline_mode = #tpu.pipeline_mode<synchronous>, transform_indices = @transform_3, window_bounds = array<i64: 8, 128>}, {pipeline_mode = #tpu.pipeline_mode<synchronous>, transform_indices = @transform_4, window_bounds = array<i64: 1, 128>}, {pipeline_mode = #tpu.pipeline_mode<synchronous>, transform_indices = @transform_5, window_bounds = array<i64: 1, 128>}, {pipeline_mode = #tpu.pipeline_mode<synchronous>, transform_indices = @transform_6, window_bounds = array<i64: 1, 128>}, {pipeline_mode = #tpu.pipeline_mode<synchronous>, transform_indices = @transform_7, window_bounds = array<i64: 3, 1, 128>}, {pipeline_mode = #tpu.pipeline_mode<synchronous>, transform_indices = @transform_8, window_bounds = array<i64: 3, 1, 128>}, {pipeline_mode = #tpu.pipeline_mode<synchronous>, transform_indices = @transform_9, window_bounds = array<i64: 3, 128, 384>}, {pipeline_mode = #tpu.pipeline_mode<synchronous>, transform_indices = @transform_10, window_bounds = array<i64: 3, 1, 384>}, {pipeline_mode = #tpu.pipeline_mode<synchronous>, transform_indices = @transform_11, window_bounds = array<i64: 3, 128, 128>}, {pipeline_mode = #tpu.pipeline_mode<synchronous>, transform_indices = @transform_12, window_bounds = array<i64: 3, 1, 128>}, {pipeline_mode = #tpu.pipeline_mode<synchronous>, transform_indices = @transform_13, window_bounds = array<i64: 3, 1, 128>}, {pipeline_mode = #tpu.pipeline_mode<synchronous>, transform_indices = @transform_14, window_bounds = array<i64: 3, 1, 128>}, {pipeline_mode = #tpu.pipeline_mode<synchronous>, transform_indices = @transform_15, window_bounds = array<i64: 3, 128, 256>}, {pipeline_mode = #tpu.pipeline_mode<synchronous>, transform_indices = @transform_16, window_bounds = array<i64: 3, 1, 256>}, {pipeline_mode = #tpu.pipeline_mode<synchronous>, transform_indices = @transform_17, window_bounds = array<i64: 3, 256, 128>}, {pipeline_mode = #tpu.pipeline_mode<synchronous>, transform_indices = @transform_18, window_bounds = array<i64: 3, 1, 128>}, {pipeline_mode = #tpu.pipeline_mode<synchronous>, transform_indices = @transform_19, window_bounds = array<i64: 128, 128>}, {pipeline_mode = #tpu.pipeline_mode<synchronous>, transform_indices = @transform_20, window_bounds = array<i64: 1, 128>}, {pipeline_mode = #tpu.pipeline_mode<synchronous>, transform_indices = @transform_21, window_bounds = array<i64: 1, 128>}, {pipeline_mode = #tpu.pipeline_mode<synchronous>, transform_indices = @transform_22, window_bounds = array<i64: 1, 128>}, {pipeline_mode = #tpu.pipeline_mode<synchronous>, transform_indices = @transform_23, window_bounds = array<i64: 128, 64>}, {pipeline_mode = #tpu.pipeline_mode<synchronous>, transform_indices = @transform_24, window_bounds = array<i64: 1, 64>}, {pipeline_mode = #tpu.pipeline_mode<synchronous>, transform_indices = @transform_25, window_bounds = array<i64: 1, 64>}, {pipeline_mode = #tpu.pipeline_mode<synchronous>, transform_indices = @transform_26, window_bounds = array<i64: 1, 64>}, {pipeline_mode = #tpu.pipeline_mode<synchronous>, transform_indices = @transform_27, window_bounds = array<i64: 64, 128>}, {pipeline_mode = #tpu.pipeline_mode<synchronous>, transform_indices = @transform_28, window_bounds = array<i64: 1, 128>}, {pipeline_mode = #tpu.pipeline_mode<synchronous>, transform_indices = @transform_29, window_bounds = array<i64: 128, 128>}, {pipeline_mode = #tpu.pipeline_mode<synchronous>, transform_indices = @transform_30, window_bounds = array<i64: 1, 128>}, {transform_indices = @transform_31, window_bounds = array<i64: 1, 1, 128>}]} {
    %c0 = arith.constant 0 : index
    %c0_0 = arith.constant 0 : index
    %c0_1 = arith.constant 0 : index
    %0 = vector.load %arg1[%c0, %c0_0, %c0_1] : memref<1x8x8xf32, #tpu.memory_space<vmem>>, vector<1x8x8xf32>
    %1 = vector.shape_cast %0 : vector<1x8x8xf32> to vector<8x8xf32>
    %2 = arith.truncf %1 : vector<8x8xf32> to vector<8x8xbf16>
    %c0_2 = arith.constant 0 : index
    %c0_3 = arith.constant 0 : index
    %3 = vector.load %arg4[%c0_2, %c0_3] : memref<8x128xbf16, #tpu.memory_space<vmem>>, vector<8x128xbf16>
    %cst = arith.constant dense<0.000000e+00> : vector<8x128xf32>
    %4 = tpu.matmul %2, %3, %cst {dimension_numbers = #tpu.dot_dimension_numbers<[1], [0], [0], [1], [0, 0, 1, 1], [], []>} : vector<8x8xbf16>, vector<8x128xbf16>, vector<8x128xf32> -> vector<8x128xf32>
    %c0_4 = arith.constant 0 : index
    %c0_5 = arith.constant 0 : index
    %5 = vector.load %arg5[%c0_4, %c0_5] : memref<1x128xf32, #tpu.memory_space<vmem>>, vector<1x128xf32>
    %6 = vector.broadcast %5 : vector<1x128xf32> to vector<8x128xf32>
    %7 = arith.addf %4, %6 : vector<8x128xf32>
    %c0_6 = arith.constant 0 : index
    %c0_7 = arith.constant 0 : index
    %8 = vector.load %arg6[%c0_6, %c0_7] : memref<1x128xf32, #tpu.memory_space<vmem>>, vector<1x128xf32>
    %c0_8 = arith.constant 0 : index
    %c0_9 = arith.constant 0 : index
    %9 = vector.load %arg7[%c0_8, %c0_9] : memref<1x128xf32, #tpu.memory_space<vmem>>, vector<1x128xf32>
    %cst_10 = arith.constant dense<0.000000e+00> : vector<8xf32>
    %10 = vector.multi_reduction <add>, %7, %cst_10 [1] : vector<8x128xf32> to vector<8xf32>
    %11 = vector.shape_cast %10 : vector<8xf32> to vector<8x1xf32>
    %cst_11 = arith.constant 1.280000e+02 : f32
    %12 = vector.broadcast %cst_11 : f32 to vector<8x1xf32>
    %13 = arith.divf %11, %12 : vector<8x1xf32>
    %14 = vector.broadcast %13 : vector<8x1xf32> to vector<8x128xf32>
    %15 = arith.subf %7, %14 : vector<8x128xf32>
    %16 = arith.mulf %15, %15 : vector<8x128xf32>
    %cst_12 = arith.constant dense<0.000000e+00> : vector<8xf32>
    %17 = vector.multi_reduction <add>, %16, %cst_12 [1] : vector<8x128xf32> to vector<8xf32>
    %18 = vector.shape_cast %17 : vector<8xf32> to vector<8x1xf32>
    %cst_13 = arith.constant 1.280000e+02 : f32
    %19 = vector.broadcast %cst_13 : f32 to vector<8x1xf32>
    %20 = arith.divf %18, %19 : vector<8x1xf32>
    %21 = vector.broadcast %13 : vector<8x1xf32> to vector<8x128xf32>
    %22 = arith.subf %7, %21 : vector<8x128xf32>
    %cst_14 = arith.constant 9.99999974E-6 : f32
    %23 = vector.broadcast %cst_14 : f32 to vector<8x1xf32>
    %24 = arith.addf %20, %23 : vector<8x1xf32>
    %25 = math.rsqrt %24 : vector<8x1xf32>
    %26 = vector.broadcast %25 : vector<8x1xf32> to vector<8x128xf32>
    %27 = arith.mulf %22, %26 : vector<8x128xf32>
    %28 = vector.broadcast %8 : vector<1x128xf32> to vector<8x128xf32>
    %29 = arith.mulf %27, %28 : vector<8x128xf32>
    %30 = vector.broadcast %9 : vector<1x128xf32> to vector<8x128xf32>
    %31 = arith.addf %29, %30 : vector<8x128xf32>
    %32 = vector.shape_cast %31 : vector<8x128xf32> to vector<1x8x128xf32>
    %c0_15 = arith.constant 0 : index
    %c0_16 = arith.constant 0 : index
    %33 = vector.load %arg3[%c0_15, %c0_16] : memref<8x128xf32, #tpu.memory_space<vmem>>, vector<8x128xf32>
    %34 = vector.shape_cast %33 : vector<8x128xf32> to vector<1x8x128xf32>
    %35 = arith.addf %32, %34 : vector<1x8x128xf32>
    %c0_17 = arith.constant 0 : index
    %c0_18 = arith.constant 0 : index
    %c0_19 = arith.constant 0 : index
    %36 = vector.load %arg2[%c0_17, %c0_18, %c0_19] : memref<1x1x8xf32, #tpu.memory_space<vmem>>, vector<1x1x8xf32>
    %37 = vector.shape_cast %36 : vector<1x1x8xf32> to vector<1x8xf32>
    %cst_20 = arith.constant dense<0xFF800000> : vector<1xf32>
    %38 = vector.multi_reduction <maximumf>, %37, %cst_20 [1] : vector<1x8xf32> to vector<1xf32>
    %39 = vector.shape_cast %38 : vector<1xf32> to vector<1x1xf32>
    %40 = tpu.iota {dimensions = array<i32: 1>} : vector<1x8xi32>
    %c0_i32 = arith.constant 0 : i32
    %41 = vector.broadcast %c0_i32 : i32 to vector<1x8xi32>
    %42 = arith.cmpi eq, %40, %41 : vector<1x8xi32>
    %cst_21 = arith.constant 5.000000e-01 : f32
    %43 = vector.broadcast %cst_21 : f32 to vector<1x1xf32>
    %44 = arith.cmpf olt, %39, %43 : vector<1x1xf32>
    %45 = vector.broadcast %44 : vector<1x1xi1> to vector<1x8xi1>
    %46 = arith.andi %42, %45 : vector<1x8xi1>
    %cst_22 = arith.constant 1.000000e+00 : f32
    %47 = vector.broadcast %cst_22 : f32 to vector<1x8xf32>
    %48 = arith.select %46, %47, %37 : vector<1x8xi1>, vector<1x8xf32>
    %cst_23 = arith.constant 1.000000e+00 : f32
    %49 = vector.broadcast %cst_23 : f32 to vector<1x8xf32>
    %50 = arith.subf %49, %48 : vector<1x8xf32>
    %cst_24 = arith.constant -1.000000e+30 : f32
    %51 = vector.broadcast %cst_24 : f32 to vector<1x8xf32>
    %52 = arith.mulf %50, %51 : vector<1x8xf32>
    %53 = vector.shape_cast %52 : vector<1x8xf32> to vector<1x1x8xf32>
    %54 = vector.shape_cast %35 : vector<1x8x128xf32> to vector<8x128xf32>
    %c0_25 = arith.constant 0 : index
    %c0_26 = arith.constant 0 : index
    %c0_27 = arith.constant 0 : index
    %55 = vector.load %arg8[%c0_25, %c0_26, %c0_27] : memref<3x1x128xf32, #tpu.memory_space<vmem>>, vector<1x1x128xf32>
    %56 = vector.shape_cast %55 : vector<1x1x128xf32> to vector<1x128xf32>
    %c0_28 = arith.constant 0 : index
    %c0_29 = arith.constant 0 : index
    %c0_30 = arith.constant 0 : index
    %57 = vector.load %arg9[%c0_28, %c0_29, %c0_30] : memref<3x1x128xf32, #tpu.memory_space<vmem>>, vector<1x1x128xf32>
    %58 = vector.shape_cast %57 : vector<1x1x128xf32> to vector<1x128xf32>
    %cst_31 = arith.constant dense<0.000000e+00> : vector<8xf32>
    %59 = vector.multi_reduction <add>, %54, %cst_31 [1] : vector<8x128xf32> to vector<8xf32>
    %60 = vector.shape_cast %59 : vector<8xf32> to vector<8x1xf32>
    %cst_32 = arith.constant 1.280000e+02 : f32
    %61 = vector.broadcast %cst_32 : f32 to vector<8x1xf32>
    %62 = arith.divf %60, %61 : vector<8x1xf32>
    %63 = vector.broadcast %62 : vector<8x1xf32> to vector<8x128xf32>
    %64 = arith.subf %54, %63 : vector<8x128xf32>
    %65 = arith.mulf %64, %64 : vector<8x128xf32>
    %cst_33 = arith.constant dense<0.000000e+00> : vector<8xf32>
    %66 = vector.multi_reduction <add>, %65, %cst_33 [1] : vector<8x128xf32> to vector<8xf32>
    %67 = vector.shape_cast %66 : vector<8xf32> to vector<8x1xf32>
    %cst_34 = arith.constant 1.280000e+02 : f32
    %68 = vector.broadcast %cst_34 : f32 to vector<8x1xf32>
    %69 = arith.divf %67, %68 : vector<8x1xf32>
    %70 = vector.broadcast %62 : vector<8x1xf32> to vector<8x128xf32>
    %71 = arith.subf %54, %70 : vector<8x128xf32>
    %cst_35 = arith.constant 9.99999974E-6 : f32
    %72 = vector.broadcast %cst_35 : f32 to vector<8x1xf32>
    %73 = arith.addf %69, %72 : vector<8x1xf32>
    %74 = math.rsqrt %73 : vector<8x1xf32>
    %75 = vector.broadcast %74 : vector<8x1xf32> to vector<8x128xf32>
    %76 = arith.mulf %71, %75 : vector<8x128xf32>
    %77 = vector.broadcast %56 : vector<1x128xf32> to vector<8x128xf32>
    %78 = arith.mulf %76, %77 : vector<8x128xf32>
    %79 = vector.broadcast %58 : vector<1x128xf32> to vector<8x128xf32>
    %80 = arith.addf %78, %79 : vector<8x128xf32>
    %81 = arith.truncf %80 : vector<8x128xf32> to vector<8x128xbf16>
    %c0_36 = arith.constant 0 : index
    %c0_37 = arith.constant 0 : index
    %c0_38 = arith.constant 0 : index
    %82 = vector.load %arg10[%c0_36, %c0_37, %c0_38] : memref<3x128x384xbf16, #tpu.memory_space<vmem>>, vector<1x128x384xbf16>
    %83 = vector.shape_cast %82 : vector<1x128x384xbf16> to vector<128x384xbf16>
    %cst_39 = arith.constant dense<0.000000e+00> : vector<8x384xf32>
    %84 = tpu.matmul %81, %83, %cst_39 {dimension_numbers = #tpu.dot_dimension_numbers<[1], [0], [0], [1], [0, 0, 1, 1], [], []>} : vector<8x128xbf16>, vector<128x384xbf16>, vector<8x384xf32> -> vector<8x384xf32>
    %c0_40 = arith.constant 0 : index
    %c0_41 = arith.constant 0 : index
    %c0_42 = arith.constant 0 : index
    %85 = vector.load %arg11[%c0_40, %c0_41, %c0_42] : memref<3x1x384xf32, #tpu.memory_space<vmem>>, vector<1x1x384xf32>
    %86 = vector.shape_cast %85 : vector<1x1x384xf32> to vector<1x384xf32>
    %87 = vector.broadcast %86 : vector<1x384xf32> to vector<8x384xf32>
    %88 = arith.addf %84, %87 : vector<8x384xf32>
    %89 = arith.truncf %88 : vector<8x384xf32> to vector<8x384xbf16>
    %90 = vector.extract_strided_slice %89 {offsets = [0, 0], sizes = [8, 128], strides = [1, 1]} : vector<8x384xbf16> to vector<8x128xbf16>
    %91 = vector.shape_cast %90 : vector<8x128xbf16> to vector<1x8x128xbf16>
    %92 = vector.extract_strided_slice %89 {offsets = [0, 128], sizes = [8, 128], strides = [1, 1]} : vector<8x384xbf16> to vector<8x128xbf16>
    %93 = vector.shape_cast %92 : vector<8x128xbf16> to vector<1x8x128xbf16>
    %94 = vector.extract_strided_slice %89 {offsets = [0, 256], sizes = [8, 128], strides = [1, 1]} : vector<8x384xbf16> to vector<8x128xbf16>
    %95 = vector.shape_cast %94 : vector<8x128xbf16> to vector<1x8x128xbf16>
    %96 = vector.extract_strided_slice %91 {offsets = [0, 0, 0], sizes = [1, 8, 32], strides = [1, 1, 1]} : vector<1x8x128xbf16> to vector<1x8x32xbf16>
    %97 = vector.extract_strided_slice %93 {offsets = [0, 0, 0], sizes = [1, 8, 32], strides = [1, 1, 1]} : vector<1x8x128xbf16> to vector<1x8x32xbf16>
    "tpu.trace_start"() <{level = 10 : i32, message = "bqd,bkd->bqk"}> : () -> ()
    %cst_43 = arith.constant dense<0.000000e+00> : vector<1x8x8xf32>
    %98 = tpu.matmul %96, %97, %cst_43 {dimension_numbers = #tpu.dot_dimension_numbers<[2], [2], [1], [1], [0, 0, 0, 1, 1, 1], [0], [0]>} : vector<1x8x32xbf16>, vector<1x8x32xbf16>, vector<1x8x8xf32> -> vector<1x8x8xf32>
    "tpu.trace_stop"() : () -> ()
    %99 = vector.broadcast %53 : vector<1x1x8xf32> to vector<1x8x8xf32>
    %100 = arith.addf %98, %99 : vector<1x8x8xf32>
    %cst_44 = arith.constant dense<0xFF800000> : vector<1x8xf32>
    %101 = vector.multi_reduction <maximumf>, %100, %cst_44 [2] : vector<1x8x8xf32> to vector<1x8xf32>
    %102 = vector.shape_cast %101 : vector<1x8xf32> to vector<1x8x1xf32>
    %103 = vector.broadcast %102 : vector<1x8x1xf32> to vector<1x8x8xf32>
    %104 = arith.subf %100, %103 : vector<1x8x8xf32>
    %105 = math.exp %104 : vector<1x8x8xf32>
    %cst_45 = arith.constant dense<0.000000e+00> : vector<1x8xf32>
    %106 = vector.multi_reduction <add>, %105, %cst_45 [2] : vector<1x8x8xf32> to vector<1x8xf32>
    %107 = vector.shape_cast %106 : vector<1x8xf32> to vector<1x8x1xf32>
    %108 = tpu.reciprocal %107 {approx = true} : vector<1x8x1xf32> -> vector<1x8x1xf32>
    %109 = vector.broadcast %108 : vector<1x8x1xf32> to vector<1x8x8xf32>
    %110 = arith.mulf %105, %109 : vector<1x8x8xf32>
    %111 = arith.truncf %110 : vector<1x8x8xf32> to vector<1x8x8xbf16>
    %112 = vector.extract_strided_slice %95 {offsets = [0, 0, 0], sizes = [1, 8, 32], strides = [1, 1, 1]} : vector<1x8x128xbf16> to vector<1x8x32xbf16>
    "tpu.trace_start"() <{level = 10 : i32, message = "bqk,bkd->bqd"}> : () -> ()
    %cst_46 = arith.constant dense<0.000000e+00> : vector<1x8x32xf32>
    %113 = tpu.matmul %111, %112, %cst_46 {dimension_numbers = #tpu.dot_dimension_numbers<[2], [1], [1], [2], [0, 0, 0, 1, 1, 2], [0], [0]>} : vector<1x8x8xbf16>, vector<1x8x32xbf16>, vector<1x8x32xf32> -> vector<1x8x32xf32>
    "tpu.trace_stop"() : () -> ()
    %114 = vector.extract_strided_slice %91 {offsets = [0, 0, 32], sizes = [1, 8, 32], strides = [1, 1, 1]} : vector<1x8x128xbf16> to vector<1x8x32xbf16>
    %115 = vector.extract_strided_slice %93 {offsets = [0, 0, 32], sizes = [1, 8, 32], strides = [1, 1, 1]} : vector<1x8x128xbf16> to vector<1x8x32xbf16>
    "tpu.trace_start"() <{level = 10 : i32, message = "bqd,bkd->bqk"}> : () -> ()
    %cst_47 = arith.constant dense<0.000000e+00> : vector<1x8x8xf32>
    %116 = tpu.matmul %114, %115, %cst_47 {dimension_numbers = #tpu.dot_dimension_numbers<[2], [2], [1], [1], [0, 0, 0, 1, 1, 1], [0], [0]>} : vector<1x8x32xbf16>, vector<1x8x32xbf16>, vector<1x8x8xf32> -> vector<1x8x8xf32>
    "tpu.trace_stop"() : () -> ()
    %117 = vector.broadcast %53 : vector<1x1x8xf32> to vector<1x8x8xf32>
    %118 = arith.addf %116, %117 : vector<1x8x8xf32>
    %cst_48 = arith.constant dense<0xFF800000> : vector<1x8xf32>
    %119 = vector.multi_reduction <maximumf>, %118, %cst_48 [2] : vector<1x8x8xf32> to vector<1x8xf32>
    %120 = vector.shape_cast %119 : vector<1x8xf32> to vector<1x8x1xf32>
    %121 = vector.broadcast %120 : vector<1x8x1xf32> to vector<1x8x8xf32>
    %122 = arith.subf %118, %121 : vector<1x8x8xf32>
    %123 = math.exp %122 : vector<1x8x8xf32>
    %cst_49 = arith.constant dense<0.000000e+00> : vector<1x8xf32>
    %124 = vector.multi_reduction <add>, %123, %cst_49 [2] : vector<1x8x8xf32> to vector<1x8xf32>
    %125 = vector.shape_cast %124 : vector<1x8xf32> to vector<1x8x1xf32>
    %126 = tpu.reciprocal %125 {approx = true} : vector<1x8x1xf32> -> vector<1x8x1xf32>
    %127 = vector.broadcast %126 : vector<1x8x1xf32> to vector<1x8x8xf32>
    %128 = arith.mulf %123, %127 : vector<1x8x8xf32>
    %129 = arith.truncf %128 : vector<1x8x8xf32> to vector<1x8x8xbf16>
    %130 = vector.extract_strided_slice %95 {offsets = [0, 0, 32], sizes = [1, 8, 32], strides = [1, 1, 1]} : vector<1x8x128xbf16> to vector<1x8x32xbf16>
    "tpu.trace_start"() <{level = 10 : i32, message = "bqk,bkd->bqd"}> : () -> ()
    %cst_50 = arith.constant dense<0.000000e+00> : vector<1x8x32xf32>
    %131 = tpu.matmul %129, %130, %cst_50 {dimension_numbers = #tpu.dot_dimension_numbers<[2], [1], [1], [2], [0, 0, 0, 1, 1, 2], [0], [0]>} : vector<1x8x8xbf16>, vector<1x8x32xbf16>, vector<1x8x32xf32> -> vector<1x8x32xf32>
    "tpu.trace_stop"() : () -> ()
    %132 = vector.extract_strided_slice %91 {offsets = [0, 0, 64], sizes = [1, 8, 32], strides = [1, 1, 1]} : vector<1x8x128xbf16> to vector<1x8x32xbf16>
    %133 = vector.extract_strided_slice %93 {offsets = [0, 0, 64], sizes = [1, 8, 32], strides = [1, 1, 1]} : vector<1x8x128xbf16> to vector<1x8x32xbf16>
    "tpu.trace_start"() <{level = 10 : i32, message = "bqd,bkd->bqk"}> : () -> ()
    %cst_51 = arith.constant dense<0.000000e+00> : vector<1x8x8xf32>
    %134 = tpu.matmul %132, %133, %cst_51 {dimension_numbers = #tpu.dot_dimension_numbers<[2], [2], [1], [1], [0, 0, 0, 1, 1, 1], [0], [0]>} : vector<1x8x32xbf16>, vector<1x8x32xbf16>, vector<1x8x8xf32> -> vector<1x8x8xf32>
    "tpu.trace_stop"() : () -> ()
    %135 = vector.broadcast %53 : vector<1x1x8xf32> to vector<1x8x8xf32>
    %136 = arith.addf %134, %135 : vector<1x8x8xf32>
    %cst_52 = arith.constant dense<0xFF800000> : vector<1x8xf32>
    %137 = vector.multi_reduction <maximumf>, %136, %cst_52 [2] : vector<1x8x8xf32> to vector<1x8xf32>
    %138 = vector.shape_cast %137 : vector<1x8xf32> to vector<1x8x1xf32>
    %139 = vector.broadcast %138 : vector<1x8x1xf32> to vector<1x8x8xf32>
    %140 = arith.subf %136, %139 : vector<1x8x8xf32>
    %141 = math.exp %140 : vector<1x8x8xf32>
    %cst_53 = arith.constant dense<0.000000e+00> : vector<1x8xf32>
    %142 = vector.multi_reduction <add>, %141, %cst_53 [2] : vector<1x8x8xf32> to vector<1x8xf32>
    %143 = vector.shape_cast %142 : vector<1x8xf32> to vector<1x8x1xf32>
    %144 = tpu.reciprocal %143 {approx = true} : vector<1x8x1xf32> -> vector<1x8x1xf32>
    %145 = vector.broadcast %144 : vector<1x8x1xf32> to vector<1x8x8xf32>
    %146 = arith.mulf %141, %145 : vector<1x8x8xf32>
    %147 = arith.truncf %146 : vector<1x8x8xf32> to vector<1x8x8xbf16>
    %148 = vector.extract_strided_slice %95 {offsets = [0, 0, 64], sizes = [1, 8, 32], strides = [1, 1, 1]} : vector<1x8x128xbf16> to vector<1x8x32xbf16>
    "tpu.trace_start"() <{level = 10 : i32, message = "bqk,bkd->bqd"}> : () -> ()
    %cst_54 = arith.constant dense<0.000000e+00> : vector<1x8x32xf32>
    %149 = tpu.matmul %147, %148, %cst_54 {dimension_numbers = #tpu.dot_dimension_numbers<[2], [1], [1], [2], [0, 0, 0, 1, 1, 2], [0], [0]>} : vector<1x8x8xbf16>, vector<1x8x32xbf16>, vector<1x8x32xf32> -> vector<1x8x32xf32>
    "tpu.trace_stop"() : () -> ()
    %150 = vector.extract_strided_slice %91 {offsets = [0, 0, 96], sizes = [1, 8, 32], strides = [1, 1, 1]} : vector<1x8x128xbf16> to vector<1x8x32xbf16>
    %151 = vector.extract_strided_slice %93 {offsets = [0, 0, 96], sizes = [1, 8, 32], strides = [1, 1, 1]} : vector<1x8x128xbf16> to vector<1x8x32xbf16>
    "tpu.trace_start"() <{level = 10 : i32, message = "bqd,bkd->bqk"}> : () -> ()
    %cst_55 = arith.constant dense<0.000000e+00> : vector<1x8x8xf32>
    %152 = tpu.matmul %150, %151, %cst_55 {dimension_numbers = #tpu.dot_dimension_numbers<[2], [2], [1], [1], [0, 0, 0, 1, 1, 1], [0], [0]>} : vector<1x8x32xbf16>, vector<1x8x32xbf16>, vector<1x8x8xf32> -> vector<1x8x8xf32>
    "tpu.trace_stop"() : () -> ()
    %153 = vector.broadcast %53 : vector<1x1x8xf32> to vector<1x8x8xf32>
    %154 = arith.addf %152, %153 : vector<1x8x8xf32>
    %cst_56 = arith.constant dense<0xFF800000> : vector<1x8xf32>
    %155 = vector.multi_reduction <maximumf>, %154, %cst_56 [2] : vector<1x8x8xf32> to vector<1x8xf32>
    %156 = vector.shape_cast %155 : vector<1x8xf32> to vector<1x8x1xf32>
    %157 = vector.broadcast %156 : vector<1x8x1xf32> to vector<1x8x8xf32>
    %158 = arith.subf %154, %157 : vector<1x8x8xf32>
    %159 = math.exp %158 : vector<1x8x8xf32>
    %cst_57 = arith.constant dense<0.000000e+00> : vector<1x8xf32>
    %160 = vector.multi_reduction <add>, %159, %cst_57 [2] : vector<1x8x8xf32> to vector<1x8xf32>
    %161 = vector.shape_cast %160 : vector<1x8xf32> to vector<1x8x1xf32>
    %162 = tpu.reciprocal %161 {approx = true} : vector<1x8x1xf32> -> vector<1x8x1xf32>
    %163 = vector.broadcast %162 : vector<1x8x1xf32> to vector<1x8x8xf32>
    %164 = arith.mulf %159, %163 : vector<1x8x8xf32>
    %165 = arith.truncf %164 : vector<1x8x8xf32> to vector<1x8x8xbf16>
    %166 = vector.extract_strided_slice %95 {offsets = [0, 0, 96], sizes = [1, 8, 32], strides = [1, 1, 1]} : vector<1x8x128xbf16> to vector<1x8x32xbf16>
    "tpu.trace_start"() <{level = 10 : i32, message = "bqk,bkd->bqd"}> : () -> ()
    %cst_58 = arith.constant dense<0.000000e+00> : vector<1x8x32xf32>
    %167 = tpu.matmul %165, %166, %cst_58 {dimension_numbers = #tpu.dot_dimension_numbers<[2], [1], [1], [2], [0, 0, 0, 1, 1, 2], [0], [0]>} : vector<1x8x8xbf16>, vector<1x8x32xbf16>, vector<1x8x32xf32> -> vector<1x8x32xf32>
    "tpu.trace_stop"() : () -> ()
    %168 = tpu.concatenate %113, %131, %149, %167 in 2 : vector<1x8x32xf32>, vector<1x8x32xf32>, vector<1x8x32xf32>, vector<1x8x32xf32> -> vector<1x8x128xf32>
    %169 = vector.shape_cast %168 : vector<1x8x128xf32> to vector<8x128xf32>
    %170 = arith.truncf %169 : vector<8x128xf32> to vector<8x128xbf16>
    %c0_59 = arith.constant 0 : index
    %c0_60 = arith.constant 0 : index
    %c0_61 = arith.constant 0 : index
    %171 = vector.load %arg12[%c0_59, %c0_60, %c0_61] : memref<3x128x128xbf16, #tpu.memory_space<vmem>>, vector<1x128x128xbf16>
    %172 = vector.shape_cast %171 : vector<1x128x128xbf16> to vector<128x128xbf16>
    %cst_62 = arith.constant dense<0.000000e+00> : vector<8x128xf32>
    %173 = tpu.matmul %170, %172, %cst_62 {dimension_numbers = #tpu.dot_dimension_numbers<[1], [0], [0], [1], [0, 0, 1, 1], [], []>} : vector<8x128xbf16>, vector<128x128xbf16>, vector<8x128xf32> -> vector<8x128xf32>
    %c0_63 = arith.constant 0 : index
    %c0_64 = arith.constant 0 : index
    %c0_65 = arith.constant 0 : index
    %174 = vector.load %arg13[%c0_63, %c0_64, %c0_65] : memref<3x1x128xf32, #tpu.memory_space<vmem>>, vector<1x1x128xf32>
    %175 = vector.shape_cast %174 : vector<1x1x128xf32> to vector<1x128xf32>
    %176 = vector.broadcast %175 : vector<1x128xf32> to vector<8x128xf32>
    %177 = arith.addf %173, %176 : vector<8x128xf32>
    %178 = vector.shape_cast %177 : vector<8x128xf32> to vector<1x8x128xf32>
    %179 = arith.addf %35, %178 : vector<1x8x128xf32>
    %180 = vector.shape_cast %179 : vector<1x8x128xf32> to vector<8x128xf32>
    %c0_66 = arith.constant 0 : index
    %c0_67 = arith.constant 0 : index
    %c0_68 = arith.constant 0 : index
    %181 = vector.load %arg14[%c0_66, %c0_67, %c0_68] : memref<3x1x128xf32, #tpu.memory_space<vmem>>, vector<1x1x128xf32>
    %182 = vector.shape_cast %181 : vector<1x1x128xf32> to vector<1x128xf32>
    %c0_69 = arith.constant 0 : index
    %c0_70 = arith.constant 0 : index
    %c0_71 = arith.constant 0 : index
    %183 = vector.load %arg15[%c0_69, %c0_70, %c0_71] : memref<3x1x128xf32, #tpu.memory_space<vmem>>, vector<1x1x128xf32>
    %184 = vector.shape_cast %183 : vector<1x1x128xf32> to vector<1x128xf32>
    %cst_72 = arith.constant dense<0.000000e+00> : vector<8xf32>
    %185 = vector.multi_reduction <add>, %180, %cst_72 [1] : vector<8x128xf32> to vector<8xf32>
    %186 = vector.shape_cast %185 : vector<8xf32> to vector<8x1xf32>
    %cst_73 = arith.constant 1.280000e+02 : f32
    %187 = vector.broadcast %cst_73 : f32 to vector<8x1xf32>
    %188 = arith.divf %186, %187 : vector<8x1xf32>
    %189 = vector.broadcast %188 : vector<8x1xf32> to vector<8x128xf32>
    %190 = arith.subf %180, %189 : vector<8x128xf32>
    %191 = arith.mulf %190, %190 : vector<8x128xf32>
    %cst_74 = arith.constant dense<0.000000e+00> : vector<8xf32>
    %192 = vector.multi_reduction <add>, %191, %cst_74 [1] : vector<8x128xf32> to vector<8xf32>
    %193 = vector.shape_cast %192 : vector<8xf32> to vector<8x1xf32>
    %cst_75 = arith.constant 1.280000e+02 : f32
    %194 = vector.broadcast %cst_75 : f32 to vector<8x1xf32>
    %195 = arith.divf %193, %194 : vector<8x1xf32>
    %196 = vector.broadcast %188 : vector<8x1xf32> to vector<8x128xf32>
    %197 = arith.subf %180, %196 : vector<8x128xf32>
    %cst_76 = arith.constant 9.99999974E-6 : f32
    %198 = vector.broadcast %cst_76 : f32 to vector<8x1xf32>
    %199 = arith.addf %195, %198 : vector<8x1xf32>
    %200 = math.rsqrt %199 : vector<8x1xf32>
    %201 = vector.broadcast %200 : vector<8x1xf32> to vector<8x128xf32>
    %202 = arith.mulf %197, %201 : vector<8x128xf32>
    %203 = vector.broadcast %182 : vector<1x128xf32> to vector<8x128xf32>
    %204 = arith.mulf %202, %203 : vector<8x128xf32>
    %205 = vector.broadcast %184 : vector<1x128xf32> to vector<8x128xf32>
    %206 = arith.addf %204, %205 : vector<8x128xf32>
    %207 = arith.truncf %206 : vector<8x128xf32> to vector<8x128xbf16>
    %c0_77 = arith.constant 0 : index
    %c0_78 = arith.constant 0 : index
    %c0_79 = arith.constant 0 : index
    %208 = vector.load %arg16[%c0_77, %c0_78, %c0_79] : memref<3x128x256xbf16, #tpu.memory_space<vmem>>, vector<1x128x256xbf16>
    %209 = vector.shape_cast %208 : vector<1x128x256xbf16> to vector<128x256xbf16>
    %cst_80 = arith.constant dense<0.000000e+00> : vector<8x256xf32>
    %210 = tpu.matmul %207, %209, %cst_80 {dimension_numbers = #tpu.dot_dimension_numbers<[1], [0], [0], [1], [0, 0, 1, 1], [], []>} : vector<8x128xbf16>, vector<128x256xbf16>, vector<8x256xf32> -> vector<8x256xf32>
    %c0_81 = arith.constant 0 : index
    %c0_82 = arith.constant 0 : index
    %c0_83 = arith.constant 0 : index
    %211 = vector.load %arg17[%c0_81, %c0_82, %c0_83] : memref<3x1x256xf32, #tpu.memory_space<vmem>>, vector<1x1x256xf32>
    %212 = vector.shape_cast %211 : vector<1x1x256xf32> to vector<1x256xf32>
    %213 = vector.broadcast %212 : vector<1x256xf32> to vector<8x256xf32>
    %214 = arith.addf %210, %213 : vector<8x256xf32>
    %cst_84 = arith.constant 0.000000e+00 : f32
    %215 = vector.broadcast %cst_84 : f32 to vector<8x256xf32>
    %216 = arith.maximumf %214, %215 : vector<8x256xf32>
    %217 = arith.truncf %216 : vector<8x256xf32> to vector<8x256xbf16>
    %c0_85 = arith.constant 0 : index
    %c0_86 = arith.constant 0 : index
    %c0_87 = arith.constant 0 : index
    %218 = vector.load %arg18[%c0_85, %c0_86, %c0_87] : memref<3x256x128xbf16, #tpu.memory_space<vmem>>, vector<1x256x128xbf16>
    %219 = vector.shape_cast %218 : vector<1x256x128xbf16> to vector<256x128xbf16>
    %cst_88 = arith.constant dense<0.000000e+00> : vector<8x128xf32>
    %220 = tpu.matmul %217, %219, %cst_88 {dimension_numbers = #tpu.dot_dimension_numbers<[1], [0], [0], [1], [0, 0, 1, 1], [], []>} : vector<8x256xbf16>, vector<256x128xbf16>, vector<8x128xf32> -> vector<8x128xf32>
    %c0_89 = arith.constant 0 : index
    %c0_90 = arith.constant 0 : index
    %c0_91 = arith.constant 0 : index
    %221 = vector.load %arg19[%c0_89, %c0_90, %c0_91] : memref<3x1x128xf32, #tpu.memory_space<vmem>>, vector<1x1x128xf32>
    %222 = vector.shape_cast %221 : vector<1x1x128xf32> to vector<1x128xf32>
    %223 = vector.broadcast %222 : vector<1x128xf32> to vector<8x128xf32>
    %224 = arith.addf %220, %223 : vector<8x128xf32>
    %225 = vector.shape_cast %224 : vector<8x128xf32> to vector<1x8x128xf32>
    %226 = arith.addf %179, %225 : vector<1x8x128xf32>
    %227 = vector.shape_cast %226 : vector<1x8x128xf32> to vector<8x128xf32>
    %c1 = arith.constant 1 : index
    %c0_92 = arith.constant 0 : index
    %c0_93 = arith.constant 0 : index
    %228 = vector.load %arg8[%c1, %c0_92, %c0_93] : memref<3x1x128xf32, #tpu.memory_space<vmem>>, vector<1x1x128xf32>
    %229 = vector.shape_cast %228 : vector<1x1x128xf32> to vector<1x128xf32>
    %c1_94 = arith.constant 1 : index
    %c0_95 = arith.constant 0 : index
    %c0_96 = arith.constant 0 : index
    %230 = vector.load %arg9[%c1_94, %c0_95, %c0_96] : memref<3x1x128xf32, #tpu.memory_space<vmem>>, vector<1x1x128xf32>
    %231 = vector.shape_cast %230 : vector<1x1x128xf32> to vector<1x128xf32>
    %cst_97 = arith.constant dense<0.000000e+00> : vector<8xf32>
    %232 = vector.multi_reduction <add>, %227, %cst_97 [1] : vector<8x128xf32> to vector<8xf32>
    %233 = vector.shape_cast %232 : vector<8xf32> to vector<8x1xf32>
    %cst_98 = arith.constant 1.280000e+02 : f32
    %234 = vector.broadcast %cst_98 : f32 to vector<8x1xf32>
    %235 = arith.divf %233, %234 : vector<8x1xf32>
    %236 = vector.broadcast %235 : vector<8x1xf32> to vector<8x128xf32>
    %237 = arith.subf %227, %236 : vector<8x128xf32>
    %238 = arith.mulf %237, %237 : vector<8x128xf32>
    %cst_99 = arith.constant dense<0.000000e+00> : vector<8xf32>
    %239 = vector.multi_reduction <add>, %238, %cst_99 [1] : vector<8x128xf32> to vector<8xf32>
    %240 = vector.shape_cast %239 : vector<8xf32> to vector<8x1xf32>
    %cst_100 = arith.constant 1.280000e+02 : f32
    %241 = vector.broadcast %cst_100 : f32 to vector<8x1xf32>
    %242 = arith.divf %240, %241 : vector<8x1xf32>
    %243 = vector.broadcast %235 : vector<8x1xf32> to vector<8x128xf32>
    %244 = arith.subf %227, %243 : vector<8x128xf32>
    %cst_101 = arith.constant 9.99999974E-6 : f32
    %245 = vector.broadcast %cst_101 : f32 to vector<8x1xf32>
    %246 = arith.addf %242, %245 : vector<8x1xf32>
    %247 = math.rsqrt %246 : vector<8x1xf32>
    %248 = vector.broadcast %247 : vector<8x1xf32> to vector<8x128xf32>
    %249 = arith.mulf %244, %248 : vector<8x128xf32>
    %250 = vector.broadcast %229 : vector<1x128xf32> to vector<8x128xf32>
    %251 = arith.mulf %249, %250 : vector<8x128xf32>
    %252 = vector.broadcast %231 : vector<1x128xf32> to vector<8x128xf32>
    %253 = arith.addf %251, %252 : vector<8x128xf32>
    %254 = arith.truncf %253 : vector<8x128xf32> to vector<8x128xbf16>
    %c1_102 = arith.constant 1 : index
    %c0_103 = arith.constant 0 : index
    %c0_104 = arith.constant 0 : index
    %255 = vector.load %arg10[%c1_102, %c0_103, %c0_104] : memref<3x128x384xbf16, #tpu.memory_space<vmem>>, vector<1x128x384xbf16>
    %256 = vector.shape_cast %255 : vector<1x128x384xbf16> to vector<128x384xbf16>
    %cst_105 = arith.constant dense<0.000000e+00> : vector<8x384xf32>
    %257 = tpu.matmul %254, %256, %cst_105 {dimension_numbers = #tpu.dot_dimension_numbers<[1], [0], [0], [1], [0, 0, 1, 1], [], []>} : vector<8x128xbf16>, vector<128x384xbf16>, vector<8x384xf32> -> vector<8x384xf32>
    %c1_106 = arith.constant 1 : index
    %c0_107 = arith.constant 0 : index
    %c0_108 = arith.constant 0 : index
    %258 = vector.load %arg11[%c1_106, %c0_107, %c0_108] : memref<3x1x384xf32, #tpu.memory_space<vmem>>, vector<1x1x384xf32>
    %259 = vector.shape_cast %258 : vector<1x1x384xf32> to vector<1x384xf32>
    %260 = vector.broadcast %259 : vector<1x384xf32> to vector<8x384xf32>
    %261 = arith.addf %257, %260 : vector<8x384xf32>
    %262 = arith.truncf %261 : vector<8x384xf32> to vector<8x384xbf16>
    %263 = vector.extract_strided_slice %262 {offsets = [0, 0], sizes = [8, 128], strides = [1, 1]} : vector<8x384xbf16> to vector<8x128xbf16>
    %264 = vector.shape_cast %263 : vector<8x128xbf16> to vector<1x8x128xbf16>
    %265 = vector.extract_strided_slice %262 {offsets = [0, 128], sizes = [8, 128], strides = [1, 1]} : vector<8x384xbf16> to vector<8x128xbf16>
    %266 = vector.shape_cast %265 : vector<8x128xbf16> to vector<1x8x128xbf16>
    %267 = vector.extract_strided_slice %262 {offsets = [0, 256], sizes = [8, 128], strides = [1, 1]} : vector<8x384xbf16> to vector<8x128xbf16>
    %268 = vector.shape_cast %267 : vector<8x128xbf16> to vector<1x8x128xbf16>
    %269 = vector.extract_strided_slice %264 {offsets = [0, 0, 0], sizes = [1, 8, 32], strides = [1, 1, 1]} : vector<1x8x128xbf16> to vector<1x8x32xbf16>
    %270 = vector.extract_strided_slice %266 {offsets = [0, 0, 0], sizes = [1, 8, 32], strides = [1, 1, 1]} : vector<1x8x128xbf16> to vector<1x8x32xbf16>
    "tpu.trace_start"() <{level = 10 : i32, message = "bqd,bkd->bqk"}> : () -> ()
    %cst_109 = arith.constant dense<0.000000e+00> : vector<1x8x8xf32>
    %271 = tpu.matmul %269, %270, %cst_109 {dimension_numbers = #tpu.dot_dimension_numbers<[2], [2], [1], [1], [0, 0, 0, 1, 1, 1], [0], [0]>} : vector<1x8x32xbf16>, vector<1x8x32xbf16>, vector<1x8x8xf32> -> vector<1x8x8xf32>
    "tpu.trace_stop"() : () -> ()
    %272 = vector.broadcast %53 : vector<1x1x8xf32> to vector<1x8x8xf32>
    %273 = arith.addf %271, %272 : vector<1x8x8xf32>
    %cst_110 = arith.constant dense<0xFF800000> : vector<1x8xf32>
    %274 = vector.multi_reduction <maximumf>, %273, %cst_110 [2] : vector<1x8x8xf32> to vector<1x8xf32>
    %275 = vector.shape_cast %274 : vector<1x8xf32> to vector<1x8x1xf32>
    %276 = vector.broadcast %275 : vector<1x8x1xf32> to vector<1x8x8xf32>
    %277 = arith.subf %273, %276 : vector<1x8x8xf32>
    %278 = math.exp %277 : vector<1x8x8xf32>
    %cst_111 = arith.constant dense<0.000000e+00> : vector<1x8xf32>
    %279 = vector.multi_reduction <add>, %278, %cst_111 [2] : vector<1x8x8xf32> to vector<1x8xf32>
    %280 = vector.shape_cast %279 : vector<1x8xf32> to vector<1x8x1xf32>
    %281 = tpu.reciprocal %280 {approx = true} : vector<1x8x1xf32> -> vector<1x8x1xf32>
    %282 = vector.broadcast %281 : vector<1x8x1xf32> to vector<1x8x8xf32>
    %283 = arith.mulf %278, %282 : vector<1x8x8xf32>
    %284 = arith.truncf %283 : vector<1x8x8xf32> to vector<1x8x8xbf16>
    %285 = vector.extract_strided_slice %268 {offsets = [0, 0, 0], sizes = [1, 8, 32], strides = [1, 1, 1]} : vector<1x8x128xbf16> to vector<1x8x32xbf16>
    "tpu.trace_start"() <{level = 10 : i32, message = "bqk,bkd->bqd"}> : () -> ()
    %cst_112 = arith.constant dense<0.000000e+00> : vector<1x8x32xf32>
    %286 = tpu.matmul %284, %285, %cst_112 {dimension_numbers = #tpu.dot_dimension_numbers<[2], [1], [1], [2], [0, 0, 0, 1, 1, 2], [0], [0]>} : vector<1x8x8xbf16>, vector<1x8x32xbf16>, vector<1x8x32xf32> -> vector<1x8x32xf32>
    "tpu.trace_stop"() : () -> ()
    %287 = vector.extract_strided_slice %264 {offsets = [0, 0, 32], sizes = [1, 8, 32], strides = [1, 1, 1]} : vector<1x8x128xbf16> to vector<1x8x32xbf16>
    %288 = vector.extract_strided_slice %266 {offsets = [0, 0, 32], sizes = [1, 8, 32], strides = [1, 1, 1]} : vector<1x8x128xbf16> to vector<1x8x32xbf16>
    "tpu.trace_start"() <{level = 10 : i32, message = "bqd,bkd->bqk"}> : () -> ()
    %cst_113 = arith.constant dense<0.000000e+00> : vector<1x8x8xf32>
    %289 = tpu.matmul %287, %288, %cst_113 {dimension_numbers = #tpu.dot_dimension_numbers<[2], [2], [1], [1], [0, 0, 0, 1, 1, 1], [0], [0]>} : vector<1x8x32xbf16>, vector<1x8x32xbf16>, vector<1x8x8xf32> -> vector<1x8x8xf32>
    "tpu.trace_stop"() : () -> ()
    %290 = vector.broadcast %53 : vector<1x1x8xf32> to vector<1x8x8xf32>
    %291 = arith.addf %289, %290 : vector<1x8x8xf32>
    %cst_114 = arith.constant dense<0xFF800000> : vector<1x8xf32>
    %292 = vector.multi_reduction <maximumf>, %291, %cst_114 [2] : vector<1x8x8xf32> to vector<1x8xf32>
    %293 = vector.shape_cast %292 : vector<1x8xf32> to vector<1x8x1xf32>
    %294 = vector.broadcast %293 : vector<1x8x1xf32> to vector<1x8x8xf32>
    %295 = arith.subf %291, %294 : vector<1x8x8xf32>
    %296 = math.exp %295 : vector<1x8x8xf32>
    %cst_115 = arith.constant dense<0.000000e+00> : vector<1x8xf32>
    %297 = vector.multi_reduction <add>, %296, %cst_115 [2] : vector<1x8x8xf32> to vector<1x8xf32>
    %298 = vector.shape_cast %297 : vector<1x8xf32> to vector<1x8x1xf32>
    %299 = tpu.reciprocal %298 {approx = true} : vector<1x8x1xf32> -> vector<1x8x1xf32>
    %300 = vector.broadcast %299 : vector<1x8x1xf32> to vector<1x8x8xf32>
    %301 = arith.mulf %296, %300 : vector<1x8x8xf32>
    %302 = arith.truncf %301 : vector<1x8x8xf32> to vector<1x8x8xbf16>
    %303 = vector.extract_strided_slice %268 {offsets = [0, 0, 32], sizes = [1, 8, 32], strides = [1, 1, 1]} : vector<1x8x128xbf16> to vector<1x8x32xbf16>
    "tpu.trace_start"() <{level = 10 : i32, message = "bqk,bkd->bqd"}> : () -> ()
    %cst_116 = arith.constant dense<0.000000e+00> : vector<1x8x32xf32>
    %304 = tpu.matmul %302, %303, %cst_116 {dimension_numbers = #tpu.dot_dimension_numbers<[2], [1], [1], [2], [0, 0, 0, 1, 1, 2], [0], [0]>} : vector<1x8x8xbf16>, vector<1x8x32xbf16>, vector<1x8x32xf32> -> vector<1x8x32xf32>
    "tpu.trace_stop"() : () -> ()
    %305 = vector.extract_strided_slice %264 {offsets = [0, 0, 64], sizes = [1, 8, 32], strides = [1, 1, 1]} : vector<1x8x128xbf16> to vector<1x8x32xbf16>
    %306 = vector.extract_strided_slice %266 {offsets = [0, 0, 64], sizes = [1, 8, 32], strides = [1, 1, 1]} : vector<1x8x128xbf16> to vector<1x8x32xbf16>
    "tpu.trace_start"() <{level = 10 : i32, message = "bqd,bkd->bqk"}> : () -> ()
    %cst_117 = arith.constant dense<0.000000e+00> : vector<1x8x8xf32>
    %307 = tpu.matmul %305, %306, %cst_117 {dimension_numbers = #tpu.dot_dimension_numbers<[2], [2], [1], [1], [0, 0, 0, 1, 1, 1], [0], [0]>} : vector<1x8x32xbf16>, vector<1x8x32xbf16>, vector<1x8x8xf32> -> vector<1x8x8xf32>
    "tpu.trace_stop"() : () -> ()
    %308 = vector.broadcast %53 : vector<1x1x8xf32> to vector<1x8x8xf32>
    %309 = arith.addf %307, %308 : vector<1x8x8xf32>
    %cst_118 = arith.constant dense<0xFF800000> : vector<1x8xf32>
    %310 = vector.multi_reduction <maximumf>, %309, %cst_118 [2] : vector<1x8x8xf32> to vector<1x8xf32>
    %311 = vector.shape_cast %310 : vector<1x8xf32> to vector<1x8x1xf32>
    %312 = vector.broadcast %311 : vector<1x8x1xf32> to vector<1x8x8xf32>
    %313 = arith.subf %309, %312 : vector<1x8x8xf32>
    %314 = math.exp %313 : vector<1x8x8xf32>
    %cst_119 = arith.constant dense<0.000000e+00> : vector<1x8xf32>
    %315 = vector.multi_reduction <add>, %314, %cst_119 [2] : vector<1x8x8xf32> to vector<1x8xf32>
    %316 = vector.shape_cast %315 : vector<1x8xf32> to vector<1x8x1xf32>
    %317 = tpu.reciprocal %316 {approx = true} : vector<1x8x1xf32> -> vector<1x8x1xf32>
    %318 = vector.broadcast %317 : vector<1x8x1xf32> to vector<1x8x8xf32>
    %319 = arith.mulf %314, %318 : vector<1x8x8xf32>
    %320 = arith.truncf %319 : vector<1x8x8xf32> to vector<1x8x8xbf16>
    %321 = vector.extract_strided_slice %268 {offsets = [0, 0, 64], sizes = [1, 8, 32], strides = [1, 1, 1]} : vector<1x8x128xbf16> to vector<1x8x32xbf16>
    "tpu.trace_start"() <{level = 10 : i32, message = "bqk,bkd->bqd"}> : () -> ()
    %cst_120 = arith.constant dense<0.000000e+00> : vector<1x8x32xf32>
    %322 = tpu.matmul %320, %321, %cst_120 {dimension_numbers = #tpu.dot_dimension_numbers<[2], [1], [1], [2], [0, 0, 0, 1, 1, 2], [0], [0]>} : vector<1x8x8xbf16>, vector<1x8x32xbf16>, vector<1x8x32xf32> -> vector<1x8x32xf32>
    "tpu.trace_stop"() : () -> ()
    %323 = vector.extract_strided_slice %264 {offsets = [0, 0, 96], sizes = [1, 8, 32], strides = [1, 1, 1]} : vector<1x8x128xbf16> to vector<1x8x32xbf16>
    %324 = vector.extract_strided_slice %266 {offsets = [0, 0, 96], sizes = [1, 8, 32], strides = [1, 1, 1]} : vector<1x8x128xbf16> to vector<1x8x32xbf16>
    "tpu.trace_start"() <{level = 10 : i32, message = "bqd,bkd->bqk"}> : () -> ()
    %cst_121 = arith.constant dense<0.000000e+00> : vector<1x8x8xf32>
    %325 = tpu.matmul %323, %324, %cst_121 {dimension_numbers = #tpu.dot_dimension_numbers<[2], [2], [1], [1], [0, 0, 0, 1, 1, 1], [0], [0]>} : vector<1x8x32xbf16>, vector<1x8x32xbf16>, vector<1x8x8xf32> -> vector<1x8x8xf32>
    "tpu.trace_stop"() : () -> ()
    %326 = vector.broadcast %53 : vector<1x1x8xf32> to vector<1x8x8xf32>
    %327 = arith.addf %325, %326 : vector<1x8x8xf32>
    %cst_122 = arith.constant dense<0xFF800000> : vector<1x8xf32>
    %328 = vector.multi_reduction <maximumf>, %327, %cst_122 [2] : vector<1x8x8xf32> to vector<1x8xf32>
    %329 = vector.shape_cast %328 : vector<1x8xf32> to vector<1x8x1xf32>
    %330 = vector.broadcast %329 : vector<1x8x1xf32> to vector<1x8x8xf32>
    %331 = arith.subf %327, %330 : vector<1x8x8xf32>
    %332 = math.exp %331 : vector<1x8x8xf32>
    %cst_123 = arith.constant dense<0.000000e+00> : vector<1x8xf32>
    %333 = vector.multi_reduction <add>, %332, %cst_123 [2] : vector<1x8x8xf32> to vector<1x8xf32>
    %334 = vector.shape_cast %333 : vector<1x8xf32> to vector<1x8x1xf32>
    %335 = tpu.reciprocal %334 {approx = true} : vector<1x8x1xf32> -> vector<1x8x1xf32>
    %336 = vector.broadcast %335 : vector<1x8x1xf32> to vector<1x8x8xf32>
    %337 = arith.mulf %332, %336 : vector<1x8x8xf32>
    %338 = arith.truncf %337 : vector<1x8x8xf32> to vector<1x8x8xbf16>
    %339 = vector.extract_strided_slice %268 {offsets = [0, 0, 96], sizes = [1, 8, 32], strides = [1, 1, 1]} : vector<1x8x128xbf16> to vector<1x8x32xbf16>
    "tpu.trace_start"() <{level = 10 : i32, message = "bqk,bkd->bqd"}> : () -> ()
    %cst_124 = arith.constant dense<0.000000e+00> : vector<1x8x32xf32>
    %340 = tpu.matmul %338, %339, %cst_124 {dimension_numbers = #tpu.dot_dimension_numbers<[2], [1], [1], [2], [0, 0, 0, 1, 1, 2], [0], [0]>} : vector<1x8x8xbf16>, vector<1x8x32xbf16>, vector<1x8x32xf32> -> vector<1x8x32xf32>
    "tpu.trace_stop"() : () -> ()
    %341 = tpu.concatenate %286, %304, %322, %340 in 2 : vector<1x8x32xf32>, vector<1x8x32xf32>, vector<1x8x32xf32>, vector<1x8x32xf32> -> vector<1x8x128xf32>
    %342 = vector.shape_cast %341 : vector<1x8x128xf32> to vector<8x128xf32>
    %343 = arith.truncf %342 : vector<8x128xf32> to vector<8x128xbf16>
    %c1_125 = arith.constant 1 : index
    %c0_126 = arith.constant 0 : index
    %c0_127 = arith.constant 0 : index
    %344 = vector.load %arg12[%c1_125, %c0_126, %c0_127] : memref<3x128x128xbf16, #tpu.memory_space<vmem>>, vector<1x128x128xbf16>
    %345 = vector.shape_cast %344 : vector<1x128x128xbf16> to vector<128x128xbf16>
    %cst_128 = arith.constant dense<0.000000e+00> : vector<8x128xf32>
    %346 = tpu.matmul %343, %345, %cst_128 {dimension_numbers = #tpu.dot_dimension_numbers<[1], [0], [0], [1], [0, 0, 1, 1], [], []>} : vector<8x128xbf16>, vector<128x128xbf16>, vector<8x128xf32> -> vector<8x128xf32>
    %c1_129 = arith.constant 1 : index
    %c0_130 = arith.constant 0 : index
    %c0_131 = arith.constant 0 : index
    %347 = vector.load %arg13[%c1_129, %c0_130, %c0_131] : memref<3x1x128xf32, #tpu.memory_space<vmem>>, vector<1x1x128xf32>
    %348 = vector.shape_cast %347 : vector<1x1x128xf32> to vector<1x128xf32>
    %349 = vector.broadcast %348 : vector<1x128xf32> to vector<8x128xf32>
    %350 = arith.addf %346, %349 : vector<8x128xf32>
    %351 = vector.shape_cast %350 : vector<8x128xf32> to vector<1x8x128xf32>
    %352 = arith.addf %226, %351 : vector<1x8x128xf32>
    %353 = vector.shape_cast %352 : vector<1x8x128xf32> to vector<8x128xf32>
    %c1_132 = arith.constant 1 : index
    %c0_133 = arith.constant 0 : index
    %c0_134 = arith.constant 0 : index
    %354 = vector.load %arg14[%c1_132, %c0_133, %c0_134] : memref<3x1x128xf32, #tpu.memory_space<vmem>>, vector<1x1x128xf32>
    %355 = vector.shape_cast %354 : vector<1x1x128xf32> to vector<1x128xf32>
    %c1_135 = arith.constant 1 : index
    %c0_136 = arith.constant 0 : index
    %c0_137 = arith.constant 0 : index
    %356 = vector.load %arg15[%c1_135, %c0_136, %c0_137] : memref<3x1x128xf32, #tpu.memory_space<vmem>>, vector<1x1x128xf32>
    %357 = vector.shape_cast %356 : vector<1x1x128xf32> to vector<1x128xf32>
    %cst_138 = arith.constant dense<0.000000e+00> : vector<8xf32>
    %358 = vector.multi_reduction <add>, %353, %cst_138 [1] : vector<8x128xf32> to vector<8xf32>
    %359 = vector.shape_cast %358 : vector<8xf32> to vector<8x1xf32>
    %cst_139 = arith.constant 1.280000e+02 : f32
    %360 = vector.broadcast %cst_139 : f32 to vector<8x1xf32>
    %361 = arith.divf %359, %360 : vector<8x1xf32>
    %362 = vector.broadcast %361 : vector<8x1xf32> to vector<8x128xf32>
    %363 = arith.subf %353, %362 : vector<8x128xf32>
    %364 = arith.mulf %363, %363 : vector<8x128xf32>
    %cst_140 = arith.constant dense<0.000000e+00> : vector<8xf32>
    %365 = vector.multi_reduction <add>, %364, %cst_140 [1] : vector<8x128xf32> to vector<8xf32>
    %366 = vector.shape_cast %365 : vector<8xf32> to vector<8x1xf32>
    %cst_141 = arith.constant 1.280000e+02 : f32
    %367 = vector.broadcast %cst_141 : f32 to vector<8x1xf32>
    %368 = arith.divf %366, %367 : vector<8x1xf32>
    %369 = vector.broadcast %361 : vector<8x1xf32> to vector<8x128xf32>
    %370 = arith.subf %353, %369 : vector<8x128xf32>
    %cst_142 = arith.constant 9.99999974E-6 : f32
    %371 = vector.broadcast %cst_142 : f32 to vector<8x1xf32>
    %372 = arith.addf %368, %371 : vector<8x1xf32>
    %373 = math.rsqrt %372 : vector<8x1xf32>
    %374 = vector.broadcast %373 : vector<8x1xf32> to vector<8x128xf32>
    %375 = arith.mulf %370, %374 : vector<8x128xf32>
    %376 = vector.broadcast %355 : vector<1x128xf32> to vector<8x128xf32>
    %377 = arith.mulf %375, %376 : vector<8x128xf32>
    %378 = vector.broadcast %357 : vector<1x128xf32> to vector<8x128xf32>
    %379 = arith.addf %377, %378 : vector<8x128xf32>
    %380 = arith.truncf %379 : vector<8x128xf32> to vector<8x128xbf16>
    %c1_143 = arith.constant 1 : index
    %c0_144 = arith.constant 0 : index
    %c0_145 = arith.constant 0 : index
    %381 = vector.load %arg16[%c1_143, %c0_144, %c0_145] : memref<3x128x256xbf16, #tpu.memory_space<vmem>>, vector<1x128x256xbf16>
    %382 = vector.shape_cast %381 : vector<1x128x256xbf16> to vector<128x256xbf16>
    %cst_146 = arith.constant dense<0.000000e+00> : vector<8x256xf32>
    %383 = tpu.matmul %380, %382, %cst_146 {dimension_numbers = #tpu.dot_dimension_numbers<[1], [0], [0], [1], [0, 0, 1, 1], [], []>} : vector<8x128xbf16>, vector<128x256xbf16>, vector<8x256xf32> -> vector<8x256xf32>
    %c1_147 = arith.constant 1 : index
    %c0_148 = arith.constant 0 : index
    %c0_149 = arith.constant 0 : index
    %384 = vector.load %arg17[%c1_147, %c0_148, %c0_149] : memref<3x1x256xf32, #tpu.memory_space<vmem>>, vector<1x1x256xf32>
    %385 = vector.shape_cast %384 : vector<1x1x256xf32> to vector<1x256xf32>
    %386 = vector.broadcast %385 : vector<1x256xf32> to vector<8x256xf32>
    %387 = arith.addf %383, %386 : vector<8x256xf32>
    %cst_150 = arith.constant 0.000000e+00 : f32
    %388 = vector.broadcast %cst_150 : f32 to vector<8x256xf32>
    %389 = arith.maximumf %387, %388 : vector<8x256xf32>
    %390 = arith.truncf %389 : vector<8x256xf32> to vector<8x256xbf16>
    %c1_151 = arith.constant 1 : index
    %c0_152 = arith.constant 0 : index
    %c0_153 = arith.constant 0 : index
    %391 = vector.load %arg18[%c1_151, %c0_152, %c0_153] : memref<3x256x128xbf16, #tpu.memory_space<vmem>>, vector<1x256x128xbf16>
    %392 = vector.shape_cast %391 : vector<1x256x128xbf16> to vector<256x128xbf16>
    %cst_154 = arith.constant dense<0.000000e+00> : vector<8x128xf32>
    %393 = tpu.matmul %390, %392, %cst_154 {dimension_numbers = #tpu.dot_dimension_numbers<[1], [0], [0], [1], [0, 0, 1, 1], [], []>} : vector<8x256xbf16>, vector<256x128xbf16>, vector<8x128xf32> -> vector<8x128xf32>
    %c1_155 = arith.constant 1 : index
    %c0_156 = arith.constant 0 : index
    %c0_157 = arith.constant 0 : index
    %394 = vector.load %arg19[%c1_155, %c0_156, %c0_157] : memref<3x1x128xf32, #tpu.memory_space<vmem>>, vector<1x1x128xf32>
    %395 = vector.shape_cast %394 : vector<1x1x128xf32> to vector<1x128xf32>
    %396 = vector.broadcast %395 : vector<1x128xf32> to vector<8x128xf32>
    %397 = arith.addf %393, %396 : vector<8x128xf32>
    %398 = vector.shape_cast %397 : vector<8x128xf32> to vector<1x8x128xf32>
    %399 = arith.addf %352, %398 : vector<1x8x128xf32>
    %400 = vector.shape_cast %399 : vector<1x8x128xf32> to vector<8x128xf32>
    %c2 = arith.constant 2 : index
    %c0_158 = arith.constant 0 : index
    %c0_159 = arith.constant 0 : index
    %401 = vector.load %arg8[%c2, %c0_158, %c0_159] : memref<3x1x128xf32, #tpu.memory_space<vmem>>, vector<1x1x128xf32>
    %402 = vector.shape_cast %401 : vector<1x1x128xf32> to vector<1x128xf32>
    %c2_160 = arith.constant 2 : index
    %c0_161 = arith.constant 0 : index
    %c0_162 = arith.constant 0 : index
    %403 = vector.load %arg9[%c2_160, %c0_161, %c0_162] : memref<3x1x128xf32, #tpu.memory_space<vmem>>, vector<1x1x128xf32>
    %404 = vector.shape_cast %403 : vector<1x1x128xf32> to vector<1x128xf32>
    %cst_163 = arith.constant dense<0.000000e+00> : vector<8xf32>
    %405 = vector.multi_reduction <add>, %400, %cst_163 [1] : vector<8x128xf32> to vector<8xf32>
    %406 = vector.shape_cast %405 : vector<8xf32> to vector<8x1xf32>
    %cst_164 = arith.constant 1.280000e+02 : f32
    %407 = vector.broadcast %cst_164 : f32 to vector<8x1xf32>
    %408 = arith.divf %406, %407 : vector<8x1xf32>
    %409 = vector.broadcast %408 : vector<8x1xf32> to vector<8x128xf32>
    %410 = arith.subf %400, %409 : vector<8x128xf32>
    %411 = arith.mulf %410, %410 : vector<8x128xf32>
    %cst_165 = arith.constant dense<0.000000e+00> : vector<8xf32>
    %412 = vector.multi_reduction <add>, %411, %cst_165 [1] : vector<8x128xf32> to vector<8xf32>
    %413 = vector.shape_cast %412 : vector<8xf32> to vector<8x1xf32>
    %cst_166 = arith.constant 1.280000e+02 : f32
    %414 = vector.broadcast %cst_166 : f32 to vector<8x1xf32>
    %415 = arith.divf %413, %414 : vector<8x1xf32>
    %416 = vector.broadcast %408 : vector<8x1xf32> to vector<8x128xf32>
    %417 = arith.subf %400, %416 : vector<8x128xf32>
    %cst_167 = arith.constant 9.99999974E-6 : f32
    %418 = vector.broadcast %cst_167 : f32 to vector<8x1xf32>
    %419 = arith.addf %415, %418 : vector<8x1xf32>
    %420 = math.rsqrt %419 : vector<8x1xf32>
    %421 = vector.broadcast %420 : vector<8x1xf32> to vector<8x128xf32>
    %422 = arith.mulf %417, %421 : vector<8x128xf32>
    %423 = vector.broadcast %402 : vector<1x128xf32> to vector<8x128xf32>
    %424 = arith.mulf %422, %423 : vector<8x128xf32>
    %425 = vector.broadcast %404 : vector<1x128xf32> to vector<8x128xf32>
    %426 = arith.addf %424, %425 : vector<8x128xf32>
    %427 = arith.truncf %426 : vector<8x128xf32> to vector<8x128xbf16>
    %c2_168 = arith.constant 2 : index
    %c0_169 = arith.constant 0 : index
    %c0_170 = arith.constant 0 : index
    %428 = vector.load %arg10[%c2_168, %c0_169, %c0_170] : memref<3x128x384xbf16, #tpu.memory_space<vmem>>, vector<1x128x384xbf16>
    %429 = vector.shape_cast %428 : vector<1x128x384xbf16> to vector<128x384xbf16>
    %cst_171 = arith.constant dense<0.000000e+00> : vector<8x384xf32>
    %430 = tpu.matmul %427, %429, %cst_171 {dimension_numbers = #tpu.dot_dimension_numbers<[1], [0], [0], [1], [0, 0, 1, 1], [], []>} : vector<8x128xbf16>, vector<128x384xbf16>, vector<8x384xf32> -> vector<8x384xf32>
    %c2_172 = arith.constant 2 : index
    %c0_173 = arith.constant 0 : index
    %c0_174 = arith.constant 0 : index
    %431 = vector.load %arg11[%c2_172, %c0_173, %c0_174] : memref<3x1x384xf32, #tpu.memory_space<vmem>>, vector<1x1x384xf32>
    %432 = vector.shape_cast %431 : vector<1x1x384xf32> to vector<1x384xf32>
    %433 = vector.broadcast %432 : vector<1x384xf32> to vector<8x384xf32>
    %434 = arith.addf %430, %433 : vector<8x384xf32>
    %435 = arith.truncf %434 : vector<8x384xf32> to vector<8x384xbf16>
    %436 = vector.extract_strided_slice %435 {offsets = [0, 0], sizes = [8, 128], strides = [1, 1]} : vector<8x384xbf16> to vector<8x128xbf16>
    %437 = vector.shape_cast %436 : vector<8x128xbf16> to vector<1x8x128xbf16>
    %438 = vector.extract_strided_slice %435 {offsets = [0, 128], sizes = [8, 128], strides = [1, 1]} : vector<8x384xbf16> to vector<8x128xbf16>
    %439 = vector.shape_cast %438 : vector<8x128xbf16> to vector<1x8x128xbf16>
    %440 = vector.extract_strided_slice %435 {offsets = [0, 256], sizes = [8, 128], strides = [1, 1]} : vector<8x384xbf16> to vector<8x128xbf16>
    %441 = vector.shape_cast %440 : vector<8x128xbf16> to vector<1x8x128xbf16>
    %442 = vector.extract_strided_slice %437 {offsets = [0, 0, 0], sizes = [1, 8, 32], strides = [1, 1, 1]} : vector<1x8x128xbf16> to vector<1x8x32xbf16>
    %443 = vector.extract_strided_slice %439 {offsets = [0, 0, 0], sizes = [1, 8, 32], strides = [1, 1, 1]} : vector<1x8x128xbf16> to vector<1x8x32xbf16>
    "tpu.trace_start"() <{level = 10 : i32, message = "bqd,bkd->bqk"}> : () -> ()
    %cst_175 = arith.constant dense<0.000000e+00> : vector<1x8x8xf32>
    %444 = tpu.matmul %442, %443, %cst_175 {dimension_numbers = #tpu.dot_dimension_numbers<[2], [2], [1], [1], [0, 0, 0, 1, 1, 1], [0], [0]>} : vector<1x8x32xbf16>, vector<1x8x32xbf16>, vector<1x8x8xf32> -> vector<1x8x8xf32>
    "tpu.trace_stop"() : () -> ()
    %445 = vector.broadcast %53 : vector<1x1x8xf32> to vector<1x8x8xf32>
    %446 = arith.addf %444, %445 : vector<1x8x8xf32>
    %cst_176 = arith.constant dense<0xFF800000> : vector<1x8xf32>
    %447 = vector.multi_reduction <maximumf>, %446, %cst_176 [2] : vector<1x8x8xf32> to vector<1x8xf32>
    %448 = vector.shape_cast %447 : vector<1x8xf32> to vector<1x8x1xf32>
    %449 = vector.broadcast %448 : vector<1x8x1xf32> to vector<1x8x8xf32>
    %450 = arith.subf %446, %449 : vector<1x8x8xf32>
    %451 = math.exp %450 : vector<1x8x8xf32>
    %cst_177 = arith.constant dense<0.000000e+00> : vector<1x8xf32>
    %452 = vector.multi_reduction <add>, %451, %cst_177 [2] : vector<1x8x8xf32> to vector<1x8xf32>
    %453 = vector.shape_cast %452 : vector<1x8xf32> to vector<1x8x1xf32>
    %454 = tpu.reciprocal %453 {approx = true} : vector<1x8x1xf32> -> vector<1x8x1xf32>
    %455 = vector.broadcast %454 : vector<1x8x1xf32> to vector<1x8x8xf32>
    %456 = arith.mulf %451, %455 : vector<1x8x8xf32>
    %457 = arith.truncf %456 : vector<1x8x8xf32> to vector<1x8x8xbf16>
    %458 = vector.extract_strided_slice %441 {offsets = [0, 0, 0], sizes = [1, 8, 32], strides = [1, 1, 1]} : vector<1x8x128xbf16> to vector<1x8x32xbf16>
    "tpu.trace_start"() <{level = 10 : i32, message = "bqk,bkd->bqd"}> : () -> ()
    %cst_178 = arith.constant dense<0.000000e+00> : vector<1x8x32xf32>
    %459 = tpu.matmul %457, %458, %cst_178 {dimension_numbers = #tpu.dot_dimension_numbers<[2], [1], [1], [2], [0, 0, 0, 1, 1, 2], [0], [0]>} : vector<1x8x8xbf16>, vector<1x8x32xbf16>, vector<1x8x32xf32> -> vector<1x8x32xf32>
    "tpu.trace_stop"() : () -> ()
    %460 = vector.extract_strided_slice %437 {offsets = [0, 0, 32], sizes = [1, 8, 32], strides = [1, 1, 1]} : vector<1x8x128xbf16> to vector<1x8x32xbf16>
    %461 = vector.extract_strided_slice %439 {offsets = [0, 0, 32], sizes = [1, 8, 32], strides = [1, 1, 1]} : vector<1x8x128xbf16> to vector<1x8x32xbf16>
    "tpu.trace_start"() <{level = 10 : i32, message = "bqd,bkd->bqk"}> : () -> ()
    %cst_179 = arith.constant dense<0.000000e+00> : vector<1x8x8xf32>
    %462 = tpu.matmul %460, %461, %cst_179 {dimension_numbers = #tpu.dot_dimension_numbers<[2], [2], [1], [1], [0, 0, 0, 1, 1, 1], [0], [0]>} : vector<1x8x32xbf16>, vector<1x8x32xbf16>, vector<1x8x8xf32> -> vector<1x8x8xf32>
    "tpu.trace_stop"() : () -> ()
    %463 = vector.broadcast %53 : vector<1x1x8xf32> to vector<1x8x8xf32>
    %464 = arith.addf %462, %463 : vector<1x8x8xf32>
    %cst_180 = arith.constant dense<0xFF800000> : vector<1x8xf32>
    %465 = vector.multi_reduction <maximumf>, %464, %cst_180 [2] : vector<1x8x8xf32> to vector<1x8xf32>
    %466 = vector.shape_cast %465 : vector<1x8xf32> to vector<1x8x1xf32>
    %467 = vector.broadcast %466 : vector<1x8x1xf32> to vector<1x8x8xf32>
    %468 = arith.subf %464, %467 : vector<1x8x8xf32>
    %469 = math.exp %468 : vector<1x8x8xf32>
    %cst_181 = arith.constant dense<0.000000e+00> : vector<1x8xf32>
    %470 = vector.multi_reduction <add>, %469, %cst_181 [2] : vector<1x8x8xf32> to vector<1x8xf32>
    %471 = vector.shape_cast %470 : vector<1x8xf32> to vector<1x8x1xf32>
    %472 = tpu.reciprocal %471 {approx = true} : vector<1x8x1xf32> -> vector<1x8x1xf32>
    %473 = vector.broadcast %472 : vector<1x8x1xf32> to vector<1x8x8xf32>
    %474 = arith.mulf %469, %473 : vector<1x8x8xf32>
    %475 = arith.truncf %474 : vector<1x8x8xf32> to vector<1x8x8xbf16>
    %476 = vector.extract_strided_slice %441 {offsets = [0, 0, 32], sizes = [1, 8, 32], strides = [1, 1, 1]} : vector<1x8x128xbf16> to vector<1x8x32xbf16>
    "tpu.trace_start"() <{level = 10 : i32, message = "bqk,bkd->bqd"}> : () -> ()
    %cst_182 = arith.constant dense<0.000000e+00> : vector<1x8x32xf32>
    %477 = tpu.matmul %475, %476, %cst_182 {dimension_numbers = #tpu.dot_dimension_numbers<[2], [1], [1], [2], [0, 0, 0, 1, 1, 2], [0], [0]>} : vector<1x8x8xbf16>, vector<1x8x32xbf16>, vector<1x8x32xf32> -> vector<1x8x32xf32>
    "tpu.trace_stop"() : () -> ()
    %478 = vector.extract_strided_slice %437 {offsets = [0, 0, 64], sizes = [1, 8, 32], strides = [1, 1, 1]} : vector<1x8x128xbf16> to vector<1x8x32xbf16>
    %479 = vector.extract_strided_slice %439 {offsets = [0, 0, 64], sizes = [1, 8, 32], strides = [1, 1, 1]} : vector<1x8x128xbf16> to vector<1x8x32xbf16>
    "tpu.trace_start"() <{level = 10 : i32, message = "bqd,bkd->bqk"}> : () -> ()
    %cst_183 = arith.constant dense<0.000000e+00> : vector<1x8x8xf32>
    %480 = tpu.matmul %478, %479, %cst_183 {dimension_numbers = #tpu.dot_dimension_numbers<[2], [2], [1], [1], [0, 0, 0, 1, 1, 1], [0], [0]>} : vector<1x8x32xbf16>, vector<1x8x32xbf16>, vector<1x8x8xf32> -> vector<1x8x8xf32>
    "tpu.trace_stop"() : () -> ()
    %481 = vector.broadcast %53 : vector<1x1x8xf32> to vector<1x8x8xf32>
    %482 = arith.addf %480, %481 : vector<1x8x8xf32>
    %cst_184 = arith.constant dense<0xFF800000> : vector<1x8xf32>
    %483 = vector.multi_reduction <maximumf>, %482, %cst_184 [2] : vector<1x8x8xf32> to vector<1x8xf32>
    %484 = vector.shape_cast %483 : vector<1x8xf32> to vector<1x8x1xf32>
    %485 = vector.broadcast %484 : vector<1x8x1xf32> to vector<1x8x8xf32>
    %486 = arith.subf %482, %485 : vector<1x8x8xf32>
    %487 = math.exp %486 : vector<1x8x8xf32>
    %cst_185 = arith.constant dense<0.000000e+00> : vector<1x8xf32>
    %488 = vector.multi_reduction <add>, %487, %cst_185 [2] : vector<1x8x8xf32> to vector<1x8xf32>
    %489 = vector.shape_cast %488 : vector<1x8xf32> to vector<1x8x1xf32>
    %490 = tpu.reciprocal %489 {approx = true} : vector<1x8x1xf32> -> vector<1x8x1xf32>
    %491 = vector.broadcast %490 : vector<1x8x1xf32> to vector<1x8x8xf32>
    %492 = arith.mulf %487, %491 : vector<1x8x8xf32>
    %493 = arith.truncf %492 : vector<1x8x8xf32> to vector<1x8x8xbf16>
    %494 = vector.extract_strided_slice %441 {offsets = [0, 0, 64], sizes = [1, 8, 32], strides = [1, 1, 1]} : vector<1x8x128xbf16> to vector<1x8x32xbf16>
    "tpu.trace_start"() <{level = 10 : i32, message = "bqk,bkd->bqd"}> : () -> ()
    %cst_186 = arith.constant dense<0.000000e+00> : vector<1x8x32xf32>
    %495 = tpu.matmul %493, %494, %cst_186 {dimension_numbers = #tpu.dot_dimension_numbers<[2], [1], [1], [2], [0, 0, 0, 1, 1, 2], [0], [0]>} : vector<1x8x8xbf16>, vector<1x8x32xbf16>, vector<1x8x32xf32> -> vector<1x8x32xf32>
    "tpu.trace_stop"() : () -> ()
    %496 = vector.extract_strided_slice %437 {offsets = [0, 0, 96], sizes = [1, 8, 32], strides = [1, 1, 1]} : vector<1x8x128xbf16> to vector<1x8x32xbf16>
    %497 = vector.extract_strided_slice %439 {offsets = [0, 0, 96], sizes = [1, 8, 32], strides = [1, 1, 1]} : vector<1x8x128xbf16> to vector<1x8x32xbf16>
    "tpu.trace_start"() <{level = 10 : i32, message = "bqd,bkd->bqk"}> : () -> ()
    %cst_187 = arith.constant dense<0.000000e+00> : vector<1x8x8xf32>
    %498 = tpu.matmul %496, %497, %cst_187 {dimension_numbers = #tpu.dot_dimension_numbers<[2], [2], [1], [1], [0, 0, 0, 1, 1, 1], [0], [0]>} : vector<1x8x32xbf16>, vector<1x8x32xbf16>, vector<1x8x8xf32> -> vector<1x8x8xf32>
    "tpu.trace_stop"() : () -> ()
    %499 = vector.broadcast %53 : vector<1x1x8xf32> to vector<1x8x8xf32>
    %500 = arith.addf %498, %499 : vector<1x8x8xf32>
    %cst_188 = arith.constant dense<0xFF800000> : vector<1x8xf32>
    %501 = vector.multi_reduction <maximumf>, %500, %cst_188 [2] : vector<1x8x8xf32> to vector<1x8xf32>
    %502 = vector.shape_cast %501 : vector<1x8xf32> to vector<1x8x1xf32>
    %503 = vector.broadcast %502 : vector<1x8x1xf32> to vector<1x8x8xf32>
    %504 = arith.subf %500, %503 : vector<1x8x8xf32>
    %505 = math.exp %504 : vector<1x8x8xf32>
    %cst_189 = arith.constant dense<0.000000e+00> : vector<1x8xf32>
    %506 = vector.multi_reduction <add>, %505, %cst_189 [2] : vector<1x8x8xf32> to vector<1x8xf32>
    %507 = vector.shape_cast %506 : vector<1x8xf32> to vector<1x8x1xf32>
    %508 = tpu.reciprocal %507 {approx = true} : vector<1x8x1xf32> -> vector<1x8x1xf32>
    %509 = vector.broadcast %508 : vector<1x8x1xf32> to vector<1x8x8xf32>
    %510 = arith.mulf %505, %509 : vector<1x8x8xf32>
    %511 = arith.truncf %510 : vector<1x8x8xf32> to vector<1x8x8xbf16>
    %512 = vector.extract_strided_slice %441 {offsets = [0, 0, 96], sizes = [1, 8, 32], strides = [1, 1, 1]} : vector<1x8x128xbf16> to vector<1x8x32xbf16>
    "tpu.trace_start"() <{level = 10 : i32, message = "bqk,bkd->bqd"}> : () -> ()
    %cst_190 = arith.constant dense<0.000000e+00> : vector<1x8x32xf32>
    %513 = tpu.matmul %511, %512, %cst_190 {dimension_numbers = #tpu.dot_dimension_numbers<[2], [1], [1], [2], [0, 0, 0, 1, 1, 2], [0], [0]>} : vector<1x8x8xbf16>, vector<1x8x32xbf16>, vector<1x8x32xf32> -> vector<1x8x32xf32>
    "tpu.trace_stop"() : () -> ()
    %514 = tpu.concatenate %459, %477, %495, %513 in 2 : vector<1x8x32xf32>, vector<1x8x32xf32>, vector<1x8x32xf32>, vector<1x8x32xf32> -> vector<1x8x128xf32>
    %515 = vector.shape_cast %514 : vector<1x8x128xf32> to vector<8x128xf32>
    %516 = arith.truncf %515 : vector<8x128xf32> to vector<8x128xbf16>
    %c2_191 = arith.constant 2 : index
    %c0_192 = arith.constant 0 : index
    %c0_193 = arith.constant 0 : index
    %517 = vector.load %arg12[%c2_191, %c0_192, %c0_193] : memref<3x128x128xbf16, #tpu.memory_space<vmem>>, vector<1x128x128xbf16>
    %518 = vector.shape_cast %517 : vector<1x128x128xbf16> to vector<128x128xbf16>
    %cst_194 = arith.constant dense<0.000000e+00> : vector<8x128xf32>
    %519 = tpu.matmul %516, %518, %cst_194 {dimension_numbers = #tpu.dot_dimension_numbers<[1], [0], [0], [1], [0, 0, 1, 1], [], []>} : vector<8x128xbf16>, vector<128x128xbf16>, vector<8x128xf32> -> vector<8x128xf32>
    %c2_195 = arith.constant 2 : index
    %c0_196 = arith.constant 0 : index
    %c0_197 = arith.constant 0 : index
    %520 = vector.load %arg13[%c2_195, %c0_196, %c0_197] : memref<3x1x128xf32, #tpu.memory_space<vmem>>, vector<1x1x128xf32>
    %521 = vector.shape_cast %520 : vector<1x1x128xf32> to vector<1x128xf32>
    %522 = vector.broadcast %521 : vector<1x128xf32> to vector<8x128xf32>
    %523 = arith.addf %519, %522 : vector<8x128xf32>
    %524 = vector.shape_cast %523 : vector<8x128xf32> to vector<1x8x128xf32>
    %525 = arith.addf %399, %524 : vector<1x8x128xf32>
    %526 = vector.shape_cast %525 : vector<1x8x128xf32> to vector<8x128xf32>
    %c2_198 = arith.constant 2 : index
    %c0_199 = arith.constant 0 : index
    %c0_200 = arith.constant 0 : index
    %527 = vector.load %arg14[%c2_198, %c0_199, %c0_200] : memref<3x1x128xf32, #tpu.memory_space<vmem>>, vector<1x1x128xf32>
    %528 = vector.shape_cast %527 : vector<1x1x128xf32> to vector<1x128xf32>
    %c2_201 = arith.constant 2 : index
    %c0_202 = arith.constant 0 : index
    %c0_203 = arith.constant 0 : index
    %529 = vector.load %arg15[%c2_201, %c0_202, %c0_203] : memref<3x1x128xf32, #tpu.memory_space<vmem>>, vector<1x1x128xf32>
    %530 = vector.shape_cast %529 : vector<1x1x128xf32> to vector<1x128xf32>
    %cst_204 = arith.constant dense<0.000000e+00> : vector<8xf32>
    %531 = vector.multi_reduction <add>, %526, %cst_204 [1] : vector<8x128xf32> to vector<8xf32>
    %532 = vector.shape_cast %531 : vector<8xf32> to vector<8x1xf32>
    %cst_205 = arith.constant 1.280000e+02 : f32
    %533 = vector.broadcast %cst_205 : f32 to vector<8x1xf32>
    %534 = arith.divf %532, %533 : vector<8x1xf32>
    %535 = vector.broadcast %534 : vector<8x1xf32> to vector<8x128xf32>
    %536 = arith.subf %526, %535 : vector<8x128xf32>
    %537 = arith.mulf %536, %536 : vector<8x128xf32>
    %cst_206 = arith.constant dense<0.000000e+00> : vector<8xf32>
    %538 = vector.multi_reduction <add>, %537, %cst_206 [1] : vector<8x128xf32> to vector<8xf32>
    %539 = vector.shape_cast %538 : vector<8xf32> to vector<8x1xf32>
    %cst_207 = arith.constant 1.280000e+02 : f32
    %540 = vector.broadcast %cst_207 : f32 to vector<8x1xf32>
    %541 = arith.divf %539, %540 : vector<8x1xf32>
    %542 = vector.broadcast %534 : vector<8x1xf32> to vector<8x128xf32>
    %543 = arith.subf %526, %542 : vector<8x128xf32>
    %cst_208 = arith.constant 9.99999974E-6 : f32
    %544 = vector.broadcast %cst_208 : f32 to vector<8x1xf32>
    %545 = arith.addf %541, %544 : vector<8x1xf32>
    %546 = math.rsqrt %545 : vector<8x1xf32>
    %547 = vector.broadcast %546 : vector<8x1xf32> to vector<8x128xf32>
    %548 = arith.mulf %543, %547 : vector<8x128xf32>
    %549 = vector.broadcast %528 : vector<1x128xf32> to vector<8x128xf32>
    %550 = arith.mulf %548, %549 : vector<8x128xf32>
    %551 = vector.broadcast %530 : vector<1x128xf32> to vector<8x128xf32>
    %552 = arith.addf %550, %551 : vector<8x128xf32>
    %553 = arith.truncf %552 : vector<8x128xf32> to vector<8x128xbf16>
    %c2_209 = arith.constant 2 : index
    %c0_210 = arith.constant 0 : index
    %c0_211 = arith.constant 0 : index
    %554 = vector.load %arg16[%c2_209, %c0_210, %c0_211] : memref<3x128x256xbf16, #tpu.memory_space<vmem>>, vector<1x128x256xbf16>
    %555 = vector.shape_cast %554 : vector<1x128x256xbf16> to vector<128x256xbf16>
    %cst_212 = arith.constant dense<0.000000e+00> : vector<8x256xf32>
    %556 = tpu.matmul %553, %555, %cst_212 {dimension_numbers = #tpu.dot_dimension_numbers<[1], [0], [0], [1], [0, 0, 1, 1], [], []>} : vector<8x128xbf16>, vector<128x256xbf16>, vector<8x256xf32> -> vector<8x256xf32>
    %c2_213 = arith.constant 2 : index
    %c0_214 = arith.constant 0 : index
    %c0_215 = arith.constant 0 : index
    %557 = vector.load %arg17[%c2_213, %c0_214, %c0_215] : memref<3x1x256xf32, #tpu.memory_space<vmem>>, vector<1x1x256xf32>
    %558 = vector.shape_cast %557 : vector<1x1x256xf32> to vector<1x256xf32>
    %559 = vector.broadcast %558 : vector<1x256xf32> to vector<8x256xf32>
    %560 = arith.addf %556, %559 : vector<8x256xf32>
    %cst_216 = arith.constant 0.000000e+00 : f32
    %561 = vector.broadcast %cst_216 : f32 to vector<8x256xf32>
    %562 = arith.maximumf %560, %561 : vector<8x256xf32>
    %563 = arith.truncf %562 : vector<8x256xf32> to vector<8x256xbf16>
    %c2_217 = arith.constant 2 : index
    %c0_218 = arith.constant 0 : index
    %c0_219 = arith.constant 0 : index
    %564 = vector.load %arg18[%c2_217, %c0_218, %c0_219] : memref<3x256x128xbf16, #tpu.memory_space<vmem>>, vector<1x256x128xbf16>
    %565 = vector.shape_cast %564 : vector<1x256x128xbf16> to vector<256x128xbf16>
    %cst_220 = arith.constant dense<0.000000e+00> : vector<8x128xf32>
    %566 = tpu.matmul %563, %565, %cst_220 {dimension_numbers = #tpu.dot_dimension_numbers<[1], [0], [0], [1], [0, 0, 1, 1], [], []>} : vector<8x256xbf16>, vector<256x128xbf16>, vector<8x128xf32> -> vector<8x128xf32>
    %c2_221 = arith.constant 2 : index
    %c0_222 = arith.constant 0 : index
    %c0_223 = arith.constant 0 : index
    %567 = vector.load %arg19[%c2_221, %c0_222, %c0_223] : memref<3x1x128xf32, #tpu.memory_space<vmem>>, vector<1x1x128xf32>
    %568 = vector.shape_cast %567 : vector<1x1x128xf32> to vector<1x128xf32>
    %569 = vector.broadcast %568 : vector<1x128xf32> to vector<8x128xf32>
    %570 = arith.addf %566, %569 : vector<8x128xf32>
    %571 = vector.shape_cast %570 : vector<8x128xf32> to vector<1x8x128xf32>
    %572 = arith.addf %525, %571 : vector<1x8x128xf32>
    %573 = vector.shape_cast %48 : vector<1x8xf32> to vector<1x8x1xf32>
    %574 = vector.broadcast %573 : vector<1x8x1xf32> to vector<1x8x128xf32>
    %575 = arith.mulf %572, %574 : vector<1x8x128xf32>
    %cst_224 = arith.constant dense<0.000000e+00> : vector<1x128xf32>
    %576 = vector.multi_reduction <add>, %575, %cst_224 [1] : vector<1x8x128xf32> to vector<1x128xf32>
    %cst_225 = arith.constant dense<0.000000e+00> : vector<1xf32>
    %577 = vector.multi_reduction <add>, %48, %cst_225 [1] : vector<1x8xf32> to vector<1xf32>
    %578 = vector.shape_cast %577 : vector<1xf32> to vector<1x1xf32>
    %cst_226 = arith.constant 1.000000e+00 : f32
    %579 = vector.broadcast %cst_226 : f32 to vector<1x1xf32>
    %580 = arith.maximumf %578, %579 : vector<1x1xf32>
    %581 = vector.broadcast %580 : vector<1x1xf32> to vector<1x128xf32>
    %582 = arith.divf %576, %581 : vector<1x128xf32>
    %583 = vector.shape_cast %31 : vector<8x128xf32> to vector<1x8x128xf32>
    %cst_227 = arith.constant dense<0.000000e+00> : vector<1x128xf32>
    %584 = vector.multi_reduction <add>, %583, %cst_227 [1] : vector<1x8x128xf32> to vector<1x128xf32>
    %cst_228 = arith.constant 8.000000e+00 : f32
    %585 = vector.broadcast %cst_228 : f32 to vector<1x128xf32>
    %586 = arith.divf %584, %585 : vector<1x128xf32>
    %587 = arith.truncf %586 : vector<1x128xf32> to vector<1x128xbf16>
    %c0_229 = arith.constant 0 : index
    %c0_230 = arith.constant 0 : index
    %588 = vector.load %arg30[%c0_229, %c0_230] : memref<128x128xbf16, #tpu.memory_space<vmem>>, vector<128x128xbf16>
    %cst_231 = arith.constant dense<0.000000e+00> : vector<1x128xf32>
    %589 = tpu.matmul %587, %588, %cst_231 {dimension_numbers = #tpu.dot_dimension_numbers<[1], [0], [0], [1], [0, 0, 1, 1], [], []>} : vector<1x128xbf16>, vector<128x128xbf16>, vector<1x128xf32> -> vector<1x128xf32>
    %c0_232 = arith.constant 0 : index
    %c0_233 = arith.constant 0 : index
    %590 = vector.load %arg31[%c0_232, %c0_233] : memref<1x128xf32, #tpu.memory_space<vmem>>, vector<1x128xf32>
    %591 = arith.addf %589, %590 : vector<1x128xf32>
    %592 = arith.truncf %582 : vector<1x128xf32> to vector<1x128xbf16>
    %c0_234 = arith.constant 0 : index
    %c0_235 = arith.constant 0 : index
    %593 = vector.load %arg20[%c0_234, %c0_235] : memref<128x128xbf16, #tpu.memory_space<vmem>>, vector<128x128xbf16>
    %cst_236 = arith.constant dense<0.000000e+00> : vector<1x128xf32>
    %594 = tpu.matmul %592, %593, %cst_236 {dimension_numbers = #tpu.dot_dimension_numbers<[1], [0], [0], [1], [0, 0, 1, 1], [], []>} : vector<1x128xbf16>, vector<128x128xbf16>, vector<1x128xf32> -> vector<1x128xf32>
    %c0_237 = arith.constant 0 : index
    %c0_238 = arith.constant 0 : index
    %595 = vector.load %arg21[%c0_237, %c0_238] : memref<1x128xf32, #tpu.memory_space<vmem>>, vector<1x128xf32>
    %596 = arith.addf %594, %595 : vector<1x128xf32>
    %c0_239 = arith.constant 0 : index
    %c0_240 = arith.constant 0 : index
    %597 = vector.load %arg22[%c0_239, %c0_240] : memref<1x128xf32, #tpu.memory_space<vmem>>, vector<1x128xf32>
    %c0_241 = arith.constant 0 : index
    %c0_242 = arith.constant 0 : index
    %598 = vector.load %arg23[%c0_241, %c0_242] : memref<1x128xf32, #tpu.memory_space<vmem>>, vector<1x128xf32>
    %cst_243 = arith.constant dense<0.000000e+00> : vector<1xf32>
    %599 = vector.multi_reduction <add>, %596, %cst_243 [1] : vector<1x128xf32> to vector<1xf32>
    %600 = vector.shape_cast %599 : vector<1xf32> to vector<1x1xf32>
    %cst_244 = arith.constant 1.280000e+02 : f32
    %601 = vector.broadcast %cst_244 : f32 to vector<1x1xf32>
    %602 = arith.divf %600, %601 : vector<1x1xf32>
    %603 = vector.broadcast %602 : vector<1x1xf32> to vector<1x128xf32>
    %604 = arith.subf %596, %603 : vector<1x128xf32>
    %605 = arith.mulf %604, %604 : vector<1x128xf32>
    %cst_245 = arith.constant dense<0.000000e+00> : vector<1xf32>
    %606 = vector.multi_reduction <add>, %605, %cst_245 [1] : vector<1x128xf32> to vector<1xf32>
    %607 = vector.shape_cast %606 : vector<1xf32> to vector<1x1xf32>
    %cst_246 = arith.constant 1.280000e+02 : f32
    %608 = vector.broadcast %cst_246 : f32 to vector<1x1xf32>
    %609 = arith.divf %607, %608 : vector<1x1xf32>
    %610 = vector.broadcast %602 : vector<1x1xf32> to vector<1x128xf32>
    %611 = arith.subf %596, %610 : vector<1x128xf32>
    %cst_247 = arith.constant 9.99999974E-6 : f32
    %612 = vector.broadcast %cst_247 : f32 to vector<1x1xf32>
    %613 = arith.addf %609, %612 : vector<1x1xf32>
    %614 = math.rsqrt %613 : vector<1x1xf32>
    %615 = vector.broadcast %614 : vector<1x1xf32> to vector<1x128xf32>
    %616 = arith.mulf %611, %615 : vector<1x128xf32>
    %617 = arith.mulf %616, %597 : vector<1x128xf32>
    %618 = arith.addf %617, %598 : vector<1x128xf32>
    %cst_248 = arith.constant 0.000000e+00 : f32
    %619 = vector.broadcast %cst_248 : f32 to vector<1x128xf32>
    %620 = arith.maximumf %618, %619 : vector<1x128xf32>
    %621 = arith.addf %620, %591 : vector<1x128xf32>
    %622 = arith.truncf %621 : vector<1x128xf32> to vector<1x128xbf16>
    %c0_249 = arith.constant 0 : index
    %c0_250 = arith.constant 0 : index
    %623 = vector.load %arg24[%c0_249, %c0_250] : memref<128x64xbf16, #tpu.memory_space<vmem>>, vector<128x64xbf16>
    %cst_251 = arith.constant dense<0.000000e+00> : vector<1x64xf32>
    %624 = tpu.matmul %622, %623, %cst_251 {dimension_numbers = #tpu.dot_dimension_numbers<[1], [0], [0], [1], [0, 0, 1, 1], [], []>} : vector<1x128xbf16>, vector<128x64xbf16>, vector<1x64xf32> -> vector<1x64xf32>
    %c0_252 = arith.constant 0 : index
    %c0_253 = arith.constant 0 : index
    %625 = vector.load %arg25[%c0_252, %c0_253] : memref<1x64xf32, #tpu.memory_space<vmem>>, vector<1x64xf32>
    %626 = arith.addf %624, %625 : vector<1x64xf32>
    %c0_254 = arith.constant 0 : index
    %c0_255 = arith.constant 0 : index
    %627 = vector.load %arg26[%c0_254, %c0_255] : memref<1x64xf32, #tpu.memory_space<vmem>>, vector<1x64xf32>
    %c0_256 = arith.constant 0 : index
    %c0_257 = arith.constant 0 : index
    %628 = vector.load %arg27[%c0_256, %c0_257] : memref<1x64xf32, #tpu.memory_space<vmem>>, vector<1x64xf32>
    %cst_258 = arith.constant dense<0.000000e+00> : vector<1xf32>
    %629 = vector.multi_reduction <add>, %626, %cst_258 [1] : vector<1x64xf32> to vector<1xf32>
    %630 = vector.shape_cast %629 : vector<1xf32> to vector<1x1xf32>
    %cst_259 = arith.constant 6.400000e+01 : f32
    %631 = vector.broadcast %cst_259 : f32 to vector<1x1xf32>
    %632 = arith.divf %630, %631 : vector<1x1xf32>
    %633 = vector.broadcast %632 : vector<1x1xf32> to vector<1x64xf32>
    %634 = arith.subf %626, %633 : vector<1x64xf32>
    %635 = arith.mulf %634, %634 : vector<1x64xf32>
    %cst_260 = arith.constant dense<0.000000e+00> : vector<1xf32>
    %636 = vector.multi_reduction <add>, %635, %cst_260 [1] : vector<1x64xf32> to vector<1xf32>
    %637 = vector.shape_cast %636 : vector<1xf32> to vector<1x1xf32>
    %cst_261 = arith.constant 6.400000e+01 : f32
    %638 = vector.broadcast %cst_261 : f32 to vector<1x1xf32>
    %639 = arith.divf %637, %638 : vector<1x1xf32>
    %640 = vector.broadcast %632 : vector<1x1xf32> to vector<1x64xf32>
    %641 = arith.subf %626, %640 : vector<1x64xf32>
    %cst_262 = arith.constant 9.99999974E-6 : f32
    %642 = vector.broadcast %cst_262 : f32 to vector<1x1xf32>
    %643 = arith.addf %639, %642 : vector<1x1xf32>
    %644 = math.rsqrt %643 : vector<1x1xf32>
    %645 = vector.broadcast %644 : vector<1x1xf32> to vector<1x64xf32>
    %646 = arith.mulf %641, %645 : vector<1x64xf32>
    %647 = arith.mulf %646, %627 : vector<1x64xf32>
    %648 = arith.addf %647, %628 : vector<1x64xf32>
    %cst_263 = arith.constant 0.000000e+00 : f32
    %649 = vector.broadcast %cst_263 : f32 to vector<1x64xf32>
    %650 = arith.maximumf %648, %649 : vector<1x64xf32>
    %651 = arith.truncf %650 : vector<1x64xf32> to vector<1x64xbf16>
    %c0_264 = arith.constant 0 : index
    %c0_265 = arith.constant 0 : index
    %652 = vector.load %arg28[%c0_264, %c0_265] : memref<64x128xbf16, #tpu.memory_space<vmem>>, vector<64x128xbf16>
    %cst_266 = arith.constant dense<0.000000e+00> : vector<1x128xf32>
    %653 = tpu.matmul %651, %652, %cst_266 {dimension_numbers = #tpu.dot_dimension_numbers<[1], [0], [0], [1], [0, 0, 1, 1], [], []>} : vector<1x64xbf16>, vector<64x128xbf16>, vector<1x128xf32> -> vector<1x128xf32>
    %c0_267 = arith.constant 0 : index
    %c0_268 = arith.constant 0 : index
    %654 = vector.load %arg29[%c0_267, %c0_268] : memref<1x128xf32, #tpu.memory_space<vmem>>, vector<1x128xf32>
    %655 = arith.addf %653, %654 : vector<1x128xf32>
    %656 = vector.shape_cast %655 : vector<1x128xf32> to vector<1x1x128xf32>
    %c0_269 = arith.constant 0 : index
    %c0_270 = arith.constant 0 : index
    %c0_271 = arith.constant 0 : index
    %657 = vector.load %arg32[%c0_269, %c0_270, %c0_271] : memref<1x1x128xf32, #tpu.memory_space<vmem>>, vector<1x1x128xf32>
    tpu.vector_store %arg32[%c0_269, %c0_270, %c0_271], %656 {strides = array<i32>} : memref<1x1x128xf32, #tpu.memory_space<vmem>>, vector<1x1x128xf32>,
    return
  }
  func.func @transform_0(%arg0: i32) -> (i32, i32, i32) {
    %c0_i32 = arith.constant 0 : i32
    %c0_i32_0 = arith.constant 0 : i32
    %c0_i32_1 = arith.constant 0 : i32
    return %arg0, %c0_i32, %c0_i32_0 : i32, i32, i32
  }
  func.func @transform_1(%arg0: i32) -> (i32, i32, i32) {
    %c0_i32 = arith.constant 0 : i32
    %c0_i32_0 = arith.constant 0 : i32
    %c0_i32_1 = arith.constant 0 : i32
    return %arg0, %c0_i32, %c0_i32_0 : i32, i32, i32
  }
  func.func @transform_2(%arg0: i32) -> (i32, i32) {
    %c0_i32 = arith.constant 0 : i32
    %c0_i32_0 = arith.constant 0 : i32
    %c0_i32_1 = arith.constant 0 : i32
    return %c0_i32, %c0_i32_0 : i32, i32
  }
  func.func @transform_3(%arg0: i32) -> (i32, i32) {
    %c0_i32 = arith.constant 0 : i32
    %c0_i32_0 = arith.constant 0 : i32
    %c0_i32_1 = arith.constant 0 : i32
    return %c0_i32, %c0_i32_0 : i32, i32
  }
  func.func @transform_4(%arg0: i32) -> (i32, i32) {
    %c0_i32 = arith.constant 0 : i32
    %c0_i32_0 = arith.constant 0 : i32
    %c0_i32_1 = arith.constant 0 : i32
    return %c0_i32, %c0_i32_0 : i32, i32
  }
  func.func @transform_5(%arg0: i32) -> (i32, i32) {
    %c0_i32 = arith.constant 0 : i32
    %c0_i32_0 = arith.constant 0 : i32
    %c0_i32_1 = arith.constant 0 : i32
    return %c0_i32, %c0_i32_0 : i32, i32
  }
  func.func @transform_6(%arg0: i32) -> (i32, i32) {
    %c0_i32 = arith.constant 0 : i32
    %c0_i32_0 = arith.constant 0 : i32
    %c0_i32_1 = arith.constant 0 : i32
    return %c0_i32, %c0_i32_0 : i32, i32
  }
  func.func @transform_7(%arg0: i32) -> (i32, i32, i32) {
    %c0_i32 = arith.constant 0 : i32
    %c0_i32_0 = arith.constant 0 : i32
    %c0_i32_1 = arith.constant 0 : i32
    %c0_i32_2 = arith.constant 0 : i32
    return %c0_i32, %c0_i32_0, %c0_i32_1 : i32, i32, i32
  }
  func.func @transform_8(%arg0: i32) -> (i32, i32, i32) {
    %c0_i32 = arith.constant 0 : i32
    %c0_i32_0 = arith.constant 0 : i32
    %c0_i32_1 = arith.constant 0 : i32
    %c0_i32_2 = arith.constant 0 : i32
    return %c0_i32, %c0_i32_0, %c0_i32_1 : i32, i32, i32
  }
  func.func @transform_9(%arg0: i32) -> (i32, i32, i32) {
    %c0_i32 = arith.constant 0 : i32
    %c0_i32_0 = arith.constant 0 : i32
    %c0_i32_1 = arith.constant 0 : i32
    %c0_i32_2 = arith.constant 0 : i32
    return %c0_i32, %c0_i32_0, %c0_i32_1 : i32, i32, i32
  }
  func.func @transform_10(%arg0: i32) -> (i32, i32, i32) {
    %c0_i32 = arith.constant 0 : i32
    %c0_i32_0 = arith.constant 0 : i32
    %c0_i32_1 = arith.constant 0 : i32
    %c0_i32_2 = arith.constant 0 : i32
    return %c0_i32, %c0_i32_0, %c0_i32_1 : i32, i32, i32
  }
  func.func @transform_11(%arg0: i32) -> (i32, i32, i32) {
    %c0_i32 = arith.constant 0 : i32
    %c0_i32_0 = arith.constant 0 : i32
    %c0_i32_1 = arith.constant 0 : i32
    %c0_i32_2 = arith.constant 0 : i32
    return %c0_i32, %c0_i32_0, %c0_i32_1 : i32, i32, i32
  }
  func.func @transform_12(%arg0: i32) -> (i32, i32, i32) {
    %c0_i32 = arith.constant 0 : i32
    %c0_i32_0 = arith.constant 0 : i32
    %c0_i32_1 = arith.constant 0 : i32
    %c0_i32_2 = arith.constant 0 : i32
    return %c0_i32, %c0_i32_0, %c0_i32_1 : i32, i32, i32
  }
  func.func @transform_13(%arg0: i32) -> (i32, i32, i32) {
    %c0_i32 = arith.constant 0 : i32
    %c0_i32_0 = arith.constant 0 : i32
    %c0_i32_1 = arith.constant 0 : i32
    %c0_i32_2 = arith.constant 0 : i32
    return %c0_i32, %c0_i32_0, %c0_i32_1 : i32, i32, i32
  }
  func.func @transform_14(%arg0: i32) -> (i32, i32, i32) {
    %c0_i32 = arith.constant 0 : i32
    %c0_i32_0 = arith.constant 0 : i32
    %c0_i32_1 = arith.constant 0 : i32
    %c0_i32_2 = arith.constant 0 : i32
    return %c0_i32, %c0_i32_0, %c0_i32_1 : i32, i32, i32
  }
  func.func @transform_15(%arg0: i32) -> (i32, i32, i32) {
    %c0_i32 = arith.constant 0 : i32
    %c0_i32_0 = arith.constant 0 : i32
    %c0_i32_1 = arith.constant 0 : i32
    %c0_i32_2 = arith.constant 0 : i32
    return %c0_i32, %c0_i32_0, %c0_i32_1 : i32, i32, i32
  }
  func.func @transform_16(%arg0: i32) -> (i32, i32, i32) {
    %c0_i32 = arith.constant 0 : i32
    %c0_i32_0 = arith.constant 0 : i32
    %c0_i32_1 = arith.constant 0 : i32
    %c0_i32_2 = arith.constant 0 : i32
    return %c0_i32, %c0_i32_0, %c0_i32_1 : i32, i32, i32
  }
  func.func @transform_17(%arg0: i32) -> (i32, i32, i32) {
    %c0_i32 = arith.constant 0 : i32
    %c0_i32_0 = arith.constant 0 : i32
    %c0_i32_1 = arith.constant 0 : i32
    %c0_i32_2 = arith.constant 0 : i32
    return %c0_i32, %c0_i32_0, %c0_i32_1 : i32, i32, i32
  }
  func.func @transform_18(%arg0: i32) -> (i32, i32, i32) {
    %c0_i32 = arith.constant 0 : i32
    %c0_i32_0 = arith.constant 0 : i32
    %c0_i32_1 = arith.constant 0 : i32
    %c0_i32_2 = arith.constant 0 : i32
    return %c0_i32, %c0_i32_0, %c0_i32_1 : i32, i32, i32
  }
  func.func @transform_19(%arg0: i32) -> (i32, i32) {
    %c0_i32 = arith.constant 0 : i32
    %c0_i32_0 = arith.constant 0 : i32
    %c0_i32_1 = arith.constant 0 : i32
    return %c0_i32, %c0_i32_0 : i32, i32
  }
  func.func @transform_20(%arg0: i32) -> (i32, i32) {
    %c0_i32 = arith.constant 0 : i32
    %c0_i32_0 = arith.constant 0 : i32
    %c0_i32_1 = arith.constant 0 : i32
    return %c0_i32, %c0_i32_0 : i32, i32
  }
  func.func @transform_21(%arg0: i32) -> (i32, i32) {
    %c0_i32 = arith.constant 0 : i32
    %c0_i32_0 = arith.constant 0 : i32
    %c0_i32_1 = arith.constant 0 : i32
    return %c0_i32, %c0_i32_0 : i32, i32
  }
  func.func @transform_22(%arg0: i32) -> (i32, i32) {
    %c0_i32 = arith.constant 0 : i32
    %c0_i32_0 = arith.constant 0 : i32
    %c0_i32_1 = arith.constant 0 : i32
    return %c0_i32, %c0_i32_0 : i32, i32
  }
  func.func @transform_23(%arg0: i32) -> (i32, i32) {
    %c0_i32 = arith.constant 0 : i32
    %c0_i32_0 = arith.constant 0 : i32
    %c0_i32_1 = arith.constant 0 : i32
    return %c0_i32, %c0_i32_0 : i32, i32
  }
  func.func @transform_24(%arg0: i32) -> (i32, i32) {
    %c0_i32 = arith.constant 0 : i32
    %c0_i32_0 = arith.constant 0 : i32
    %c0_i32_1 = arith.constant 0 : i32
    return %c0_i32, %c0_i32_0 : i32, i32
  }
  func.func @transform_25(%arg0: i32) -> (i32, i32) {
    %c0_i32 = arith.constant 0 : i32
    %c0_i32_0 = arith.constant 0 : i32
    %c0_i32_1 = arith.constant 0 : i32
    return %c0_i32, %c0_i32_0 : i32, i32
  }
  func.func @transform_26(%arg0: i32) -> (i32, i32) {
    %c0_i32 = arith.constant 0 : i32
    %c0_i32_0 = arith.constant 0 : i32
    %c0_i32_1 = arith.constant 0 : i32
    return %c0_i32, %c0_i32_0 : i32, i32
  }
  func.func @transform_27(%arg0: i32) -> (i32, i32) {
    %c0_i32 = arith.constant 0 : i32
    %c0_i32_0 = arith.constant 0 : i32
    %c0_i32_1 = arith.constant 0 : i32
    return %c0_i32, %c0_i32_0 : i32, i32
  }
  func.func @transform_28(%arg0: i32) -> (i32, i32) {
    %c0_i32 = arith.constant 0 : i32
    %c0_i32_0 = arith.constant 0 : i32
    %c0_i32_1 = arith.constant 0 : i32
    return %c0_i32, %c0_i32_0 : i32, i32
  }
  func.func @transform_29(%arg0: i32) -> (i32, i32) {
    %c0_i32 = arith.constant 0 : i32
    %c0_i32_0 = arith.constant 0 : i32
    %c0_i32_1 = arith.constant 0 : i32
    return %c0_i32, %c0_i32_0 : i32, i32
  }
  func.func @transform_30(%arg0: i32) -> (i32, i32) {
    %c0_i32 = arith.constant 0 : i32
    %c0_i32_0 = arith.constant 0 : i32
    %c0_i32_1 = arith.constant 0 : i32
    return %c0_i32, %c0_i32_0 : i32, i32
  }
  func.func @transform_31(%arg0: i32) -> (i32, i32, i32) {
    %c0_i32 = arith.constant 0 : i32
    %c0_i32_0 = arith.constant 0 : i32
    %c0_i32_1 = arith.constant 0 : i32
    return %arg0, %c0_i32, %c0_i32_0 : i32, i32, i32
  }
}

</mosaic_0001>

<bundles_post_ra>
// kernel: enhanced_gaze_transformer_forward.1
= control target key start
LH: loop header
LB: loop body
LE: loop exit
PB: predicated region body
PF: predicated region fallthrough
CT: control target
= control target key end

     0   :  { %s6810_s6 = smov 1   ;;  %s6811_s10 = smov 2   ;;  %s7772_s0 = inlined_call_operand.smem [shape: u32[32], index: -1, kind: input, shape index: {}] }
   0x1   :  { %s6856_s5 = sld [smem:[%s7772_s0]]   ;;  %s6812_s14 = smov 3  }
   0x2   :  { %s6861_s9 = sld [smem:[%s7772_s0 + %s6810_s6]]   ;;  %s6813_s18 = smov 4  }
   0x3   :  { %s6866_s13 = sld [smem:[%s7772_s0 + %s6811_s10]]   ;;  %s6814_s22 = smov 5  }
   0x4   :  { %s6871_s17 = sld [smem:[%s7772_s0 + %s6812_s14]]   ;;  %s6815_s26 = smov 6  }
   0x5   :  { %s6876_s21 = sld [smem:[%s7772_s0 + %s6813_s18]]   ;;  %s6816_s30 = smov 7  }
   0x6   :  { %s6881_s25 = sld [smem:[%s7772_s0 + %s6814_s22]]   ;;  %s6817_s4 = smov 8  }
   0x7   :  { %7796 = sst [smem:[#allocation5_spill]] %s6856_s5  ;;  %s6818_s10 = smov 9  }
   0x8   :  { %7797 = sst [smem:[#allocation6_spill]] %s6861_s9  ;;  %s6819_s15 = smov 10  }
   0x9   :  { %7798 = sst [smem:[#allocation7_spill]] %s6866_s13  ;;  %s6820_s20 = smov 11  }
   0xa   :  { %7799 = sst [smem:[#allocation8_spill]] %s6871_s17  ;;  %s6822_s1 = smov 13  }
   0xb   :  { %s6886_s29 = sld [smem:[%s7772_s0 + %s6815_s26]]   ;;  %s6821_s26 = smov 12  }
   0xc   :  { %s6891_s3 = sld [smem:[%s7772_s0 + %s6816_s30]]   ;;  %s6823_s7 = smov 14  }
   0xd   :  { %s6896_s8 = sld [smem:[%s7772_s0 + %s6817_s4]]   ;;  %s6825_s22 = smov 16  }
   0xe   :  { %s6901_s14 = sld [smem:[%s7772_s0 + %s6818_s10]]   ;;  %s6826_s28 = smov 17  }
   0xf   :  { %s6906_s19 = sld [smem:[%s7772_s0 + %s6819_s15]]   ;;  %s6824_s15 = smov 15  }
  0x10   :  { %s6911_s24 = sld [smem:[%s7772_s0 + %s6820_s20]]  }
  0x11   :  { %s6916_s30 = sld [smem:[%s7772_s0 + %s6821_s26]]  }
  0x12   :  { %7800 = sst [smem:[#allocation9_spill]] %s6891_s3 }
  0x13   :  { %7801 = sst [smem:[#allocation10_spill]] %s6896_s8 }
  0x14   :  { %s6921_s6 = sld [smem:[%s7772_s0 + %s6822_s1]]  }
  0x15   :  { %s6926_s12 = sld [smem:[%s7772_s0 + %s6823_s7]]   ;;  %s6827_s7 = smov 18  }
  0x16   :  { %s6931_s20 = sld [smem:[%s7772_s0 + %s6824_s15]]   ;;  %s6828_s15 = smov 19  }
  0x17   :  { %s6936_s27 = sld [smem:[%s7772_s0 + %s6825_s22]]   ;;  %s6829_s22 = smov 20  }
  0x18   :  { %s6941_s4 = sld [smem:[%s7772_s0 + %s6826_s28]]   ;;  %s6830_s28 = smov 21  }
  0x1a   :  { %7802 = sst [smem:[#allocation11_spill]] %s6921_s6 }
  0x1b   :  { %7803 = sst [smem:[#allocation12_spill]] %s6926_s12 }
  0x1c   :  { %s6946_s12 = sld [smem:[%s7772_s0 + %s6827_s7]]   ;;  %s6831_s7 = smov 22  }
  0x1d   :  { %7804 = sst [smem:[#allocation13_spill]] %s6936_s27 }
  0x1e   :  { %7805 = sst [smem:[#allocation14_spill]] %s6941_s4 }
  0x1f   :  { %s6951_s6 = sld [smem:[%s7772_s0 + %s6828_s15]]   ;;  %s6832_s15 = smov 23  }
  0x20   :  { %s6956_s27 = sld [smem:[%s7772_s0 + %s6829_s22]]   ;;  %s6833_s22 = smov 24  }
  0x21   :  { %s6961_s4 = sld [smem:[%s7772_s0 + %s6830_s28]]   ;;  %s6834_s28 = smov 25  }
  0x22   :  { %7806 = sst [smem:[#allocation15_spill]] %s6946_s12 }
  0x23   :  { %s6966_s12 = sld [smem:[%s7772_s0 + %s6831_s7]]   ;;  %s6835_s7 = smov 26  }
  0x25   :  { %7807 = sst [smem:[#allocation16_spill]] %s6951_s6 }
  0x26   :  { %7808 = sst [smem:[#allocation17_spill]] %s6956_s27 }
  0x27   :  { %7809 = sst [smem:[#allocation18_spill]] %s6961_s4 }
  0x28   :  { %s6971_s6 = sld [smem:[%s7772_s0 + %s6832_s15]]   ;;  %s6836_s15 = smov 27  }
  0x29   :  { %7810 = sst [smem:[#allocation19_spill]] %s6966_s12 }
  0x2a   :  { %s6976_s27 = sld [smem:[%s7772_s0 + %s6833_s22]]   ;;  %s6837_s22 = smov 28  }
  0x2b   :  { %s6981_s4 = sld [smem:[%s7772_s0 + %s6834_s28]]   ;;  %s6838_s28 = smov 29  }
  0x2c   :  { %s6986_s12 = sld [smem:[%s7772_s0 + %s6835_s7]]   ;;  %s6839_s7 = smov 30  }
  0x2e   :  { %7811 = sst [smem:[#allocation20_spill]] %s6971_s6 }
  0x2f   :  { %s6991_s6 = sld [smem:[%s7772_s0 + %s6836_s15]]   ;;  %s6840_s15 = smov 31  }
  0x30   :  { %7812 = sst [smem:[#allocation21_spill]] %s6976_s27 }
  0x31   :  { %7813 = sst [smem:[#allocation22_spill]] %s6981_s4 }
  0x32   :  { %7814 = sst [smem:[#allocation23_spill]] %s6986_s12 }
  0x33   :  { %s6996_s27 = sld [smem:[%s7772_s0 + %s6837_s22]]  }
  0x34   :  { %s7001_s4 = sld [smem:[%s7772_s0 + %s6838_s28]]  }
  0x35   :  { %7815 = sst [smem:[#allocation24_spill]] %s6991_s6 }
  0x36   :  { %s7006_s12 = sld [smem:[%s7772_s0 + %s6839_s7]]  }
  0x37   :  { %s7011_s6 = sld [smem:[%s7772_s0 + %s6840_s15]]  }
  0x3a   :  { %7816 = sst [smem:[#allocation25_spill]] %s7001_s4 }
  0x3b   :  { %68 = vsyncpa [#allocation3], 0 }
  0x3c   :  { %70 = vsyncpa [#allocation3 + $0x1], 0  ;;  %s7013_s22 = smov 0   ;;  %s7015_s23 = smov 0  }
  0x3d   :  { %s7017_s26 = smov 0   ;;  %s7019_s28 = smov 0  }
  0x3e LB: > { %s7817_s8 = sld [smem:[#allocation10_spill]]  ;;  %s7818_s4 = sld [smem:[#allocation25_spill]]  ;;  %s6804_s26 = sphi %s7017_s26, %s7845_s26   ;;  %s6800_s23 = sphi %s7015_s23, %s7844_s23   ;;  %s6796_s22 = sphi %s7013_s22, %s7843_s22   ;;  %s6808_s28 = sphi %s7019_s28, %s7846_s28  }
  0x3f   : > { %s7819_s3 = sld [smem:[#allocation9_spill]]  ;;  %s7034_s0 = sadd.s32 4294967295, %s6808_s28  }
  0x40   : > { %s5307_s1 = sadd.s32 4294967294, %s6808_s28   ;;  %s7038_s2 = sadd.s32 1, %s6808_s28  }
  0x41   : > { %s744_s7 = sadd.s32 1, %s6804_s26  ;;  %s741_s10 = ssub.s32 %s6808_s28, %s7038_s2 }
  0x42   : > { %p754_p0 = scmp.ne.s32.totalorder %s6804_s26, %s6800_s23  ;;  %p742_p1 = scmp.eq.s32.totalorder %s741_s10, 0 }
  0x43   : > { %p755_p2 = scmp.eq.s32.totalorder %s7034_s0, 1  ;;  %p760_p3 = scmp.ne.s32.totalorder %s6800_s23, %s6796_s22 }
  0x44   : > { %p761_p4 = scmp.eq.s32.totalorder %s5307_s1, 1  ;;  %p5310_p7 = scmp.ge.s32.totalorder %s6808_s28, 1 }
  0x45   : > { %s7049_s11 = scalar_select %p742_p1, %s6804_s26, %s744_s7  }
  0x46   : > { %p7051_p5 = por %p755_p2, %p754_p0  ;;  %p7055_p6 = por %p761_p4, %p760_p3 }
  0x47   : > { %p879_p8 = scmp.lt.s32.totalorder %s6808_s28, 3 }
  0x49   : > { %p880_p9 = pnand %p5310_p7, %p879_p8 }
  0x4a   : > { %s7822_s17 = sld [smem:[#allocation8_spill]] (!%p880_p9)  ;;  %s7823_s5 = sld [smem:[#allocation5_spill]] (!%p880_p9)  ;;  %vm982_vm0 = vcmask (!%p880_p9), 1043456   ;;  %v6841_v1 = vmov (!%p880_p9), 0.0   ;;  %vm6842_vm1 = vmmov (!%p880_p9), 0   ;;  %vm978_vm2 = vcmask (!%p880_p9), 64512  }
  0x4b   : > { %883 = sbr.rel (%p880_p9) target bundleno = 10264 (0x2818), region = 144  ;;  %p960_p10 = scmp.lt.s32.totalorder (!%p880_p9), %s7034_s0, 1  ;;  %5992 = vmatprep.subr.bf16.mxu0 (!%p880_p9), %v6841_v1  ;;  %5994 = vmatprep.mubr.msk.bf16.mxu0 (!%p880_p9), %vm6842_vm1, %v6841_v1  ;;  %v5312_v5 = vld [vmem:[%s6876_s21] ss:$0 sm:$0xff] (!%p880_p9)  ;;  %v6410_v26 = vld [vmem:[%s6901_s14 + $0x4] ss:$12 sps:$4 sm:$0xff] (!%p880_p9)  }
  0x4c   : > { %s7824_s13 = sld [smem:[#allocation7_spill]] (!%p880_p9)  ;;  %v5314_v19 = vld [vmem:[%s6881_s25] ss:$0 sm:$0xff] (!%p880_p9)  ;;  %v6413_v28 = vld [vmem:[%s6901_s14 + $0x8] ss:$12 sps:$4 sm:$0xff] (!%p880_p9)   ;;  %1276 = vmatprep.subr.bf16.mxu1 (!%p880_p9), %v6410_v26  ;;  %v6843_v49 = vmov (!%p880_p9), 0  }
  0x4d   : > { %v5315_v21 = vld [vmem:[%s6886_s29] ss:$0 sm:$0xff] (!%p880_p9)  ;;  %v6414_v29 = vld [vmem:[%s6901_s14 + $0x1c] ss:$12 sps:$4 sm:$0xff] (!%p880_p9)   ;;  %v6416_v31 = vld [vmem:[%s6901_s14 + $0x18] ss:$12 sps:$4 sm:$0xff] (!%p880_p9)   ;;  %1308 = vmatprep.mubr.bf16.mxu1 (!%p880_p9), %v6843_v49 }
  0x4e   : > { %v6412_v27 = vld [vmem:[%s6901_s14] ss:$12 sps:$4 sm:$0xff] (!%p880_p9)   ;;  %v6420_v37 = vld [vmem:[%s6901_s14 + $0x30] ss:$12 sps:$4 sm:$0xff] (!%p880_p9)   ;;  %v6421_v38 = vld [vmem:[%s6901_s14 + $0x38] ss:$12 sps:$4 sm:$0xff] (!%p880_p9)  }
  0x4f   : > { %v6417_v30 = vld [vmem:[%s6901_s14 + $0x20] ss:$12 sps:$4 sm:$0xff] (!%p880_p9)   ;;  %1277 = vmatpush1.bf16.msra.mxu1 (!%p880_p9), %v6412_v27  ;;  %v6424_v40 = vld [vmem:[%s6901_s14 + $0x48] ss:$12 sps:$4 sm:$0xff] (!%p880_p9)   ;;  %v6425_v41 = vld [vmem:[%s6901_s14 + $0x50] ss:$12 sps:$4 sm:$0xff] (!%p880_p9)  }
  0x50   : > { %v970_v0 = vld [vmem:[%s7822_s17] sm:$0xf] (!%p880_p9)  ;;  %1278 = vmatprep.subr.bf16.mxu1 (!%p880_p9), %v6414_v29  ;;  %v6422_v39 = vld [vmem:[%s6901_s14 + $0x4c] ss:$12 sps:$4 sm:$0xff] (!%p880_p9)   ;;  %v6426_v42 = vld [vmem:[%s6901_s14 + $0x64] ss:$12 sps:$4 sm:$0xff] (!%p880_p9)  }
  0x51   : > { %v984_v2 = vsel (!%p880_p9), %vm982_vm0, %v970_v0, 0  ;;  %v6418_v32 = vld [vmem:[%s6901_s14 + $0x34] ss:$12 sps:$4 sm:$0xff] (!%p880_p9)   ;;  %v6430_v45 = vld [vmem:[%s6901_s14 + $0x7c] ss:$12 sps:$4 sm:$0xff] (!%p880_p9)   ;;  %vm1364_vm3 = vcmask (!%p880_p9), 261120  }
  0x52   : > { %5993 = vmatpush3.bf16.msra.mxu0 %v984_v2  ;;  %s7068_s18 = scalar_select %p960_p10, %s7034_s0, 1  ;;  %v1054_v23 = vld [vmem:[%s7824_s13] sm:$0xff]  ;;  %v6429_v44 = vld [vmem:[%s6901_s14 + $0x68] ss:$12 sps:$4 sm:$0xff]   ;;  %v6436_v50 = vld [vmem:[%s6901_s14 + $0x90] ss:$12 sps:$4 sm:$0xff]   ;;  %v1061_v2 = vlaneseq }
  0x53   : > { %5998 = vmatprep.subr.bf16.mxu0 %v6841_v1  ;;  %1279 = vmatpush1.bf16.msra.mxu1 %v6416_v31  ;;  %v6428_v43 = vld [vmem:[%s6901_s14 + $0x60] ss:$12 sps:$4 sm:$0xff]   ;;  %v6432_v46 = vld [vmem:[%s6901_s14 + $0x78] ss:$12 sps:$4 sm:$0xff]   ;;  %v6440_v53 = vld [vmem:[%s6901_s14 + $0xa8] ss:$12 sps:$4 sm:$0xff]  }
  0x54   : > { %s5311_s1 = sshll.u32 %s7068_s18, 3  ;;  %1280 = vmatprep.subr.bf16.mxu1 %v6418_v32  ;;  %v6433_v47 = vld [vmem:[%s6901_s14 + $0x80] ss:$12 sps:$4 sm:$0xff]   ;;  %v6437_v51 = vld [vmem:[%s6901_s14 + $0x98] ss:$12 sps:$4 sm:$0xff]   ;;  %s7781_s10 = smov 96  }
  0x55   : > { %s963_s7 = scalar_lea.vmem %s7823_s5, %s5311_s1  ;;  %v6434_v48 = vld [vmem:[%s6901_s14 + $0x94] ss:$12 sps:$4 sm:$0xff]   ;;  %v6438_v52 = vld [vmem:[%s6901_s14 + $0xac] ss:$12 sps:$4 sm:$0xff]   ;;  %v6441_v54 = vld [vmem:[%s6901_s14 + $0xb0] ss:$12 sps:$4 sm:$0xff]  }
  0x56   : > { %v968_v3 = vld [vmem:[%s963_s7] sm:$0xff]  ;;  %s7825_s9 = sld [smem:[#allocation6_spill]]  ;;  %s7785_s1 = smov 64   ;;  %vm1057_vm4 = vcmask 57344   ;;  %vm1815_vm8 = vcmask 523264   ;;  %vm1817_vm9 = vcmask 785408  }
  0x57   : > { %v969_v4 = vpack.c.bf16 %v968_v3, %v968_v3  ;;  %1281 = vmatpush1.bf16.msra.mxu1 %v6420_v37  ;;  %v5316_v59 = vld [vmem:[%s7819_s3] ss:$0 sm:$0xff]  ;;  %v1134_v3 = vshrl.u32 %v1061_v2, 7  ;;  %s7783_s7 = smov 32   ;;  %s7830_s5 = sld [smem:[#allocation13_spill]]  ;;  %vm4977_vm10 = vcmask 1040384  }
  0x58   : > { %1282 = vmatprep.subr.bf16.mxu1 %v6422_v39  ;;  %v5317_v61 = vld [vmem:[%s7817_s8] ss:$0 sm:$0xff]  ;;  %s7832_s13 = smov 64   ;;  %s7833_s17 = smov 32   ;;  %vm5103_vm11 = vcmask 516096  }
  0x59   : > { %5995 = vmatmul.mubr.msk.bf16.vlgmr.msra.gmra.mrb[0].mxu0 %vm978_vm2, %v969_v4  ;;  %v7128_v4 = vsub.s32 0, %v1134_v3 }
  0x5a   : > { %6014 = vmatprep.mubr.msk.bf16.mxu0 %vm6842_vm1, %v6841_v1  ;;  %5999 = vmatpush3.bf16.msra.mxu0 %v6413_v28 }
  0x5b   : > { %6000 = vmatprep.subr.bf16.mxu0 %v6841_v1  ;;  %1283 = vmatpush1.bf16.msra.mxu1 %v6424_v40  ;;  %v1062_v40 = vand.u32 127, %v1061_v2 }
  0x5c   : > { %1284 = vmatprep.subr.bf16.mxu1 %v6426_v42 }
  0x5d   : > { %vm1063_vm5 = vcmp.eq.s32.totalorder %v1062_v40, 0 }
  0x5e   : > { %6001 = vmatpush3.bf16.msra.mxu0 %v6417_v30 }
  0x5f   : > { %6002 = vmatprep.subr.bf16.mxu0 %v6841_v1  ;;  %1285 = vmatpush1.bf16.msra.mxu1 %v6428_v43 }
  0x60   : > { %1286 = vmatprep.subr.bf16.mxu1 %v6430_v45 }
  0x62   : > { %6003 = vmatpush3.bf16.msra.mxu0 %v6421_v38 }
  0x63   : > { %6004 = vmatprep.subr.bf16.mxu0 %v6841_v1  ;;  %1287 = vmatpush1.bf16.msra.mxu1 %v6432_v46 }
  0x64   : > { %1288 = vmatprep.subr.bf16.mxu1 %v6434_v48 }
  0x66   : > { %6005 = vmatpush3.bf16.msra.mxu0 %v6425_v41 }
  0x67   : > { %6006 = vmatprep.subr.bf16.mxu0 %v6841_v1  ;;  %1289 = vmatpush1.bf16.msra.mxu1 %v6436_v50 }
  0x68   : > { %1290 = vmatprep.subr.bf16.mxu1 %v6438_v52 }
  0x6a   : > { %6007 = vmatpush3.bf16.msra.mxu0 %v6429_v44 }
  0x6b   : > { %6008 = vmatprep.subr.bf16.mxu0 %v6841_v1  ;;  %1291 = vmatpush1.bf16.msra.mxu1 %v6440_v53 }
  0x6c   : > { %6030 = vmatprep.subr.bf16.mxu1 %v6841_v1 }
  0x6e   : > { %6009 = vmatpush3.bf16.msra.mxu0 %v6433_v47 }
  0x6f   : > { %6010 = vmatprep.subr.bf16.mxu0 %v6841_v1 }
  0x72   : > { %6011 = vmatpush3.bf16.msra.mxu0 %v6437_v51 }
  0x73   : > { %6012 = vmatprep.subr.bf16.mxu0 %v6841_v1 }
  0x76   : > { %6013 = vmatpush3.bf16.msra.mxu0 %v6441_v54 }
  0x77   : > { %6018 = vmatprep.subr.bf16.mxu0 %v6841_v1 }
 0x12c   : > { %v1020_v6 = vpop.f32.mrb[0].mxu0 }
 0x12d   : > { %v1021_v7 = vadd.f32 %v5312_v5, %v1020_v6  ;;  %v5996_v8 = vpop.f32.mrb[1].mxu0  ;;  %v1131_v5 = vld [vmem:[%s6906_s19] sm:$0x7]  ;;  %v7131_v6 = vsub.s32 1, %v1134_v3 }
 0x12e   : > { %v1023_v9 = vpop.f32.mrb[2].mxu0  ;;  %v7134_v8 = vsub.s32 2, %v1134_v3 }
 0x12f   : > { %1028 = vadd.xlane.f32.xlu0 %v1021_v7  ;;  %v5997_v10 = vpop.f32.mrb[3].mxu0  ;;  %v1140_v9 = vrot.slane %v1131_v5, %v7131_v6 }
 0x1bc   : > { %v1029_v11 = vpop.xlane.xlu0 %1028 }
 0x1bd   : > { %v1031_v12 = vmul.f32 0.0078125, %v1029_v11 }
 0x1bf   : > { %v1032_v13 = vsub.f32 %v1021_v7, %v1031_v12  ;;  %v1136_v7 = vrot.slane %v1131_v5, %v7128_v4 }
 0x1c1   : > { %v1033_v14 = vmul.f32 %v1032_v13, %v1032_v13 }
 0x1c3   : > { %1034 = vadd.xlane.f32.xlu0 %v1033_v14 }
 0x250   : > { %v1035_v15 = vpop.xlane.xlu0 %1034 }
 0x251   : > { %v1036_v16 = vmul.f32 0.0078125, %v1035_v15  ;;  %v1144_v15 = vrot.slane %v1131_v5, %v7134_v8 }
 0x253   : > { %v1037_v17 = vadd.f32 1e-05, %v1036_v16 }
 0x255   : > { %6678 = vrsqrt.f32 %v1037_v17 }
 0x25f   : > { %v6679_v18 = vpop.eup %6678 }
 0x260   : > { %v1039_v20 = vmul.f32 %v6679_v18, %v1032_v13 }
 0x262   : > { %v1046_v22 = vmul.f32 %v5314_v19, %v1039_v20 }
 0x264   : > { %v7080_v24 = vadd.f32 %v5315_v21, %v1046_v22 }
 0x266   : > { %v7083_v25 = vadd.f32 %v1054_v23, %v7080_v24 }
 0x268   : > { %1073 = vadd.xlane.f32.xlu1 %v7083_v25 }
 0x2f5   : > { %v1074_v33 = vpop.xlane.xlu1 %1073 }
 0x2f6   : > { %v1075_v34 = vmul.f32 0.0078125, %v1074_v33 }
 0x2f8   : > { %v1076_v35 = vsub.f32 %v7083_v25, %v1075_v34 }
 0x2fa   : > { %v1077_v36 = vmul.f32 %v1076_v35, %v1076_v35 }
 0x2fc   : > { %1078 = vadd.xlane.f32.xlu1 %v1077_v36 }
 0x389   : > { %v1079_v55 = vpop.xlane.xlu1 %1078 }
 0x38a   : > { %v1080_v56 = vmul.f32 0.0078125, %v1079_v55 }
 0x38c   : > { %v1081_v57 = vadd.f32 1e-05, %v1080_v56 }
 0x38e   : > { %6680 = vrsqrt.f32 %v1081_v57 }
 0x398   : > { %v6681_v58 = vpop.eup %6680 }
 0x399   : > { %v1083_v60 = vmul.f32 %v6681_v58, %v1076_v35 }
 0x39b   : > { %v1090_v62 = vmul.f32 %v5316_v59, %v1083_v60 }
 0x39d   : > { %v1097_v63 = vadd.f32 %v5317_v61, %v1090_v62 }
 0x39f   : > { %v1098_v0 = vpack.c.bf16 %v1097_v63, %v1097_v63 }
 0x3a1   : > { %1309 = vmatmul.mubr.bf16.vlgmr.msra.gmra.mrb[0].mxu1 %v1098_v0  ;;  %6015 = vmatmul.mubr.bf16.vlgmr.msra.gmra.mrb[4].mxu0 %v1098_v0 }
 0x3a2   : > { %6020 = vmatprep.mubr.msk.bf16.mxu0 %vm6842_vm1, %v6841_v1  ;;  %6032 = vmatprep.mubr.msk.bf16.mxu1 %vm6842_vm1, %v6841_v1 }
 0x474   : > { %v1310_v10 = vpop.f32.mrb[0].mxu1  ;;  %v1351_v11 = vpop.f32.mrb[4].mxu0 }
 0x475   : > { %v1311_v12 = vadd.f32 %v1310_v10, %v1136_v7  ;;  %v1312_v13 = vpop.f32.mrb[1].mxu1  ;;  %v6016_v14 = vpop.f32.mrb[5].mxu0  ;;  %v1352_v23 = vadd.f32 %v1351_v11, %v1144_v15 }
 0x476   : > { %v1313_v16 = vadd.f32 %v1312_v13, %v1140_v9  ;;  %v1314_v17 = vpop.f32.mrb[2].mxu1  ;;  %v1354_v18 = vpop.f32.mrb[6].mxu0 }
 0x477   : > { %v1357_v19 = vpack.c.bf16 %v1311_v12, %v1311_v12  ;;  %v1315_v20 = vpop.f32.mrb[3].mxu1  ;;  %v6017_v21 = vpop.f32.mrb[7].mxu0  ;;  %v7143_v27 = vpack.c.bf16 %v1352_v23, %v1352_v23 }
 0x478   : > { %v1358_v22 = vpack.c.bf16 %v1313_v16, %v1313_v16 }
 0x479   : > { %1470 = vrot.lane.b32.xlu1 %v1357_v19, %s7781_s10  ;;  %v1427_v28 = vsel %vm982_vm0, %v7143_v27, 0 }
 0x47a   : > { %1473 = vrot.lane.b32.xlu0 %v1358_v22, %s7781_s10  ;;  %v1369_v26 = vsel %vm1364_vm3, %v1358_v22, 0  ;;  %s966_s10 = scalar_lea.vmem %s7825_s9, %s7068_s18  ;;  %s7826_s18 = smov 96  }
 0x47b   : > { %6019 = vmatpush3.bf16.xpose.msra.mxu0 %v1369_v26  ;;  %v1056_v29 = vld [vmem:[%s966_s10] sm:$0x1]  ;;  %s7827_s10 = sld [smem:[#allocation14_spill]]  ;;  %s7831_s9 = sld [smem:[#allocation15_spill]] }
 0x47c   : > { %6024 = vmatprep.subr.bf16.mxu0 %v6841_v1  ;;  %v1058_v30 = vsel %vm1057_vm4, %v1056_v29, -inf }
 0x47d   : > { %1584 = vrot.lane.b32.xlu1 %v1358_v22, %s7785_s1 }
 0x47e   : > { %1694 = vrot.lane.b32.xlu0 %v1358_v22, %s7783_s7 }
 0x481   : > { %1582 = vrot.lane.b32.xlu1 %v1357_v19, %s7785_s1 }
 0x482   : > { %6021 = vmatmul.mubr.msk.bf16.vlgmr.msra.gmra.mrb[8].mxu0 %vm1364_vm3, %v1357_v19 }
 0x483   : > { %6025 = vmatpush3.bf16.msra.mxu0 %v1427_v28  ;;  %6026 = vmatprep.mubr.msk.bf16.mxu0 %vm6842_vm1, %v6841_v1 }
 0x484   : > { %6036 = vmatprep.subr.bf16.mxu0 %v6841_v1 }
 0x485   : > { %1692 = vrot.lane.b32.xlu1 %v1357_v19, %s7783_s7 }
 0x49d   : > { %1059 = vmax.xlane.f32.xlu0 %v1058_v30 }
 0x4eb   : > { %v1471_v31 = vpop.permute.xlu1 %1470 }
 0x4ec   : > { %v1474_v32 = vpop.permute.xlu0 %1473 }
 0x4ed   : > { %v1479_v33 = vsel %vm1364_vm3, %v1474_v32, 0 }
 0x4ee   : > { %6031 = vmatpush3.bf16.xpose.msra.mxu1 %v1479_v33 }
 0x4ef   : > { %6042 = vmatprep.subr.bf16.mxu1 %v6841_v1  ;;  %v1585_v34 = vpop.permute.xlu1 %1584 }
 0x4f0   : > { %v1590_v35 = vsel %vm1364_vm3, %v1585_v34, 0  ;;  %v1695_v36 = vpop.permute.xlu0 %1694 }
 0x4f1   : > { %v1700_v38 = vsel %vm1364_vm3, %v1695_v36, 0 }
 0x4f3   : > { %v1583_v37 = vpop.permute.xlu1 %1582 }
 0x4f5   : > { %6033 = vmatmul.mubr.msk.bf16.vlgmr.msra.gmra.mrb[4].mxu1 %vm1364_vm3, %v1471_v31 }
 0x4f6   : > { %6043 = vmatpush3.bf16.xpose.msra.mxu1 %v1590_v35  ;;  %6044 = vmatprep.mubr.msk.bf16.mxu1 %vm6842_vm1, %v6841_v1 }
 0x4f7   : > { %6054 = vmatprep.subr.bf16.mxu1 %v6841_v1  ;;  %v1693_v39 = vpop.permute.xlu1 %1692 }
 0x4fd   : > { %6045 = vmatmul.mubr.msk.bf16.vlgmr.msra.gmra.mrb[8].mxu1 %vm1364_vm3, %v1583_v37 }
 0x4fe   : > { %6055 = vmatpush3.bf16.xpose.msra.mxu1 %v1700_v38  ;;  %6056 = vmatprep.mubr.msk.bf16.mxu1 %vm6842_vm1, %v6841_v1 }
 0x4ff   : > { %6066 = vmatprep.subr.bf16.mxu1 %v6841_v1 }
 0x505   : > { %6057 = vmatmul.mubr.msk.bf16.vlgmr.msra.gmra.mrb[12].mxu1 %vm1364_vm3, %v1693_v39 }
 0x506   : > { %6082 = vmatprep.mubr.msk.bf16.mxu1 %vm6842_vm1, %v6841_v1 }
 0x52a   : > { %v1060_v41 = vpop.xlane.xlu0 %1059 }
 0x52b   : > { %vm1064_vm6 = vcmp.lt.f32.partialorder %v1060_v41, 0.5 }
 0x52c   : > { %vm1067_vm7 = vmand %vm1063_vm5, %vm1064_vm6 }
 0x52d   : > { %v7173_v42 = vsel %vm1067_vm7, 1.0, %v1056_v29 }
 0x52e   : > { %v1069_v43 = vsub.f32 1.0, %v7173_v42 }
 0x530   : > { %v1070_v44 = vmul.f32 -1e+30, %v1069_v43 }
 0x532   : > { %v7177_v45 = vrot.slane %v1070_v44, %v7128_v4 }
 0x555   : > { %v1405_v46 = vpop.f32.mrb[8].mxu0 }
 0x556   : > { %v1406_v47 = vadd.f32 %v1405_v46, %v7177_v45  ;;  %v6022_v48 = vpop.f32.mrb[9].mxu0 }
 0x557   : > { %v1408_v50 = vpop.f32.mrb[10].mxu0 }
 0x558   : > { %v6023_v51 = vpop.f32.mrb[11].mxu0  ;;  %v1411_v52 = vsel %vm978_vm2, %v1406_v47, -inf }
 0x559   : > { %1412 = vmax.xlane.f32.xlu1 %v1411_v52 }
 0x5c8   : > { %v1515_v53 = vpop.f32.mrb[4].mxu1 }
 0x5c9   : > { %v1516_v54 = vadd.f32 %v1515_v53, %v7177_v45  ;;  %v6034_v55 = vpop.f32.mrb[5].mxu1 }
 0x5ca   : > { %v1518_v56 = vpop.f32.mrb[6].mxu1 }
 0x5cb   : > { %v6035_v57 = vpop.f32.mrb[7].mxu1  ;;  %v1521_v58 = vsel %vm978_vm2, %v1516_v54, -inf }
 0x5cc   : > { %1522 = vmax.xlane.f32.xlu0 %v1521_v58 }
 0x5d0   : > { %v1626_v59 = vpop.f32.mrb[8].mxu1 }
 0x5d1   : > { %v1627_v60 = vadd.f32 %v1626_v59, %v7177_v45  ;;  %v6046_v61 = vpop.f32.mrb[9].mxu1 }
 0x5d2   : > { %v1629_v62 = vpop.f32.mrb[10].mxu1 }
 0x5d3   : > { %v6047_v63 = vpop.f32.mrb[11].mxu1  ;;  %v1632_v0 = vsel %vm978_vm2, %v1627_v60, -inf  ;;  %v6442_v62 = vld [vmem:[%s6911_s24] sm:$0xff]  }
 0x5d4   : > { %1633 = vmax.xlane.f32.xlu0 %v1632_v0  ;;  %6067 = vmatpush3.bf16.msra.mxu1 %v6442_v62  ;;  %v6443_v63 = vld [vmem:[%s6911_s24 + $0x8] sm:$0xff]   ;;  %v6444_v0 = vld [vmem:[%s6911_s24 + $0x10] sm:$0xff]  }
 0x5d5   : > { %6068 = vmatprep.subr.bf16.mxu1 %v6841_v1  ;;  %v6476_v62 = vld [vmem:[%s7827_s10 + $0x48] sm:$0xff]  }
 0x5d8   : > { %v1736_v2 = vpop.f32.mrb[12].mxu1  ;;  %6069 = vmatpush3.bf16.msra.mxu1 %v6443_v63  ;;  %v6477_v63 = vld [vmem:[%s7827_s10 + $0x8] sm:$0xff]  }
 0x5d9   : > { %v1737_v3 = vadd.f32 %v1736_v2, %v7177_v45  ;;  %v6058_v5 = vpop.f32.mrb[13].mxu1  ;;  %6070 = vmatprep.subr.bf16.mxu1 %v6841_v1  ;;  %v6445_v2 = vld [vmem:[%s6911_s24 + $0x18] sm:$0xff]  }
 0x5da   : > { %v1739_v7 = vpop.f32.mrb[14].mxu1  ;;  %v6447_v5 = vld [vmem:[%s6911_s24 + $0x28] sm:$0xff]  }
 0x5db   : > { %v6059_v9 = vpop.f32.mrb[15].mxu1  ;;  %v1742_v10 = vsel %vm978_vm2, %v1737_v3, -inf  ;;  %v6448_v7 = vld [vmem:[%s6911_s24 + $0x30] sm:$0xff]  }
 0x5dc   : > { %1743 = vmax.xlane.f32.xlu0 %v1742_v10  ;;  %6071 = vmatpush3.bf16.msra.mxu1 %v6444_v0  ;;  %v6478_v0 = vld [vmem:[%s7827_s10 + $0x50] sm:$0xff]  }
 0x5dd   : > { %6072 = vmatprep.subr.bf16.mxu1 %v6841_v1 }
 0x5e0   : > { %6073 = vmatpush3.bf16.msra.mxu1 %v6445_v2  ;;  %v6479_v2 = vld [vmem:[%s7827_s10 + $0x10] sm:$0xff]  }
 0x5e1   : > { %6074 = vmatprep.subr.bf16.mxu1 %v6841_v1 }
 0x5e6   : > { %v1413_v11 = vpop.xlane.xlu1 %1412 }
 0x5e7   : > { %v1414_v12 = vsub.f32 %v1406_v47, %v1413_v11 }
 0x5e9   : > { %v1415_v13 = vmul.f32 1.442695, %v1414_v12 }
 0x5eb   : > { %6682 = vpow2.f32 %v1415_v13  ;;  %v6449_v13 = vld [vmem:[%s6911_s24 + $0x38] sm:$0xff]  }
 0x5f5   : > { %v6683_v14 = vpop.eup %6682 }
 0x5f6   : > { %v1417_v15 = vsel %vm978_vm2, %v6683_v14, 0.0 }
 0x5f7   : > { %1418 = vadd.xlane.f32.xlu1 %v1417_v15 }
 0x608   : > { %1534 = vrot.lane.b32.xlu1 %v7143_v27, %s7826_s18 }
 0x659   : > { %v1523_v16 = vpop.xlane.xlu0 %1522 }
 0x65a   : > { %v1524_v17 = vsub.f32 %v1516_v54, %v1523_v16 }
 0x65c   : > { %v1525_v18 = vmul.f32 1.442695, %v1524_v17 }
 0x65e   : > { %6684 = vpow2.f32 %v1525_v18 }
 0x661   : > { %v1634_v19 = vpop.xlane.xlu0 %1633 }
 0x662   : > { %v1635_v20 = vsub.f32 %v1627_v60, %v1634_v19 }
 0x664   : > { %v1636_v21 = vmul.f32 1.442695, %v1635_v20 }
 0x666   : > { %6686 = vpow2.f32 %v1636_v21 }
 0x668   : > { %v6685_v22 = vpop.eup %6684 }
 0x669   : > { %v1744_v23 = vpop.xlane.xlu0 %1743  ;;  %v1527_v26 = vsel %vm978_vm2, %v6685_v22, 0.0 }
 0x66a   : > { %v1745_v28 = vsub.f32 %v1737_v3, %v1744_v23  ;;  %1528 = vadd.xlane.f32.xlu0 %v1527_v26  ;;  %v6446_v3 = vld [vmem:[%s6911_s24 + $0x20] sm:$0xff]  }
 0x66b   : > { %6075 = vmatpush3.bf16.msra.mxu1 %v6446_v3  ;;  %v6480_v3 = vld [vmem:[%s7827_s10 + $0x58] sm:$0xff]  }
 0x66c   : > { %v1746_v29 = vmul.f32 1.442695, %v1745_v28  ;;  %6076 = vmatprep.subr.bf16.mxu1 %v6841_v1 }
 0x66e   : > { %6688 = vpow2.f32 %v1746_v29 }
 0x66f   : > { %6077 = vmatpush3.bf16.msra.mxu1 %v6447_v5  ;;  %v6481_v5 = vld [vmem:[%s7827_s10 + $0x18] sm:$0xff]  }
 0x670   : > { %v6687_v30 = vpop.eup %6686  ;;  %6078 = vmatprep.subr.bf16.mxu1 %v6841_v1 }
 0x671   : > { %v1638_v31 = vsel %vm978_vm2, %v6687_v30, 0.0 }
 0x672   : > { %1639 = vadd.xlane.f32.xlu1 %v1638_v31 }
 0x673   : > { %6079 = vmatpush3.bf16.msra.mxu1 %v6448_v7  ;;  %v6482_v7 = vld [vmem:[%s7827_s10 + $0x60] sm:$0xff]  }
 0x674   : > { %6080 = vmatprep.subr.bf16.mxu1 %v6841_v1 }
 0x677   : > { %6081 = vmatpush3.bf16.msra.mxu1 %v6449_v13 }
 0x678   : > { %v6689_v32 = vpop.eup %6688 }
 0x679   : > { %v1748_v33 = vsel %vm978_vm2, %v6689_v32, 0.0 }
 0x67a   : > { %1749 = vadd.xlane.f32.xlu0 %v1748_v33 }
 0x683   : > { %1754 = vrot.lane.b32.xlu1 %v7143_v27, %s7783_s7 }
 0x684   : > { %v1419_v34 = vpop.xlane.xlu1 %1418 }
 0x685   : > { %6690 = vrcp.f32 %v1419_v34 }
 0x688   : > { %v1535_v37 = vpop.permute.xlu1 %1534 }
 0x689   : > { %v1540_v39 = vsel %vm982_vm0, %v1535_v37, 0 }
 0x68f   : > { %v6691_v35 = vpop.eup %6690 }
 0x690   : > { %v1421_v36 = vmul.f32 %v6691_v35, %v6683_v14  ;;  %1644 = vrot.lane.b32.xlu0 %v7143_v27, %s7785_s1 }
 0x692   : > { %v1422_v38 = vpack.c.bf16 %v1421_v36, %v1421_v36 }
 0x694   : > { %6027 = vmatmul.mubr.msk.bf16.vlgmr.msra.gmra.mrb[12].mxu0 %vm978_vm2, %v1422_v38 }
 0x695   : > { %6037 = vmatpush3.bf16.msra.mxu0 %v1540_v39  ;;  %6038 = vmatprep.mubr.msk.bf16.mxu0 %vm6842_vm1, %v6841_v1  ;;  %v6450_v39 = vld [vmem:[%s6931_s20] ss:$8 sps:$4 sm:$0xff]  }
 0x696   : > { %6048 = vmatprep.subr.bf16.mxu0 %v6841_v1 }
 0x6f7   : > { %v1529_v40 = vpop.xlane.xlu0 %1528 }
 0x6f8   : > { %6692 = vrcp.f32 %v1529_v40  ;;  %v6452_v40 = vld [vmem:[%s6931_s20 + $0x4] ss:$8 sps:$4 sm:$0xff]  }
 0x6ff   : > { %v1640_v41 = vpop.xlane.xlu1 %1639 }
 0x700   : > { %6694 = vrcp.f32 %v1640_v41  ;;  %v6455_v41 = vld [vmem:[%s6931_s20 + $0x14] ss:$8 sps:$4 sm:$0xff]  }
 0x702   : > { %v6693_v43 = vpop.eup %6692 }
 0x703   : > { %v1531_v44 = vmul.f32 %v6693_v43, %v6685_v22  ;;  %v1755_v52 = vpop.permute.xlu1 %1754  ;;  %v6453_v43 = vld [vmem:[%s6931_s20 + $0x10] ss:$8 sps:$4 sm:$0xff]  }
 0x704   : > { %v1760_v54 = vsel %vm982_vm0, %v1755_v52, 0  ;;  %v6464_v52 = vld [vmem:[%s6931_s20 + $0x44] ss:$8 sps:$4 sm:$0xff]  }
 0x705   : > { %v1532_v46 = vpack.c.bf16 %v1531_v44, %v1531_v44  ;;  %v6458_v44 = vld [vmem:[%s6931_s20 + $0x24] ss:$8 sps:$4 sm:$0xff]  }
 0x707   : > { %v1750_v27 = vpop.xlane.xlu0 %1749  ;;  %6039 = vmatmul.mubr.msk.bf16.vlgmr.msra.gmra.mrb[16].mxu0 %vm978_vm2, %v1532_v46  ;;  %v6456_v46 = vld [vmem:[%s6931_s20 + $0x20] ss:$8 sps:$4 sm:$0xff]  }
 0x708   : > { %6696 = vrcp.f32 %v1750_v27  ;;  %6050 = vmatprep.mubr.msk.bf16.mxu0 %vm6842_vm1, %v6841_v1 }
 0x70a   : > { %v6695_v47 = vpop.eup %6694 }
 0x70b   : > { %v1642_v48 = vmul.f32 %v6695_v47, %v6687_v30  ;;  %v1645_v50 = vpop.permute.xlu0 %1644 }
 0x70c   : > { %v1650_v51 = vsel %vm982_vm0, %v1645_v50, 0  ;;  %v6461_v50 = vld [vmem:[%s6931_s20 + $0x34] ss:$8 sps:$4 sm:$0xff]  }
 0x70d   : > { %6049 = vmatpush3.bf16.msra.mxu0 %v1650_v51  ;;  %v1643_v53 = vpack.c.bf16 %v1642_v48, %v1642_v48  ;;  %v6459_v51 = vld [vmem:[%s6931_s20 + $0x30] ss:$8 sps:$4 sm:$0xff]  }
 0x70e   : > { %6060 = vmatprep.subr.bf16.mxu0 %v6841_v1 }
 0x710   : > { %6051 = vmatmul.mubr.msk.bf16.vlgmr.msra.gmra.mrb[20].mxu0 %vm978_vm2, %v1643_v53  ;;  %v6462_v53 = vld [vmem:[%s6931_s20 + $0x40] ss:$8 sps:$4 sm:$0xff]  }
 0x711   : > { %6061 = vmatpush3.bf16.msra.mxu0 %v1760_v54  ;;  %6062 = vmatprep.mubr.msk.bf16.mxu0 %vm6842_vm1, %v6841_v1  ;;  %v6467_v54 = vld [vmem:[%s6931_s20 + $0x54] ss:$8 sps:$4 sm:$0xff]  }
 0x712   : > { %v6697_v55 = vpop.eup %6696  ;;  %2068 = vmatprep.subr.bf16.mxu0 %v6452_v40 }
 0x713   : > { %v1752_v56 = vmul.f32 %v6697_v55, %v6689_v32  ;;  %v5350_v32 = vld [vmem:[%s6916_s30] ss:$0 sm:$0xff]  ;;  %v6465_v55 = vld [vmem:[%s6931_s20 + $0x50] ss:$8 sps:$4 sm:$0xff]  }
 0x715   : > { %v1753_v57 = vpack.c.bf16 %v1752_v56, %v1752_v56  ;;  %v6470_v56 = vld [vmem:[%s6931_s20 + $0x64] ss:$8 sps:$4 sm:$0xff]  }
 0x718   : > { %6063 = vmatmul.mubr.msk.bf16.vlgmr.msra.gmra.mrb[24].mxu0 %vm978_vm2, %v1753_v57  ;;  %v6468_v57 = vld [vmem:[%s6931_s20 + $0x60] ss:$8 sps:$4 sm:$0xff]  }
 0x719   : > { %2100 = vmatprep.mubr.bf16.mxu0 %v6843_v49  ;;  %2069 = vmatpush1.bf16.msra.mxu0 %v6450_v39 }
 0x71a   : > { %2070 = vmatprep.subr.bf16.mxu0 %v6455_v41 }
 0x71d   : > { %2071 = vmatpush1.bf16.msra.mxu0 %v6453_v43 }
 0x71e   : > { %2072 = vmatprep.subr.bf16.mxu0 %v6458_v44 }
 0x721   : > { %2073 = vmatpush1.bf16.msra.mxu0 %v6456_v46  ;;  %v5377_v46 = vld [vmem:[%s7831_s9] ss:$0 sm:$0xff] }
 0x722   : > { %2074 = vmatprep.subr.bf16.mxu0 %v6461_v50 }
 0x725   : > { %2075 = vmatpush1.bf16.msra.mxu0 %v6459_v51 }
 0x726   : > { %2076 = vmatprep.subr.bf16.mxu0 %v6464_v52  ;;  %v6490_v52 = vld [vmem:[%s6901_s14 + $0xc0] ss:$12 sps:$4 sm:$0xff]  }
 0x729   : > { %2077 = vmatpush1.bf16.msra.mxu0 %v6462_v53  ;;  %v6492_v53 = vld [vmem:[%s6901_s14 + $0xc4] ss:$12 sps:$4 sm:$0xff]  }
 0x72a   : > { %2078 = vmatprep.subr.bf16.mxu0 %v6467_v54  ;;  %v6493_v54 = vld [vmem:[%s6901_s14 + $0xc8] ss:$12 sps:$4 sm:$0xff]  }
 0x72d   : > { %2079 = vmatpush1.bf16.msra.mxu0 %v6465_v55  ;;  %v6496_v55 = vld [vmem:[%s6901_s14 + $0xdc] ss:$12 sps:$4 sm:$0xff]  }
 0x72e   : > { %2080 = vmatprep.subr.bf16.mxu0 %v6470_v56  ;;  %v6497_v56 = vld [vmem:[%s6901_s14 + $0xe0] ss:$12 sps:$4 sm:$0xff]  }
 0x731   : > { %2081 = vmatpush1.bf16.msra.mxu0 %v6468_v57  ;;  %v6494_v57 = vld [vmem:[%s6901_s14 + $0xd8] ss:$12 sps:$4 sm:$0xff]  }
 0x767   : > { %v1463_v58 = vpop.f32.mrb[12].mxu0 }
 0x768   : > { %v6028_v59 = vpop.f32.mrb[13].mxu0 }
 0x769   : > { %v1466_v60 = vpop.f32.mrb[14].mxu0  ;;  %v6471_v59 = vld [vmem:[%s6931_s20 + $0x70] ss:$8 sps:$4 sm:$0xff]  }
 0x76a   : > { %v6029_v61 = vpop.f32.mrb[15].mxu0  ;;  %v6474_v60 = vld [vmem:[%s7827_s10 + $0x40] sm:$0xff]  }
 0x76b   : > { %v6475_v61 = vld [vmem:[%s7827_s10] sm:$0xff]   ;;  %5826 = vmatprep.subr.bf16.mxu1 %v6474_v60 }
 0x7da   : > { %v1576_v9 = vpop.f32.mrb[16].mxu0 }
 0x7db   : > { %1803 = vrot.lane.b32.xlu1 %v1576_v9, %s7783_s7  ;;  %v6040_v10 = vpop.f32.mrb[17].mxu0  ;;  %s7828_s7 = sld [smem:[#allocation11_spill]]  ;;  %v6483_v9 = vld [vmem:[%s7827_s10 + $0x20] sm:$0xff]  }
 0x7dc   : > { %v1579_v11 = vpop.f32.mrb[18].mxu0  ;;  %v6484_v10 = vld [vmem:[%s7827_s10 + $0x68] sm:$0xff]  }
 0x7dd   : > { %v6041_v12 = vpop.f32.mrb[19].mxu0  ;;  %v6485_v11 = vld [vmem:[%s7827_s10 + $0x28] sm:$0xff]  }
 0x7e3   : > { %v1686_v14 = vpop.f32.mrb[20].mxu0 }
 0x7e4   : > { %1807 = vrot.lane.b32.xlu1 %v1686_v14, %s7785_s1  ;;  %v6052_v15 = vpop.f32.mrb[21].mxu0  ;;  %s7829_s1 = sld [smem:[#allocation12_spill]] }
 0x7e5   : > { %v1689_v16 = vpop.f32.mrb[22].mxu0 }
 0x7e6   : > { %v6053_v17 = vpop.f32.mrb[23].mxu0  ;;  %v5359_v16 = vld [vmem:[%s7828_s7] ss:$0 sm:$0xff] }
 0x7eb   : > { %v1796_v18 = vpop.f32.mrb[24].mxu0 }
 0x7ec   : > { %1811 = vrot.lane.b32.xlu0 %v1796_v18, %s7826_s18  ;;  %v6064_v19 = vpop.f32.mrb[25].mxu0  ;;  %v5360_v18 = vld [vmem:[%s7829_s1] ss:$0 sm:$0xff] }
 0x7ed   : > { %v1799_v20 = vpop.f32.mrb[26].mxu0 }
 0x7ee   : > { %v6065_v21 = vpop.f32.mrb[27].mxu0 }
 0x84d   : > { %v1804_v22 = vpop.permute.xlu1 %1803 }
 0x84e   : > { %v1814_v26 = vsel %vm1364_vm3, %v1463_v58, %v1804_v22  ;;  %v6473_v58 = vld [vmem:[%s6931_s20 + $0x74] ss:$8 sps:$4 sm:$0xff]  }
 0x84f   : > { %2082 = vmatprep.subr.bf16.mxu0 %v6473_v58  ;;  %v6486_v22 = vld [vmem:[%s7827_s10 + $0x70] sm:$0xff]  }
 0x850   : > { %2083 = vmatpush1.bf16.msra.mxu0 %v6471_v59  ;;  %v6500_v58 = vld [vmem:[%s6901_s14 + $0xf4] ss:$12 sps:$4 sm:$0xff]  }
 0x851   : > { %2498 = vmatprep.subr.bf16.mxu0 %v6492_v53 }
 0x856   : > { %v1808_v23 = vpop.permute.xlu1 %1807 }
 0x857   : > { %v1816_v28 = vsel %vm1815_vm8, %v1814_v26, %v1808_v23  ;;  %v6487_v23 = vld [vmem:[%s7827_s10 + $0x30] sm:$0xff]   ;;  %v6488_v26 = vld [vmem:[%s7827_s10 + $0x78] sm:$0xff]  }
 0x85e   : > { %v1812_v29 = vpop.permute.xlu0 %1811 }
 0x85f   : > { %v1818_v30 = vsel %vm1817_vm9, %v1816_v28, %v1812_v29  ;;  %v6489_v28 = vld [vmem:[%s7827_s10 + $0x38] sm:$0xff]   ;;  %v1976_v29 = vld [vmem:[%s7830_s5] sm:$0x3] }
 0x860   : > { %v1819_v31 = vpack.c.bf16 %v1818_v30, %v1818_v30  ;;  %v1981_v30 = vrot.slane %v1976_v29, %v7128_v4 }
 0x862   : > { %6083 = vmatmul.mubr.bf16.vlgmr.msra.gmra.mrb[16].mxu1 %v1819_v31  ;;  %v1985_v31 = vrot.slane %v1976_v29, %v7131_v6 }
 0x863   : > { %5827 = vmatpush3.bf16.msra.mxu1 %v6475_v61 }
 0x864   : > { %5828 = vmatprep.subr.bf16.mxu1 %v6476_v62 }
 0x867   : > { %5829 = vmatpush3.bf16.msra.mxu1 %v6477_v63  ;;  %v6501_v63 = vld [vmem:[%s6901_s14 + $0xf8] ss:$12 sps:$4 sm:$0xff]  }
 0x868   : > { %5830 = vmatprep.subr.bf16.mxu1 %v6478_v0  ;;  %v6504_v0 = vld [vmem:[%s6901_s14 + $0x10c] ss:$12 sps:$4 sm:$0xff]  }
 0x86b   : > { %5831 = vmatpush3.bf16.msra.mxu1 %v6479_v2  ;;  %v6502_v2 = vld [vmem:[%s6901_s14 + $0x108] ss:$12 sps:$4 sm:$0xff]  }
 0x86c   : > { %5832 = vmatprep.subr.bf16.mxu1 %v6480_v3  ;;  %v6505_v3 = vld [vmem:[%s6901_s14 + $0x110] ss:$12 sps:$4 sm:$0xff]  }
 0x86f   : > { %5833 = vmatpush3.bf16.msra.mxu1 %v6481_v5  ;;  %v6508_v5 = vld [vmem:[%s6901_s14 + $0x124] ss:$12 sps:$4 sm:$0xff]  }
 0x870   : > { %5834 = vmatprep.subr.bf16.mxu1 %v6482_v7  ;;  %v6506_v7 = vld [vmem:[%s6901_s14 + $0x120] ss:$12 sps:$4 sm:$0xff]  }
 0x873   : > { %5835 = vmatpush3.bf16.msra.mxu1 %v6483_v9  ;;  %v6509_v9 = vld [vmem:[%s6901_s14 + $0x128] ss:$12 sps:$4 sm:$0xff]  }
 0x874   : > { %5836 = vmatprep.subr.bf16.mxu1 %v6484_v10  ;;  %v6512_v10 = vld [vmem:[%s6901_s14 + $0x13c] ss:$12 sps:$4 sm:$0xff]  }
 0x877   : > { %5837 = vmatpush3.bf16.msra.mxu1 %v6485_v11  ;;  %v6510_v11 = vld [vmem:[%s6901_s14 + $0x138] ss:$12 sps:$4 sm:$0xff]  }
 0x878   : > { %5838 = vmatprep.subr.bf16.mxu1 %v6486_v22 }
 0x87b   : > { %5839 = vmatpush3.bf16.msra.mxu1 %v6487_v23  ;;  %v5396_v23 = vld [vmem:[%s7819_s3 + $0x1] ss:$0 sm:$0xff] }
 0x87c   : > { %5840 = vmatprep.subr.bf16.mxu1 %v6488_v26 }
 0x87f   : > { %5841 = vmatpush3.bf16.msra.mxu1 %v6489_v28  ;;  %v5397_v28 = vld [vmem:[%s7817_s8 + $0x1] ss:$0 sm:$0xff] }
 0x880   : > { %6086 = vmatprep.subr.bf16.mxu1 %v6841_v1 }
 0x935   : > { %v1925_v33 = vpop.f32.mrb[16].mxu1 }
 0x936   : > { %v1926_v34 = vadd.f32 %v5350_v32, %v1925_v33  ;;  %v6084_v35 = vpop.f32.mrb[17].mxu1 }
 0x937   : > { %v1928_v36 = vpop.f32.mrb[18].mxu1 }
 0x938   : > { %v7236_v37 = vadd.f32 %v1926_v34, %v7083_v25  ;;  %v6085_v38 = vpop.f32.mrb[19].mxu1 }
 0x93a   : > { %1934 = vadd.xlane.f32.xlu1 %v7236_v37 }
 0x9c7   : > { %v1935_v25 = vpop.xlane.xlu1 %1934 }
 0x9c8   : > { %v1936_v27 = vmul.f32 0.0078125, %v1935_v25 }
 0x9ca   : > { %v1937_v47 = vsub.f32 %v7236_v37, %v1936_v27 }
 0x9cc   : > { %v1938_v48 = vmul.f32 %v1937_v47, %v1937_v47 }
 0x9ce   : > { %1939 = vadd.xlane.f32.xlu0 %v1938_v48 }
 0xa5b   : > { %v1940_v12 = vpop.xlane.xlu0 %1939 }
 0xa5c   : > { %v1941_v13 = vmul.f32 0.0078125, %v1940_v12  ;;  %v6513_v12 = vld [vmem:[%s6901_s14 + $0x140] ss:$12 sps:$4 sm:$0xff]  }
 0xa5e   : > { %v1942_v14 = vadd.f32 1e-05, %v1941_v13  ;;  %v6516_v13 = vld [vmem:[%s6901_s14 + $0x154] ss:$12 sps:$4 sm:$0xff]  }
 0xa60   : > { %6698 = vrsqrt.f32 %v1942_v14  ;;  %v6514_v14 = vld [vmem:[%s6901_s14 + $0x150] ss:$12 sps:$4 sm:$0xff]  }
 0xa6a   : > { %v6699_v15 = vpop.eup %6698 }
 0xa6b   : > { %v1944_v17 = vmul.f32 %v6699_v15, %v1937_v47  ;;  %v6517_v15 = vld [vmem:[%s6901_s14 + $0x158] ss:$12 sps:$4 sm:$0xff]  }
 0xa6d   : > { %v1951_v19 = vmul.f32 %v5359_v16, %v1944_v17  ;;  %v6520_v16 = vld [vmem:[%s6901_s14 + $0x16c] ss:$12 sps:$4 sm:$0xff]   ;;  %v6518_v17 = vld [vmem:[%s6901_s14 + $0x168] ss:$12 sps:$4 sm:$0xff]  }
 0xa6f   : > { %v1958_v20 = vadd.f32 %v5360_v18, %v1951_v19  ;;  %v6521_v18 = vld [vmem:[%s6901_s14 + $0x170] ss:$12 sps:$4 sm:$0xff]  }
 0xa71   : > { %v1959_v21 = vpack.c.bf16 %v1958_v20, %v1958_v20 }
 0xa73   : > { %2101 = vmatmul.mubr.bf16.vlgmr.msra.gmra.mrb[28].mxu0 %v1959_v21 }
 0xa74   : > { %2530 = vmatprep.mubr.bf16.mxu0 %v6843_v49  ;;  %2499 = vmatpush1.bf16.msra.mxu0 %v6490_v52 }
 0xa75   : > { %2500 = vmatprep.subr.bf16.mxu0 %v6496_v55 }
 0xa78   : > { %2501 = vmatpush1.bf16.msra.mxu0 %v6494_v57 }
 0xa79   : > { %2502 = vmatprep.subr.bf16.mxu0 %v6500_v58 }
 0xb46   : > { %v2102_v32 = vpop.f32.mrb[28].mxu0 }
 0xb47   : > { %v2103_v33 = vadd.f32 %v2102_v32, %v1981_v30  ;;  %v2104_v34 = vpop.f32.mrb[29].mxu0  ;;  %v5430_v32 = vld [vmem:[%s6906_s19 + $0x3] sm:$0x7] }
 0xb48   : > { %v2105_v35 = vadd.f32 %v2104_v34, %v1985_v31  ;;  %v2106_v36 = vpop.f32.mrb[30].mxu0 }
 0xb49   : > { %v2109_v38 = vmax.f32 %v2103_v33, 0.0  ;;  %v2107_v39 = vpop.f32.mrb[31].mxu0  ;;  %v2362_v33 = vrot.slane %v5430_v32, %v7131_v6 }
 0xb4a   : > { %v2110_v40 = vmax.f32 %v2105_v35, 0.0  ;;  %v2366_v39 = vrot.slane %v5430_v32, %v7134_v8 }
 0xb4b   : > { %v2111_v43 = vpack.c.bf16 %v2109_v38, %v2109_v38 }
 0xb4c   : > { %v2112_v41 = vpack.c.bf16 %v2110_v40, %v2110_v40 }
 0xb4e   : > { %2280 = vmatprep.mubr.bf16.mxu1 %v2112_v41 }
 0xb4f   : > { %2281 = vmatmul.mubr.bf16.vlgmr.msra.gmra.mrb[20].mxu1 %v2111_v43 }
 0xb50   : > { %6102 = vmatprep.mubr.msk.bf16.mxu1 %vm6842_vm1, %v6841_v1  ;;  %6087 = vmatpush3.bf16.msra.mxu1 %v6493_v54 }
 0xb51   : > { %6088 = vmatprep.subr.bf16.mxu1 %v6841_v1 }
 0xb54   : > { %6089 = vmatpush3.bf16.msra.mxu1 %v6497_v56 }
 0xb55   : > { %6090 = vmatprep.subr.bf16.mxu1 %v6841_v1 }
 0xb58   : > { %6091 = vmatpush3.bf16.msra.mxu1 %v6501_v63 }
 0xb59   : > { %6092 = vmatprep.subr.bf16.mxu1 %v6841_v1 }
 0xb5c   : > { %6093 = vmatpush3.bf16.msra.mxu1 %v6505_v3 }
 0xb5d   : > { %6094 = vmatprep.subr.bf16.mxu1 %v6841_v1 }
 0xb60   : > { %6095 = vmatpush3.bf16.msra.mxu1 %v6509_v9 }
 0xb61   : > { %6096 = vmatprep.subr.bf16.mxu1 %v6841_v1 }
 0xb64   : > { %6097 = vmatpush3.bf16.msra.mxu1 %v6513_v12 }
 0xb65   : > { %6098 = vmatprep.subr.bf16.mxu1 %v6841_v1 }
 0xb68   : > { %6099 = vmatpush3.bf16.msra.mxu1 %v6517_v15 }
 0xb69   : > { %6100 = vmatprep.subr.bf16.mxu1 %v6841_v1 }
 0xb6c   : > { %6101 = vmatpush3.bf16.msra.mxu1 %v6521_v18 }
 0xb6d   : > { %6130 = vmatprep.subr.bf16.mxu1 %v6841_v1 }
 0xc22   : > { %v5842_v44 = vpop.f32.mrb[20].mxu1 }
 0xc23   : > { %v5843_v25 = vpop.f32.mrb[21].mxu1 }
 0xc24   : > { %v5844_v27 = vadd.f32 %v5843_v25, %v5842_v44  ;;  %v5845_v47 = vpop.f32.mrb[22].mxu1  ;;  %v2358_v25 = vrot.slane %v5430_v32, %v7128_v4 }
 0xc25   : > { %v5846_v48 = vpop.f32.mrb[23].mxu1 }
 0xc26   : > { %v2283_v50 = vadd.f32 %v5844_v27, %v5377_v46 }
 0xc28   : > { %v7283_v51 = vadd.f32 %v2283_v50, %v7236_v37  ;;  %v6498_v37 = vld [vmem:[%s6901_s14 + $0xf0] ss:$12 sps:$4 sm:$0xff]  }
 0xc29   : > { %2503 = vmatpush1.bf16.msra.mxu0 %v6498_v37 }
 0xc2a   : > { %2293 = vadd.xlane.f32.xlu0 %v7283_v51  ;;  %2504 = vmatprep.subr.bf16.mxu0 %v6504_v0 }
 0xc2d   : > { %2505 = vmatpush1.bf16.msra.mxu0 %v6502_v2 }
 0xc2e   : > { %2506 = vmatprep.subr.bf16.mxu0 %v6508_v5 }
 0xc31   : > { %2507 = vmatpush1.bf16.msra.mxu0 %v6506_v7 }
 0xc32   : > { %2508 = vmatprep.subr.bf16.mxu0 %v6512_v10 }
 0xc35   : > { %2509 = vmatpush1.bf16.msra.mxu0 %v6510_v11 }
 0xc36   : > { %2510 = vmatprep.subr.bf16.mxu0 %v6516_v13 }
 0xc39   : > { %2511 = vmatpush1.bf16.msra.mxu0 %v6514_v14 }
 0xc3a   : > { %2512 = vmatprep.subr.bf16.mxu0 %v6520_v16 }
 0xc3d   : > { %2513 = vmatpush1.bf16.msra.mxu0 %v6518_v17 }
 0xc3e   : > { %6106 = vmatprep.subr.bf16.mxu0 %v6841_v1 }
 0xcb7   : > { %v2294_v59 = vpop.xlane.xlu0 %2293 }
 0xcb8   : > { %v2295_v60 = vmul.f32 0.0078125, %v2294_v59 }
 0xcba   : > { %v2296_v61 = vsub.f32 %v7283_v51, %v2295_v60 }
 0xcbc   : > { %v2297_v62 = vmul.f32 %v2296_v61, %v2296_v61 }
 0xcbe   : > { %2298 = vadd.xlane.f32.xlu0 %v2297_v62 }
 0xd4b   : > { %v2299_v19 = vpop.xlane.xlu0 %2298 }
 0xd4c   : > { %v2300_v20 = vmul.f32 0.0078125, %v2299_v19 }
 0xd4e   : > { %v2301_v21 = vadd.f32 1e-05, %v2300_v20 }
 0xd50   : > { %6700 = vrsqrt.f32 %v2301_v21 }
 0xd5a   : > { %v6701_v22 = vpop.eup %6700 }
 0xd5b   : > { %v2303_v26 = vmul.f32 %v6701_v22, %v2296_v61 }
 0xd5d   : > { %v2310_v29 = vmul.f32 %v5396_v23, %v2303_v26 }
 0xd5f   : > { %v2317_v30 = vadd.f32 %v5397_v28, %v2310_v29 }
 0xd61   : > { %v2318_v31 = vpack.c.bf16 %v2317_v30, %v2317_v30 }
 0xd63   : > { %2531 = vmatmul.mubr.bf16.vlgmr.msra.gmra.mrb[32].mxu0 %v2318_v31  ;;  %6103 = vmatmul.mubr.bf16.vlgmr.msra.gmra.mrb[24].mxu1 %v2318_v31 }
 0xd64   : > { %6108 = vmatprep.mubr.msk.bf16.mxu0 %vm6842_vm1, %v6841_v1  ;;  %6132 = vmatprep.mubr.msk.bf16.mxu1 %vm6842_vm1, %v6841_v1 }
 0xe36   : > { %v2532_v34 = vpop.f32.mrb[32].mxu0  ;;  %v2573_v35 = vpop.f32.mrb[24].mxu1 }
 0xe37   : > { %v2534_v36 = vpop.f32.mrb[33].mxu0  ;;  %v6104_v38 = vpop.f32.mrb[25].mxu1  ;;  %v2574_v47 = vadd.f32 %v2573_v35, %v2366_v39  ;;  %v2533_v50 = vadd.f32 %v2532_v34, %v2358_v25 }
 0xe38   : > { %v2535_v40 = vadd.f32 %v2534_v36, %v2362_v33  ;;  %v2536_v41 = vpop.f32.mrb[34].mxu0  ;;  %v2576_v43 = vpop.f32.mrb[26].mxu1 }
 0xe39   : > { %v2537_v44 = vpop.f32.mrb[35].mxu0  ;;  %v6105_v46 = vpop.f32.mrb[27].mxu1  ;;  %v7332_v52 = vpack.c.bf16 %v2574_v47, %v2574_v47  ;;  %v2579_v53 = vpack.c.bf16 %v2533_v50, %v2533_v50 }
 0xe3a   : > { %v2580_v27 = vpack.c.bf16 %v2535_v40, %v2535_v40 }
 0xe3b   : > { %v2644_v54 = vsel %vm982_vm0, %v7332_v52, 0 }
 0xe3c   : > { %v2586_v48 = vsel %vm1364_vm3, %v2580_v27, 0 }
 0xe3d   : > { %6107 = vmatpush3.bf16.xpose.msra.mxu0 %v2586_v48 }
 0xe3e   : > { %6112 = vmatprep.subr.bf16.mxu0 %v6841_v1 }
 0xe44   : > { %6109 = vmatmul.mubr.msk.bf16.vlgmr.msra.gmra.mrb[36].mxu0 %vm1364_vm3, %v2579_v53 }
 0xe45   : > { %6113 = vmatpush3.bf16.msra.mxu0 %v2644_v54  ;;  %6114 = vmatprep.mubr.msk.bf16.mxu0 %vm6842_vm1, %v6841_v1 }
 0xe46   : > { %6118 = vmatprep.subr.bf16.mxu0 %v6841_v1 }
 0xf17   : > { %v2622_v55 = vpop.f32.mrb[36].mxu0 }
 0xf18   : > { %v2623_v56 = vadd.f32 %v2622_v55, %v7177_v45  ;;  %v6110_v57 = vpop.f32.mrb[37].mxu0 }
 0xf19   : > { %v2625_v58 = vpop.f32.mrb[38].mxu0 }
 0xf1a   : > { %v6111_v37 = vpop.f32.mrb[39].mxu0  ;;  %v2628_v59 = vsel %vm978_vm2, %v2623_v56, -inf }
 0xf1b   : > { %2629 = vmax.xlane.f32.xlu1 %v2628_v59 }
 0xf2c   : > { %2690 = vrot.lane.b32.xlu1 %v2580_v27, %s7826_s18 }
 0xf30   : > { %2801 = vrot.lane.b32.xlu1 %v2580_v27, %s7832_s13 }
 0xf34   : > { %2799 = vrot.lane.b32.xlu1 %v2579_v53, %s7832_s13 }
 0xf38   : > { %2911 = vrot.lane.b32.xlu1 %v2580_v27, %s7833_s17 }
 0xfa8   : > { %v2630_v60 = vpop.xlane.xlu1 %2629 }
 0xfa9   : > { %v2631_v61 = vsub.f32 %v2623_v56, %v2630_v60 }
 0xfab   : > { %v2632_v62 = vmul.f32 1.442695, %v2631_v61 }
 0xfac   : > { %v2691_v63 = vpop.permute.xlu1 %2690 }
 0xfad   : > { %6702 = vpow2.f32 %v2632_v62  ;;  %v2696_v17 = vsel %vm1364_vm3, %v2691_v63, 0 }
 0xfb0   : > { %v2802_v0 = vpop.permute.xlu1 %2801 }
 0xfb1   : > { %v2807_v2 = vsel %vm1364_vm3, %v2802_v0, 0 }
 0xfb2   : > { %6131 = vmatpush3.bf16.xpose.msra.mxu1 %v2807_v2 }
 0xfb3   : > { %6142 = vmatprep.subr.bf16.mxu1 %v6841_v1 }
 0xfb4   : > { %v2800_v3 = vpop.permute.xlu1 %2799 }
 0xfb7   : > { %v6703_v5 = vpop.eup %6702 }
 0xfb8   : > { %v2912_v7 = vpop.permute.xlu1 %2911  ;;  %v2634_v9 = vsel %vm978_vm2, %v6703_v5, 0.0 }
 0xfb9   : > { %v2917_v10 = vsel %vm1364_vm3, %v2912_v7, 0  ;;  %2635 = vadd.xlane.f32.xlu0 %v2634_v9  ;;  %6133 = vmatmul.mubr.msk.bf16.vlgmr.msra.gmra.mrb[28].mxu1 %vm1364_vm3, %v2800_v3 }
 0xfba   : > { %6143 = vmatpush3.bf16.xpose.msra.mxu1 %v2917_v10  ;;  %6144 = vmatprep.mubr.msk.bf16.mxu1 %vm6842_vm1, %v6841_v1 }
 0xfbb   : > { %6154 = vmatprep.subr.bf16.mxu1 %v6841_v1 }
 0xfcf   : > { %2687 = vrot.lane.b32.xlu0 %v2579_v53, %s7826_s18 }
 0xfd3   : > { %2909 = vrot.lane.b32.xlu0 %v2579_v53, %s7833_s17 }
0x1046   : > { %v2636_v11 = vpop.xlane.xlu0 %2635 }
0x1047   : > { %6704 = vrcp.f32 %v2636_v11 }
0x104a   : > { %v2688_v12 = vpop.permute.xlu0 %2687 }
0x104e   : > { %v2910_v13 = vpop.permute.xlu0 %2909 }
0x104f   : > { %6145 = vmatmul.mubr.msk.bf16.vlgmr.msra.gmra.mrb[32].mxu1 %vm1364_vm3, %v2910_v13 }
0x1050   : > { %6170 = vmatprep.mubr.msk.bf16.mxu1 %vm6842_vm1, %v6841_v1 }
0x1051   : > { %v6705_v14 = vpop.eup %6704 }
0x1052   : > { %v2638_v15 = vmul.f32 %v6705_v14, %v6703_v5 }
0x1054   : > { %v2639_v16 = vpack.c.bf16 %v2638_v15, %v2638_v15 }
0x1056   : > { %6115 = vmatmul.mubr.msk.bf16.vlgmr.msra.gmra.mrb[40].mxu0 %vm978_vm2, %v2639_v16 }
0x1057   : > { %6119 = vmatpush3.bf16.xpose.msra.mxu0 %v2696_v17  ;;  %6120 = vmatprep.mubr.msk.bf16.mxu0 %vm6842_vm1, %v6841_v1 }
0x1058   : > { %6124 = vmatprep.subr.bf16.mxu0 %v6841_v1 }
0x105e   : > { %6121 = vmatmul.mubr.msk.bf16.vlgmr.msra.gmra.mrb[44].mxu0 %vm1364_vm3, %v2688_v12 }
0x105f   : > { %6126 = vmatprep.mubr.msk.bf16.mxu0 %vm6842_vm1, %v6841_v1 }
0x108c   : > { %v2843_v18 = vpop.f32.mrb[28].mxu1 }
0x108d   : > { %v2844_v19 = vadd.f32 %v2843_v18, %v7177_v45  ;;  %v6134_v20 = vpop.f32.mrb[29].mxu1  ;;  %v6522_v18 = vld [vmem:[%s6911_s24 + $0x40] sm:$0xff]  }
0x108e   : > { %v2846_v21 = vpop.f32.mrb[30].mxu1  ;;  %6155 = vmatpush3.bf16.msra.mxu1 %v6522_v18  ;;  %v6524_v20 = vld [vmem:[%s6911_s24 + $0x50] sm:$0xff]   ;;  %v6556_v18 = vld [vmem:[%s7827_s10 + $0xc8] sm:$0xff]  }
0x108f   : > { %v6135_v22 = vpop.f32.mrb[31].mxu1  ;;  %v2849_v23 = vsel %vm978_vm2, %v2844_v19, -inf  ;;  %6156 = vmatprep.subr.bf16.mxu1 %v6841_v1  ;;  %v6525_v21 = vld [vmem:[%s6911_s24 + $0x58] sm:$0xff]  }
0x1090   : > { %2850 = vmax.xlane.f32.xlu0 %v2849_v23  ;;  %v6526_v22 = vld [vmem:[%s6911_s24 + $0x60] sm:$0xff]   ;;  %v6527_v23 = vld [vmem:[%s6911_s24 + $0x68] sm:$0xff]  }
0x111d   : > { %v2851_v26 = vpop.xlane.xlu0 %2850 }
0x111e   : > { %v2852_v29 = vsub.f32 %v2844_v19, %v2851_v26  ;;  %v6523_v19 = vld [vmem:[%s6911_s24 + $0x48] sm:$0xff]   ;;  %v6528_v26 = vld [vmem:[%s6911_s24 + $0x70] sm:$0xff]  }
0x111f   : > { %6157 = vmatpush3.bf16.msra.mxu1 %v6523_v19  ;;  %v6557_v19 = vld [vmem:[%s7827_s10 + $0x88] sm:$0xff]  }
0x1120   : > { %v2853_v35 = vmul.f32 1.442695, %v2852_v29  ;;  %6158 = vmatprep.subr.bf16.mxu1 %v6841_v1 }
0x1122   : > { %v2953_v28 = vpop.f32.mrb[32].mxu1  ;;  %6706 = vpow2.f32 %v2853_v35 }
0x1123   : > { %v2954_v30 = vadd.f32 %v2953_v28, %v7177_v45  ;;  %v6146_v31 = vpop.f32.mrb[33].mxu1  ;;  %6159 = vmatpush3.bf16.msra.mxu1 %v6524_v20  ;;  %v6558_v20 = vld [vmem:[%s7827_s10 + $0xd0] sm:$0xff]  }
0x1124   : > { %v2956_v32 = vpop.f32.mrb[34].mxu1  ;;  %6160 = vmatprep.subr.bf16.mxu1 %v6841_v1 }
0x1125   : > { %v6147_v33 = vpop.f32.mrb[35].mxu1  ;;  %v2959_v34 = vsel %vm978_vm2, %v2954_v30, -inf  ;;  %v6529_v32 = vld [vmem:[%s6911_s24 + $0x78] sm:$0xff]  }
0x1126   : > { %2960 = vmax.xlane.f32.xlu0 %v2959_v34 }
0x1127   : > { %6161 = vmatpush3.bf16.msra.mxu1 %v6525_v21  ;;  %v6559_v21 = vld [vmem:[%s7827_s10 + $0x90] sm:$0xff]  }
0x1128   : > { %6162 = vmatprep.subr.bf16.mxu1 %v6841_v1 }
0x1129   : > { %v7371_v36 = vpop.f32.mrb[40].mxu0 }
0x112a   : > { %v6116_v38 = vpop.f32.mrb[41].mxu0 }
0x112b   : > { %v2683_v39 = vpop.f32.mrb[42].mxu0  ;;  %6163 = vmatpush3.bf16.msra.mxu1 %v6526_v22  ;;  %v6560_v22 = vld [vmem:[%s7827_s10 + $0xd8] sm:$0xff]  }
0x112c   : > { %v6117_v40 = vpop.f32.mrb[43].mxu0  ;;  %v6707_v47 = vpop.eup %6706  ;;  %6164 = vmatprep.subr.bf16.mxu1 %v6841_v1 }
0x112d   : > { %v2855_v48 = vsel %vm978_vm2, %v6707_v47, 0.0 }
0x112f   : > { %6165 = vmatpush3.bf16.msra.mxu1 %v6527_v23  ;;  %v6561_v23 = vld [vmem:[%s7827_s10 + $0x98] sm:$0xff]  }
0x1130   : > { %6166 = vmatprep.subr.bf16.mxu1 %v6841_v1 }
0x1131   : > { %v2732_v41 = vpop.f32.mrb[44].mxu0 }
0x1132   : > { %v2733_v43 = vadd.f32 %v2732_v41, %v7177_v45  ;;  %v6122_v44 = vpop.f32.mrb[45].mxu0 }
0x1133   : > { %v2735_v46 = vpop.f32.mrb[46].mxu0  ;;  %6167 = vmatpush3.bf16.msra.mxu1 %v6528_v26  ;;  %v6562_v26 = vld [vmem:[%s7827_s10 + $0xe0] sm:$0xff]  }
0x1134   : > { %v6123_v25 = vpop.f32.mrb[47].mxu0  ;;  %v2738_v27 = vsel %vm978_vm2, %v2733_v43, -inf  ;;  %6168 = vmatprep.subr.bf16.mxu1 %v6841_v1 }
0x1135   : > { %2739 = vmax.xlane.f32.xlu1 %v2738_v27 }
0x1137   : > { %6169 = vmatpush3.bf16.msra.mxu1 %v6529_v32 }
0x1139   : > { %2856 = vadd.xlane.f32.xlu1 %v2855_v48 }
0x114a   : > { %2751 = vrot.lane.b32.xlu1 %v7332_v52, %s7826_s18 }
0x114e   : > { %2971 = vrot.lane.b32.xlu1 %v7332_v52, %s7833_s17 }
0x11b3   : > { %v2961_v50 = vpop.xlane.xlu0 %2960 }
0x11b4   : > { %v2962_v53 = vsub.f32 %v2954_v30, %v2961_v50 }
0x11b6   : > { %v2963_v56 = vmul.f32 1.442695, %v2962_v53  ;;  %v5480_v53 = vld [vmem:[%s6916_s30 + $0x1] ss:$0 sm:$0xff] }
0x11c2   : > { %v2740_v54 = vpop.xlane.xlu1 %2739 }
0x11c3   : > { %v2741_v55 = vsub.f32 %v2733_v43, %v2740_v54 }
0x11c5   : > { %v2742_v57 = vmul.f32 1.442695, %v2741_v55 }
0x11c6   : > { %v2857_v58 = vpop.xlane.xlu1 %2856 }
0x11c7   : > { %6708 = vpow2.f32 %v2742_v57 }
0x11c8   : > { %6710 = vpow2.f32 %v2963_v56 }
0x11ca   : > { %v2752_v37 = vpop.permute.xlu1 %2751 }
0x11cb   : > { %v2757_v59 = vsel %vm982_vm0, %v2752_v37, 0  ;;  %v6530_v37 = vld [vmem:[%s6931_s20 + $0x80] ss:$8 sps:$4 sm:$0xff]  }
0x11cc   : > { %6125 = vmatpush3.bf16.msra.mxu0 %v2757_v59  ;;  %v6532_v59 = vld [vmem:[%s6931_s20 + $0x84] ss:$8 sps:$4 sm:$0xff]  }
0x11cd   : > { %6136 = vmatprep.subr.bf16.mxu0 %v6841_v1 }
0x11ce   : > { %v2972_v12 = vpop.permute.xlu1 %2971 }
0x11cf   : > { %v2977_v15 = vsel %vm982_vm0, %v2972_v12, 0  ;;  %v6550_v12 = vld [vmem:[%s6931_s20 + $0xe4] ss:$8 sps:$4 sm:$0xff]  }
0x11d1   : > { %v6709_v60 = vpop.eup %6708 }
0x11d2   : > { %v2744_v61 = vsel %vm978_vm2, %v6709_v60, 0.0  ;;  %v6711_v62 = vpop.eup %6710 }
0x11d3   : > { %2745 = vadd.xlane.f32.xlu0 %v2744_v61  ;;  %v2965_v63 = vsel %vm978_vm2, %v6711_v62, 0.0  ;;  %v6533_v61 = vld [vmem:[%s6931_s20 + $0x90] ss:$8 sps:$4 sm:$0xff]  }
0x11d7   : > { %2966 = vadd.xlane.f32.xlu0 %v2965_v63  ;;  %v6536_v63 = vld [vmem:[%s6931_s20 + $0xa0] ss:$8 sps:$4 sm:$0xff]  }
0x11ed   : > { %2861 = vrot.lane.b32.xlu0 %v7332_v52, %s7832_s13 }
0x1260   : > { %v2746_v0 = vpop.xlane.xlu0 %2745 }
0x1261   : > { %6712 = vrcp.f32 %v2746_v0 }
0x1262   : > { %6714 = vrcp.f32 %v2857_v58 }
0x1264   : > { %v2967_v2 = vpop.xlane.xlu0 %2966 }
0x1265   : > { %6716 = vrcp.f32 %v2967_v2 }
0x1268   : > { %v2862_v7 = vpop.permute.xlu0 %2861 }
0x1269   : > { %v2867_v11 = vsel %vm982_vm0, %v2862_v7, 0  ;;  %v6539_v7 = vld [vmem:[%s6931_s20 + $0xb0] ss:$8 sps:$4 sm:$0xff]  }
0x126b   : > { %v6713_v3 = vpop.eup %6712 }
0x126c   : > { %v2748_v5 = vmul.f32 %v6713_v3, %v6709_v60  ;;  %v6715_v10 = vpop.eup %6714  ;;  %v6535_v60 = vld [vmem:[%s6931_s20 + $0x94] ss:$8 sps:$4 sm:$0xff]  }
0x126d   : > { %v2859_v52 = vmul.f32 %v6715_v10, %v6707_v47  ;;  %v6542_v10 = vld [vmem:[%s6931_s20 + $0xc0] ss:$8 sps:$4 sm:$0xff]  }
0x126e   : > { %v2749_v9 = vpack.c.bf16 %v2748_v5, %v2748_v5  ;;  %v6541_v5 = vld [vmem:[%s6931_s20 + $0xb4] ss:$8 sps:$4 sm:$0xff]  }
0x126f   : > { %v2860_v13 = vpack.c.bf16 %v2859_v52, %v2859_v52  ;;  %v6717_v14 = vpop.eup %6716  ;;  %v6545_v52 = vld [vmem:[%s6931_s20 + $0xd0] ss:$8 sps:$4 sm:$0xff]  }
0x1270   : > { %6127 = vmatmul.mubr.msk.bf16.vlgmr.msra.gmra.mrb[48].mxu0 %vm978_vm2, %v2749_v9  ;;  %v2969_v16 = vmul.f32 %v6717_v14, %v6711_v62  ;;  %v6538_v62 = vld [vmem:[%s6931_s20 + $0xa4] ss:$8 sps:$4 sm:$0xff]   ;;  %v6553_v14 = vld [vmem:[%s6931_s20 + $0xf4] ss:$8 sps:$4 sm:$0xff]  }
0x1271   : > { %6137 = vmatpush3.bf16.msra.mxu0 %v2867_v11  ;;  %6138 = vmatprep.mubr.msk.bf16.mxu0 %vm6842_vm1, %v6841_v1  ;;  %v6544_v9 = vld [vmem:[%s6931_s20 + $0xc4] ss:$8 sps:$4 sm:$0xff]   ;;  %v6547_v11 = vld [vmem:[%s6931_s20 + $0xd4] ss:$8 sps:$4 sm:$0xff]  }
0x1272   : > { %6148 = vmatprep.subr.bf16.mxu0 %v6841_v1  ;;  %v2970_v17 = vpack.c.bf16 %v2969_v16, %v2969_v16  ;;  %v6554_v16 = vld [vmem:[%s7827_s10 + $0xc0] sm:$0xff]  }
0x1273   : > { %5882 = vmatprep.subr.bf16.mxu1 %v6554_v16 }
0x1278   : > { %6139 = vmatmul.mubr.msk.bf16.vlgmr.msra.gmra.mrb[52].mxu0 %vm978_vm2, %v2860_v13  ;;  %v6548_v13 = vld [vmem:[%s6931_s20 + $0xe0] ss:$8 sps:$4 sm:$0xff]  }
0x1279   : > { %6149 = vmatpush3.bf16.msra.mxu0 %v2977_v15  ;;  %6150 = vmatprep.mubr.msk.bf16.mxu0 %vm6842_vm1, %v6841_v1  ;;  %v6551_v15 = vld [vmem:[%s6931_s20 + $0xf0] ss:$8 sps:$4 sm:$0xff]  }
0x127a   : > { %3289 = vmatprep.subr.bf16.mxu0 %v6532_v59 }
0x1280   : > { %6151 = vmatmul.mubr.msk.bf16.vlgmr.msra.gmra.mrb[56].mxu0 %vm978_vm2, %v2970_v17  ;;  %v6555_v17 = vld [vmem:[%s7827_s10 + $0x80] sm:$0xff]  }
0x1281   : > { %3321 = vmatprep.mubr.bf16.mxu0 %v6843_v49  ;;  %3290 = vmatpush1.bf16.msra.mxu0 %v6530_v37 }
0x1282   : > { %3291 = vmatprep.subr.bf16.mxu0 %v6535_v60 }
0x1285   : > { %3292 = vmatpush1.bf16.msra.mxu0 %v6533_v61 }
0x1286   : > { %3293 = vmatprep.subr.bf16.mxu0 %v6538_v62 }
0x1289   : > { %3294 = vmatpush1.bf16.msra.mxu0 %v6536_v63  ;;  %v5559_v63 = vld [vmem:[%s7831_s9 + $0x1] ss:$0 sm:$0xff] }
0x128a   : > { %3295 = vmatprep.subr.bf16.mxu0 %v6541_v5 }
0x128d   : > { %3296 = vmatpush1.bf16.msra.mxu0 %v6539_v7 }
0x128e   : > { %3297 = vmatprep.subr.bf16.mxu0 %v6544_v9  ;;  %v6570_v9 = vld [vmem:[%s6901_s14 + $0x180] ss:$12 sps:$4 sm:$0xff]  }
0x1291   : > { %3298 = vmatpush1.bf16.msra.mxu0 %v6542_v10  ;;  %v6572_v10 = vld [vmem:[%s6901_s14 + $0x184] ss:$12 sps:$4 sm:$0xff]  }
0x1292   : > { %3299 = vmatprep.subr.bf16.mxu0 %v6547_v11  ;;  %v6573_v11 = vld [vmem:[%s6901_s14 + $0x188] ss:$12 sps:$4 sm:$0xff]  }
0x1295   : > { %3300 = vmatpush1.bf16.msra.mxu0 %v6545_v52  ;;  %v6576_v52 = vld [vmem:[%s6901_s14 + $0x19c] ss:$12 sps:$4 sm:$0xff]  }
0x1296   : > { %3301 = vmatprep.subr.bf16.mxu0 %v6550_v12  ;;  %v6577_v12 = vld [vmem:[%s6901_s14 + $0x1a0] ss:$12 sps:$4 sm:$0xff]  }
0x1299   : > { %3302 = vmatpush1.bf16.msra.mxu0 %v6548_v13  ;;  %v6574_v13 = vld [vmem:[%s6901_s14 + $0x198] ss:$12 sps:$4 sm:$0xff]  }
0x129a   : > { %3303 = vmatprep.subr.bf16.mxu0 %v6553_v14  ;;  %v6580_v14 = vld [vmem:[%s6901_s14 + $0x1b4] ss:$12 sps:$4 sm:$0xff]  }
0x129d   : > { %3304 = vmatpush1.bf16.msra.mxu0 %v6551_v15 }
0x129e   : > { %3721 = vmatprep.subr.bf16.mxu0 %v6572_v10 }
0x1343   : > { %v2793_v28 = vpop.f32.mrb[48].mxu0 }
0x1344   : > { %3020 = vrot.lane.b32.xlu1 %v2793_v28, %s7833_s17  ;;  %v6128_v29 = vpop.f32.mrb[49].mxu0  ;;  %v6563_v28 = vld [vmem:[%s7827_s10 + $0xa0] sm:$0xff]  }
0x1345   : > { %v2796_v30 = vpop.f32.mrb[50].mxu0  ;;  %v6564_v29 = vld [vmem:[%s7827_s10 + $0xe8] sm:$0xff]  }
0x1346   : > { %v6129_v31 = vpop.f32.mrb[51].mxu0  ;;  %v6565_v30 = vld [vmem:[%s7827_s10 + $0xa8] sm:$0xff]  }
0x134b   : > { %v2903_v33 = vpop.f32.mrb[52].mxu0 }
0x134c   : > { %3024 = vrot.lane.b32.xlu1 %v2903_v33, %s7832_s13  ;;  %v6140_v34 = vpop.f32.mrb[53].mxu0 }
0x134d   : > { %v2906_v35 = vpop.f32.mrb[54].mxu0 }
0x134e   : > { %v6141_v38 = vpop.f32.mrb[55].mxu0  ;;  %v5491_v35 = vld [vmem:[%s7828_s7 + $0x1] ss:$0 sm:$0xff] }
0x1353   : > { %v3013_v39 = vpop.f32.mrb[56].mxu0 }
0x1354   : > { %3028 = vrot.lane.b32.xlu0 %v3013_v39, %s7826_s18  ;;  %v6152_v40 = vpop.f32.mrb[57].mxu0  ;;  %v5492_v39 = vld [vmem:[%s7829_s1 + $0x1] ss:$0 sm:$0xff] }
0x1355   : > { %v3016_v41 = vpop.f32.mrb[58].mxu0 }
0x1356   : > { %v6153_v43 = vpop.f32.mrb[59].mxu0 }
0x13b6   : > { %v3021_v44 = vpop.permute.xlu1 %3020 }
0x13b7   : > { %v3031_v25 = vsel %vm1364_vm3, %v7371_v36, %v3021_v44  ;;  %v6566_v44 = vld [vmem:[%s7827_s10 + $0xf0] sm:$0xff]  }
0x13be   : > { %v3025_v46 = vpop.permute.xlu1 %3024 }
0x13bf   : > { %v3032_v27 = vsel %vm1815_vm8, %v3031_v25, %v3025_v46  ;;  %v6567_v46 = vld [vmem:[%s7827_s10 + $0xb0] sm:$0xff]   ;;  %v6568_v25 = vld [vmem:[%s7827_s10 + $0xf8] sm:$0xff]  }
0x13c6   : > { %v3029_v47 = vpop.permute.xlu0 %3028 }
0x13c7   : > { %v3033_v48 = vsel %vm1817_vm9, %v3032_v27, %v3029_v47  ;;  %v6569_v27 = vld [vmem:[%s7827_s10 + $0xb8] sm:$0xff]   ;;  %v5509_v47 = vld [vmem:[%s7830_s5 + $0x2] sm:$0x3] }
0x13c8   : > { %v3034_v50 = vpack.c.bf16 %v3033_v48, %v3033_v48  ;;  %v3202_v48 = vrot.slane %v5509_v47, %v7128_v4 }
0x13ca   : > { %6171 = vmatmul.mubr.bf16.vlgmr.msra.gmra.mrb[36].mxu1 %v3034_v50  ;;  %v3206_v50 = vrot.slane %v5509_v47, %v7131_v6 }
0x13cb   : > { %5883 = vmatpush3.bf16.msra.mxu1 %v6555_v17 }
0x13cc   : > { %5884 = vmatprep.subr.bf16.mxu1 %v6556_v18 }
0x13cf   : > { %5885 = vmatpush3.bf16.msra.mxu1 %v6557_v19  ;;  %v6581_v19 = vld [vmem:[%s6901_s14 + $0x1b8] ss:$12 sps:$4 sm:$0xff]  }
0x13d0   : > { %5886 = vmatprep.subr.bf16.mxu1 %v6558_v20  ;;  %v6584_v20 = vld [vmem:[%s6901_s14 + $0x1cc] ss:$12 sps:$4 sm:$0xff]  }
0x13d3   : > { %5887 = vmatpush3.bf16.msra.mxu1 %v6559_v21  ;;  %v6582_v21 = vld [vmem:[%s6901_s14 + $0x1c8] ss:$12 sps:$4 sm:$0xff]  }
0x13d4   : > { %5888 = vmatprep.subr.bf16.mxu1 %v6560_v22  ;;  %v6585_v22 = vld [vmem:[%s6901_s14 + $0x1d0] ss:$12 sps:$4 sm:$0xff]  }
0x13d7   : > { %5889 = vmatpush3.bf16.msra.mxu1 %v6561_v23  ;;  %v6588_v23 = vld [vmem:[%s6901_s14 + $0x1e4] ss:$12 sps:$4 sm:$0xff]  }
0x13d8   : > { %5890 = vmatprep.subr.bf16.mxu1 %v6562_v26  ;;  %v6586_v26 = vld [vmem:[%s6901_s14 + $0x1e0] ss:$12 sps:$4 sm:$0xff]  }
0x13db   : > { %5891 = vmatpush3.bf16.msra.mxu1 %v6563_v28  ;;  %v6589_v28 = vld [vmem:[%s6901_s14 + $0x1e8] ss:$12 sps:$4 sm:$0xff]  }
0x13dc   : > { %5892 = vmatprep.subr.bf16.mxu1 %v6564_v29  ;;  %v6592_v29 = vld [vmem:[%s6901_s14 + $0x1fc] ss:$12 sps:$4 sm:$0xff]  }
0x13df   : > { %5893 = vmatpush3.bf16.msra.mxu1 %v6565_v30  ;;  %v6590_v30 = vld [vmem:[%s6901_s14 + $0x1f8] ss:$12 sps:$4 sm:$0xff]  }
0x13e0   : > { %5894 = vmatprep.subr.bf16.mxu1 %v6566_v44 }
0x13e3   : > { %5895 = vmatpush3.bf16.msra.mxu1 %v6567_v46  ;;  %v5578_v46 = vld [vmem:[%s7819_s3 + $0x2] ss:$0 sm:$0xff]  ;;  %s7839_s3 = sld [smem:[#allocation21_spill]] }
0x13e4   : > { %5896 = vmatprep.subr.bf16.mxu1 %v6568_v25 }
0x13e7   : > { %5897 = vmatpush3.bf16.msra.mxu1 %v6569_v27  ;;  %v5579_v27 = vld [vmem:[%s7817_s8 + $0x2] ss:$0 sm:$0xff] }
0x13e8   : > { %6174 = vmatprep.subr.bf16.mxu1 %v6841_v1 }
0x149d   : > { %v3142_v54 = vpop.f32.mrb[36].mxu1 }
0x149e   : > { %v3143_v55 = vadd.f32 %v5480_v53, %v3142_v54  ;;  %v6172_v56 = vpop.f32.mrb[37].mxu1 }
0x149f   : > { %v3145_v57 = vpop.f32.mrb[38].mxu1 }
0x14a0   : > { %v7421_v58 = vadd.f32 %v3143_v55, %v7283_v51  ;;  %v6173_v36 = vpop.f32.mrb[39].mxu1 }
0x14a2   : > { %3153 = vadd.xlane.f32.xlu1 %v7421_v58 }
0x152f   : > { %v3154_v51 = vpop.xlane.xlu1 %3153 }
0x1530   : > { %v3155_v0 = vmul.f32 0.0078125, %v3154_v51 }
0x1532   : > { %v3156_v2 = vsub.f32 %v7421_v58, %v3155_v0 }
0x1534   : > { %v3157_v3 = vmul.f32 %v3156_v2, %v3156_v2 }
0x1536   : > { %3158 = vadd.xlane.f32.xlu0 %v3157_v3 }
0x15c3   : > { %v3159_v31 = vpop.xlane.xlu0 %3158 }
0x15c4   : > { %v3160_v32 = vmul.f32 0.0078125, %v3159_v31  ;;  %v6593_v31 = vld [vmem:[%s6901_s14 + $0x200] ss:$12 sps:$4 sm:$0xff]  }
0x15c6   : > { %v3161_v33 = vadd.f32 1e-05, %v3160_v32  ;;  %v6596_v32 = vld [vmem:[%s6901_s14 + $0x214] ss:$12 sps:$4 sm:$0xff]  }
0x15c8   : > { %6718 = vrsqrt.f32 %v3161_v33  ;;  %v6594_v33 = vld [vmem:[%s6901_s14 + $0x210] ss:$12 sps:$4 sm:$0xff]  }
0x15d2   : > { %v6719_v34 = vpop.eup %6718 }
0x15d3   : > { %v3163_v38 = vmul.f32 %v6719_v34, %v3156_v2  ;;  %v6597_v34 = vld [vmem:[%s6901_s14 + $0x218] ss:$12 sps:$4 sm:$0xff]  }
0x15d5   : > { %v3170_v40 = vmul.f32 %v5491_v35, %v3163_v38  ;;  %v6600_v35 = vld [vmem:[%s6901_s14 + $0x22c] ss:$12 sps:$4 sm:$0xff]   ;;  %v6598_v38 = vld [vmem:[%s6901_s14 + $0x228] ss:$12 sps:$4 sm:$0xff]  }
0x15d7   : > { %v3177_v41 = vadd.f32 %v5492_v39, %v3170_v40  ;;  %v6601_v39 = vld [vmem:[%s6901_s14 + $0x230] ss:$12 sps:$4 sm:$0xff]  }
0x15d9   : > { %v3178_v43 = vpack.c.bf16 %v3177_v41, %v3177_v41 }
0x15db   : > { %3322 = vmatmul.mubr.bf16.vlgmr.msra.gmra.mrb[60].mxu0 %v3178_v43 }
0x15dc   : > { %3753 = vmatprep.mubr.bf16.mxu0 %v6843_v49  ;;  %3722 = vmatpush1.bf16.msra.mxu0 %v6570_v9 }
0x15dd   : > { %3723 = vmatprep.subr.bf16.mxu0 %v6576_v52 }
0x15e0   : > { %3724 = vmatpush1.bf16.msra.mxu0 %v6574_v13 }
0x15e1   : > { %3725 = vmatprep.subr.bf16.mxu0 %v6580_v14 }
0x16ae   : > { %v3323_v53 = vpop.f32.mrb[60].mxu0 }
0x16af   : > { %v3324_v54 = vadd.f32 %v3323_v53, %v3202_v48  ;;  %v3325_v55 = vpop.f32.mrb[61].mxu0  ;;  %v5612_v53 = vld [vmem:[%s6906_s19 + $0x6] sm:$0x7] }
0x16b0   : > { %v3326_v56 = vadd.f32 %v3325_v55, %v3206_v50  ;;  %v3327_v57 = vpop.f32.mrb[62].mxu0 }
0x16b1   : > { %v3330_v36 = vmax.f32 %v3324_v54, 0.0  ;;  %v3328_v37 = vpop.f32.mrb[63].mxu0  ;;  %v3585_v54 = vrot.slane %v5612_v53, %v7131_v6 }
0x16b2   : > { %v3331_v59 = vmax.f32 %v3326_v56, 0.0  ;;  %v3589_v37 = vrot.slane %v5612_v53, %v7134_v8 }
0x16b3   : > { %v3332_v61 = vpack.c.bf16 %v3330_v36, %v3330_v36 }
0x16b4   : > { %v3333_v60 = vpack.c.bf16 %v3331_v59, %v3331_v59 }
0x16b6   : > { %3503 = vmatprep.mubr.bf16.mxu1 %v3333_v60 }
0x16b7   : > { %3504 = vmatmul.mubr.bf16.vlgmr.msra.gmra.mrb[40].mxu1 %v3332_v61 }
0x16b8   : > { %6190 = vmatprep.mubr.msk.bf16.mxu1 %vm6842_vm1, %v6841_v1  ;;  %6175 = vmatpush3.bf16.msra.mxu1 %v6573_v11 }
0x16b9   : > { %6176 = vmatprep.subr.bf16.mxu1 %v6841_v1 }
0x16bc   : > { %6177 = vmatpush3.bf16.msra.mxu1 %v6577_v12 }
0x16bd   : > { %6178 = vmatprep.subr.bf16.mxu1 %v6841_v1 }
0x16c0   : > { %6179 = vmatpush3.bf16.msra.mxu1 %v6581_v19 }
0x16c1   : > { %6180 = vmatprep.subr.bf16.mxu1 %v6841_v1 }
0x16c4   : > { %6181 = vmatpush3.bf16.msra.mxu1 %v6585_v22 }
0x16c5   : > { %6182 = vmatprep.subr.bf16.mxu1 %v6841_v1 }
0x16c8   : > { %6183 = vmatpush3.bf16.msra.mxu1 %v6589_v28 }
0x16c9   : > { %6184 = vmatprep.subr.bf16.mxu1 %v6841_v1 }
0x16cc   : > { %6185 = vmatpush3.bf16.msra.mxu1 %v6593_v31 }
0x16cd   : > { %6186 = vmatprep.subr.bf16.mxu1 %v6841_v1 }
0x16d0   : > { %6187 = vmatpush3.bf16.msra.mxu1 %v6597_v34 }
0x16d1   : > { %6188 = vmatprep.subr.bf16.mxu1 %v6841_v1 }
0x16d4   : > { %6189 = vmatpush3.bf16.msra.mxu1 %v6601_v39 }
0x16d5   : > { %6218 = vmatprep.subr.bf16.mxu1 %v6841_v1 }
0x178a   : > { %v5898_v62 = vpop.f32.mrb[40].mxu1 }
0x178b   : > { %v5899_v51 = vpop.f32.mrb[41].mxu1 }
0x178c   : > { %v5900_v0 = vadd.f32 %v5899_v51, %v5898_v62  ;;  %v5901_v2 = vpop.f32.mrb[42].mxu1  ;;  %v3581_v51 = vrot.slane %v5612_v53, %v7128_v4 }
0x178d   : > { %v5902_v3 = vpop.f32.mrb[43].mxu1 }
0x178e   : > { %v3506_v5 = vadd.f32 %v5900_v0, %v5559_v63 }
0x1790   : > { %v7468_v7 = vadd.f32 %v3506_v5, %v7421_v58  ;;  %v6578_v58 = vld [vmem:[%s6901_s14 + $0x1b0] ss:$12 sps:$4 sm:$0xff]  }
0x1791   : > { %3726 = vmatpush1.bf16.msra.mxu0 %v6578_v58 }
0x1792   : > { %3516 = vadd.xlane.f32.xlu0 %v7468_v7  ;;  %3727 = vmatprep.subr.bf16.mxu0 %v6584_v20 }
0x1795   : > { %3728 = vmatpush1.bf16.msra.mxu0 %v6582_v21 }
0x1796   : > { %3729 = vmatprep.subr.bf16.mxu0 %v6588_v23 }
0x1799   : > { %3730 = vmatpush1.bf16.msra.mxu0 %v6586_v26 }
0x179a   : > { %3731 = vmatprep.subr.bf16.mxu0 %v6592_v29 }
0x179d   : > { %3732 = vmatpush1.bf16.msra.mxu0 %v6590_v30 }
0x179e   : > { %3733 = vmatprep.subr.bf16.mxu0 %v6596_v32 }
0x17a1   : > { %3734 = vmatpush1.bf16.msra.mxu0 %v6594_v33 }
0x17a2   : > { %3735 = vmatprep.subr.bf16.mxu0 %v6600_v35 }
0x17a5   : > { %3736 = vmatpush1.bf16.msra.mxu0 %v6598_v38 }
0x17a6   : > { %6194 = vmatprep.subr.bf16.mxu0 %v6841_v1 }
0x181f   : > { %v3517_v15 = vpop.xlane.xlu0 %3516 }
0x1820   : > { %v3518_v16 = vmul.f32 0.0078125, %v3517_v15 }
0x1822   : > { %v3519_v17 = vsub.f32 %v7468_v7, %v3518_v16 }
0x1824   : > { %v3520_v18 = vmul.f32 %v3519_v17, %v3519_v17 }
0x1826   : > { %3521 = vadd.xlane.f32.xlu0 %v3520_v18 }
0x18b3   : > { %v3522_v40 = vpop.xlane.xlu0 %3521 }
0x18b4   : > { %v3523_v41 = vmul.f32 0.0078125, %v3522_v40 }
0x18b6   : > { %v3524_v43 = vadd.f32 1e-05, %v3523_v41 }
0x18b8   : > { %6720 = vrsqrt.f32 %v3524_v43 }
0x18c2   : > { %v6721_v44 = vpop.eup %6720 }
0x18c3   : > { %v3526_v25 = vmul.f32 %v6721_v44, %v3519_v17 }
0x18c5   : > { %v3533_v47 = vmul.f32 %v5578_v46, %v3526_v25 }
0x18c7   : > { %v3540_v48 = vadd.f32 %v5579_v27, %v3533_v47 }
0x18c9   : > { %v3541_v50 = vpack.c.bf16 %v3540_v48, %v3540_v48 }
0x18cb   : > { %3754 = vmatmul.mubr.bf16.vlgmr.msra.gmra.mrb[64].mxu0 %v3541_v50  ;;  %6191 = vmatmul.mubr.bf16.vlgmr.msra.gmra.mrb[44].mxu1 %v3541_v50 }
0x18cc   : > { %6196 = vmatprep.mubr.msk.bf16.mxu0 %vm6842_vm1, %v6841_v1  ;;  %6220 = vmatprep.mubr.msk.bf16.mxu1 %vm6842_vm1, %v6841_v1 }
0x199e   : > { %v3755_v55 = vpop.f32.mrb[64].mxu0  ;;  %v3796_v56 = vpop.f32.mrb[44].mxu1 }
0x199f   : > { %v3757_v57 = vpop.f32.mrb[65].mxu0  ;;  %v6192_v36 = vpop.f32.mrb[45].mxu1  ;;  %v3797_v2 = vadd.f32 %v3796_v56, %v3589_v37  ;;  %v3756_v5 = vadd.f32 %v3755_v55, %v3581_v51 }
0x19a0   : > { %v3758_v59 = vadd.f32 %v3757_v57, %v3585_v54  ;;  %v3759_v60 = vpop.f32.mrb[66].mxu0  ;;  %v3799_v61 = vpop.f32.mrb[46].mxu1 }
0x19a1   : > { %v3760_v62 = vpop.f32.mrb[67].mxu0  ;;  %v6193_v63 = vpop.f32.mrb[47].mxu1  ;;  %v7517_v9 = vpack.c.bf16 %v3797_v2, %v3797_v2  ;;  %v3802_v10 = vpack.c.bf16 %v3756_v5, %v3756_v5 }
0x19a2   : > { %v3803_v0 = vpack.c.bf16 %v3758_v59, %v3758_v59 }
0x19a3   : > { %v3867_v8 = vsel %vm982_vm0, %v7517_v9, 0 }
0x19a4   : > { %v3809_v3 = vsel %vm1364_vm3, %v3803_v0, 0 }
0x19a5   : > { %6195 = vmatpush3.bf16.xpose.msra.mxu0 %v3809_v3 }
0x19a6   : > { %6200 = vmatprep.subr.bf16.mxu0 %v6841_v1 }
0x19ac   : > { %6197 = vmatmul.mubr.msk.bf16.vlgmr.msra.gmra.mrb[68].mxu0 %vm1364_vm3, %v3802_v10 }
0x19ad   : > { %6201 = vmatpush3.bf16.msra.mxu0 %v3867_v8  ;;  %6202 = vmatprep.mubr.msk.bf16.mxu0 %vm6842_vm1, %v6841_v1 }
0x19ae   : > { %6206 = vmatprep.subr.bf16.mxu0 %v6841_v1 }
0x1a7f   : > { %v3845_v11 = vpop.f32.mrb[68].mxu0 }
0x1a80   : > { %v3846_v52 = vadd.f32 %v3845_v11, %v7177_v45  ;;  %v6198_v12 = vpop.f32.mrb[69].mxu0 }
0x1a81   : > { %v3848_v13 = vpop.f32.mrb[70].mxu0 }
0x1a82   : > { %v6199_v14 = vpop.f32.mrb[71].mxu0  ;;  %v3851_v58 = vsel %vm978_vm2, %v3846_v52, -inf }
0x1a83   : > { %3852 = vmax.xlane.f32.xlu1 %v3851_v58 }
0x1a94   : > { %3913 = vrot.lane.b32.xlu1 %v3803_v0, %s7826_s18 }
0x1a98   : > { %4024 = vrot.lane.b32.xlu1 %v3803_v0, %s7832_s13 }
0x1a9c   : > { %4022 = vrot.lane.b32.xlu1 %v3802_v10, %s7832_s13 }
0x1aa0   : > { %4134 = vrot.lane.b32.xlu1 %v3803_v0, %s7833_s17 }
0x1b10   : > { %v3853_v15 = vpop.xlane.xlu1 %3852 }
0x1b11   : > { %v3854_v16 = vsub.f32 %v3846_v52, %v3853_v15 }
0x1b13   : > { %v3855_v17 = vmul.f32 1.442695, %v3854_v16 }
0x1b14   : > { %v3914_v18 = vpop.permute.xlu1 %3913 }
0x1b15   : > { %6722 = vpow2.f32 %v3855_v17  ;;  %v3919_v35 = vsel %vm1364_vm3, %v3914_v18, 0 }
0x1b18   : > { %v4025_v19 = vpop.permute.xlu1 %4024 }
0x1b19   : > { %v4030_v20 = vsel %vm1364_vm3, %v4025_v19, 0 }
0x1b1a   : > { %6219 = vmatpush3.bf16.xpose.msra.mxu1 %v4030_v20 }
0x1b1b   : > { %6230 = vmatprep.subr.bf16.mxu1 %v6841_v1 }
0x1b1c   : > { %v4023_v21 = vpop.permute.xlu1 %4022 }
0x1b1f   : > { %v6723_v22 = vpop.eup %6722 }
0x1b20   : > { %v4135_v23 = vpop.permute.xlu1 %4134  ;;  %v3857_v26 = vsel %vm978_vm2, %v6723_v22, 0.0 }
0x1b21   : > { %v4140_v28 = vsel %vm1364_vm3, %v4135_v23, 0  ;;  %3858 = vadd.xlane.f32.xlu0 %v3857_v26  ;;  %6221 = vmatmul.mubr.msk.bf16.vlgmr.msra.gmra.mrb[48].mxu1 %vm1364_vm3, %v4023_v21 }
0x1b22   : > { %6231 = vmatpush3.bf16.xpose.msra.mxu1 %v4140_v28  ;;  %6232 = vmatprep.mubr.msk.bf16.mxu1 %vm6842_vm1, %v6841_v1 }
0x1b23   : > { %6242 = vmatprep.subr.bf16.mxu1 %v6841_v1 }
0x1b37   : > { %3910 = vrot.lane.b32.xlu0 %v3802_v10, %s7826_s18 }
0x1b3b   : > { %4132 = vrot.lane.b32.xlu0 %v3802_v10, %s7833_s17 }
0x1bae   : > { %v3859_v29 = vpop.xlane.xlu0 %3858 }
0x1baf   : > { %6724 = vrcp.f32 %v3859_v29 }
0x1bb2   : > { %v3911_v30 = vpop.permute.xlu0 %3910 }
0x1bb6   : > { %v4133_v31 = vpop.permute.xlu0 %4132 }
0x1bb7   : > { %6233 = vmatmul.mubr.msk.bf16.vlgmr.msra.gmra.mrb[52].mxu1 %vm1364_vm3, %v4133_v31 }
0x1bb8   : > { %6258 = vmatprep.mubr.msk.bf16.mxu1 %vm6842_vm1, %v6841_v1 }
0x1bb9   : > { %v6725_v32 = vpop.eup %6724 }
0x1bba   : > { %v3861_v33 = vmul.f32 %v6725_v32, %v6723_v22 }
0x1bbc   : > { %v3862_v34 = vpack.c.bf16 %v3861_v33, %v3861_v33 }
0x1bbe   : > { %6203 = vmatmul.mubr.msk.bf16.vlgmr.msra.gmra.mrb[72].mxu0 %vm978_vm2, %v3862_v34  ;;  %v6602_v34 = vld [vmem:[%s6911_s24 + $0x80] sm:$0xff]  }
0x1bbf   : > { %6207 = vmatpush3.bf16.xpose.msra.mxu0 %v3919_v35  ;;  %6208 = vmatprep.mubr.msk.bf16.mxu0 %vm6842_vm1, %v6841_v1  ;;  %v6603_v35 = vld [vmem:[%s6911_s24 + $0x88] sm:$0xff]  }
0x1bc0   : > { %6212 = vmatprep.subr.bf16.mxu0 %v6841_v1  ;;  %6243 = vmatpush3.bf16.msra.mxu1 %v6602_v34  ;;  %v6646_v34 = vld [vmem:[%s7827_s10 + $0x150] sm:$0xff]  }
0x1bc1   : > { %6244 = vmatprep.subr.bf16.mxu1 %v6841_v1 }
0x1bc4   : > { %6245 = vmatpush3.bf16.msra.mxu1 %v6603_v35  ;;  %v6647_v35 = vld [vmem:[%s7827_s10 + $0x110] sm:$0xff]  }
0x1bc5   : > { %6246 = vmatprep.subr.bf16.mxu1 %v6841_v1 }
0x1bc6   : > { %6209 = vmatmul.mubr.msk.bf16.vlgmr.msra.gmra.mrb[76].mxu0 %vm1364_vm3, %v3911_v30 }
0x1bc7   : > { %6214 = vmatprep.mubr.msk.bf16.mxu0 %vm6842_vm1, %v6841_v1 }
0x1bf4   : > { %v4066_v38 = vpop.f32.mrb[48].mxu1 }
0x1bf5   : > { %v4067_v39 = vadd.f32 %v4066_v38, %v7177_v45  ;;  %v6222_v40 = vpop.f32.mrb[49].mxu1  ;;  %v6604_v38 = vld [vmem:[%s6911_s24 + $0x90] sm:$0xff]  }
0x1bf6   : > { %v4069_v41 = vpop.f32.mrb[50].mxu1  ;;  %6247 = vmatpush3.bf16.msra.mxu1 %v6604_v38  ;;  %v6606_v40 = vld [vmem:[%s6911_s24 + $0xa0] sm:$0xff]   ;;  %v6648_v38 = vld [vmem:[%s7827_s10 + $0x158] sm:$0xff]  }
0x1bf7   : > { %v6223_v43 = vpop.f32.mrb[51].mxu1  ;;  %v4072_v44 = vsel %vm978_vm2, %v4067_v39, -inf  ;;  %6248 = vmatprep.subr.bf16.mxu1 %v6841_v1  ;;  %v6608_v41 = vld [vmem:[%s6911_s24 + $0xb0] sm:$0xff]  }
0x1bf8   : > { %4073 = vmax.xlane.f32.xlu0 %v4072_v44 }
0x1c85   : > { %v4074_v46 = vpop.xlane.xlu0 %4073 }
0x1c86   : > { %v4075_v27 = vsub.f32 %v4067_v39, %v4074_v46  ;;  %v6605_v39 = vld [vmem:[%s6911_s24 + $0x98] sm:$0xff]  }
0x1c87   : > { %6249 = vmatpush3.bf16.msra.mxu1 %v6605_v39  ;;  %v6649_v39 = vld [vmem:[%s7827_s10 + $0x118] sm:$0xff]  }
0x1c88   : > { %v4076_v55 = vmul.f32 1.442695, %v4075_v27  ;;  %6250 = vmatprep.subr.bf16.mxu1 %v6841_v1  ;;  %v6609_v27 = vld [vmem:[%s6911_s24 + $0xb8] sm:$0xff]  }
0x1c8a   : > { %v4176_v25 = vpop.f32.mrb[52].mxu1  ;;  %6726 = vpow2.f32 %v4076_v55 }
0x1c8b   : > { %v4177_v47 = vadd.f32 %v4176_v25, %v7177_v45  ;;  %v6234_v48 = vpop.f32.mrb[53].mxu1  ;;  %6251 = vmatpush3.bf16.msra.mxu1 %v6606_v40  ;;  %v6650_v40 = vld [vmem:[%s7827_s10 + $0x160] sm:$0xff]  }
0x1c8c   : > { %v4179_v50 = vpop.f32.mrb[54].mxu1  ;;  %6252 = vmatprep.subr.bf16.mxu1 %v6841_v1 }
0x1c8d   : > { %v6235_v53 = vpop.f32.mrb[55].mxu1  ;;  %v4182_v54 = vsel %vm978_vm2, %v4177_v47, -inf }
0x1c8e   : > { %4183 = vmax.xlane.f32.xlu0 %v4182_v54 }
0x1c91   : > { %v7556_v56 = vpop.f32.mrb[72].mxu0 }
0x1c92   : > { %v6204_v57 = vpop.f32.mrb[73].mxu0 }
0x1c93   : > { %v3906_v36 = vpop.f32.mrb[74].mxu0 }
0x1c94   : > { %v6205_v37 = vpop.f32.mrb[75].mxu0  ;;  %v6727_v0 = vpop.eup %6726 }
0x1c95   : > { %v4078_v2 = vsel %vm978_vm2, %v6727_v0, 0.0 }
0x1c99   : > { %v3955_v59 = vpop.f32.mrb[76].mxu0 }
0x1c9a   : > { %v3956_v60 = vadd.f32 %v3955_v59, %v7177_v45  ;;  %v6210_v61 = vpop.f32.mrb[77].mxu0 }
0x1c9b   : > { %v3958_v62 = vpop.f32.mrb[78].mxu0 }
0x1c9c   : > { %v6211_v63 = vpop.f32.mrb[79].mxu0  ;;  %v3961_v51 = vsel %vm978_vm2, %v3956_v60, -inf }
0x1c9d   : > { %3962 = vmax.xlane.f32.xlu1 %v3961_v51 }
0x1ca1   : > { %4079 = vadd.xlane.f32.xlu1 %v4078_v2 }
0x1cb2   : > { %3974 = vrot.lane.b32.xlu1 %v7517_v9, %s7826_s18 }
0x1cb6   : > { %4194 = vrot.lane.b32.xlu1 %v7517_v9, %s7833_s17 }
0x1d1b   : > { %v4184_v3 = vpop.xlane.xlu0 %4183 }
0x1d1c   : > { %v4185_v5 = vsub.f32 %v4177_v47, %v4184_v3 }
0x1d1e   : > { %v4186_v8 = vmul.f32 1.442695, %v4185_v5 }
0x1d2a   : > { %v3963_v10 = vpop.xlane.xlu1 %3962 }
0x1d2b   : > { %v3964_v45 = vsub.f32 %v3956_v60, %v3963_v10 }
0x1d2d   : > { %v3965_v11 = vmul.f32 1.442695, %v3964_v45 }
0x1d2e   : > { %v4080_v52 = vpop.xlane.xlu1 %4079 }
0x1d2f   : > { %6728 = vpow2.f32 %v3965_v11  ;;  %v6612_v11 = vld [vmem:[%s6931_s20 + $0x104] ss:$8 sps:$4 sm:$0xff]  }
0x1d30   : > { %6730 = vpow2.f32 %v4186_v8  ;;  %v6610_v8 = vld [vmem:[%s6931_s20 + $0x100] ss:$8 sps:$4 sm:$0xff]  }
0x1d32   : > { %v3975_v12 = vpop.permute.xlu1 %3974 }
0x1d33   : > { %v3980_v13 = vsel %vm982_vm0, %v3975_v12, 0  ;;  %v6613_v12 = vld [vmem:[%s6931_s20 + $0x110] ss:$8 sps:$4 sm:$0xff]  }
0x1d34   : > { %6213 = vmatpush3.bf16.msra.mxu0 %v3980_v13  ;;  %v6618_v13 = vld [vmem:[%s6931_s20 + $0x124] ss:$8 sps:$4 sm:$0xff]  }
0x1d35   : > { %6224 = vmatprep.subr.bf16.mxu0 %v6841_v1 }
0x1d36   : > { %v4195_v28 = vpop.permute.xlu1 %4194 }
0x1d37   : > { %v4200_v31 = vsel %vm982_vm0, %v4195_v28, 0  ;;  %v6628_v28 = vld [vmem:[%s6931_s20 + $0x160] ss:$8 sps:$4 sm:$0xff]  }
0x1d39   : > { %v6729_v14 = vpop.eup %6728 }
0x1d3a   : > { %v3967_v58 = vsel %vm978_vm2, %v6729_v14, 0.0  ;;  %v6731_v15 = vpop.eup %6730 }
0x1d3b   : > { %3968 = vadd.xlane.f32.xlu0 %v3967_v58  ;;  %v4188_v16 = vsel %vm978_vm2, %v6731_v15, 0.0 }
0x1d3f   : > { %4189 = vadd.xlane.f32.xlu0 %v4188_v16 }
0x1d55   : > { %4084 = vrot.lane.b32.xlu0 %v7517_v9, %s7832_s13 }
0x1dc8   : > { %v3969_v17 = vpop.xlane.xlu0 %3968 }
0x1dc9   : > { %6732 = vrcp.f32 %v3969_v17  ;;  %v4749_v17 = vsel %vm1057_vm4, %v7173_v42, 0.0 }
0x1dca   : > { %6734 = vrcp.f32 %v4080_v52  ;;  %v6615_v52 = vld [vmem:[%s6931_s20 + $0x114] ss:$8 sps:$4 sm:$0xff]  }
0x1dcc   : > { %v4190_v18 = vpop.xlane.xlu0 %4189 }
0x1dcd   : > { %6736 = vrcp.f32 %v4190_v18  ;;  %v6621_v18 = vld [vmem:[%s6931_s20 + $0x134] ss:$8 sps:$4 sm:$0xff]  }
0x1dd0   : > { %v4085_v21 = vpop.permute.xlu0 %4084 }
0x1dd1   : > { %v4090_v26 = vsel %vm982_vm0, %v4085_v21, 0  ;;  %v6622_v21 = vld [vmem:[%s6931_s20 + $0x140] ss:$8 sps:$4 sm:$0xff]  }
0x1dd3   : > { %v6733_v19 = vpop.eup %6732 }
0x1dd4   : > { %v3971_v20 = vmul.f32 %v6733_v19, %v6729_v14  ;;  %v6735_v23 = vpop.eup %6734  ;;  %v6616_v14 = vld [vmem:[%s6931_s20 + $0x120] ss:$8 sps:$4 sm:$0xff]   ;;  %v6619_v19 = vld [vmem:[%s6931_s20 + $0x130] ss:$8 sps:$4 sm:$0xff]  }
0x1dd5   : > { %v4082_v9 = vmul.f32 %v6735_v23, %v6727_v0  ;;  %v5662_v0 = vld [vmem:[%s6916_s30 + $0x2] ss:$0 sm:$0xff]  ;;  %v6625_v23 = vld [vmem:[%s6931_s20 + $0x150] ss:$8 sps:$4 sm:$0xff]  }
0x1dd6   : > { %v3972_v22 = vpack.c.bf16 %v3971_v20, %v3971_v20  ;;  %v6624_v20 = vld [vmem:[%s6931_s20 + $0x144] ss:$8 sps:$4 sm:$0xff]  }
0x1dd7   : > { %v4083_v29 = vpack.c.bf16 %v4082_v9, %v4082_v9  ;;  %v6737_v30 = vpop.eup %6736  ;;  %v4738_v9 = vrot.slane %v7173_v42, %v7128_v4  ;;  %v6644_v42 = vld [vmem:[%s7827_s10 + $0x148] sm:$0xff]  }
0x1dd8   : > { %6215 = vmatmul.mubr.msk.bf16.vlgmr.msra.gmra.mrb[80].mxu0 %vm978_vm2, %v3972_v22  ;;  %v4192_v32 = vmul.f32 %v6737_v30, %v6731_v15  ;;  %v6627_v22 = vld [vmem:[%s6931_s20 + $0x154] ss:$8 sps:$4 sm:$0xff]   ;;  %v6631_v30 = vld [vmem:[%s6931_s20 + $0x170] ss:$8 sps:$4 sm:$0xff]  }
0x1dd9   : > { %6225 = vmatpush3.bf16.msra.mxu0 %v4090_v26  ;;  %6226 = vmatprep.mubr.msk.bf16.mxu0 %vm6842_vm1, %v6841_v1  ;;  %v6630_v26 = vld [vmem:[%s6931_s20 + $0x164] ss:$8 sps:$4 sm:$0xff]  }
0x1dda   : > { %6236 = vmatprep.subr.bf16.mxu0 %v6841_v1  ;;  %v4193_v33 = vpack.c.bf16 %v4192_v32, %v4192_v32  ;;  %v6643_v32 = vld [vmem:[%s7827_s10 + $0x100] sm:$0xff]  }
0x1de0   : > { %6227 = vmatmul.mubr.msk.bf16.vlgmr.msra.gmra.mrb[84].mxu0 %vm978_vm2, %v4083_v29  ;;  %v6633_v29 = vld [vmem:[%s6931_s20 + $0x174] ss:$8 sps:$4 sm:$0xff]  }
0x1de1   : > { %6237 = vmatpush3.bf16.msra.mxu0 %v4200_v31  ;;  %6238 = vmatprep.mubr.msk.bf16.mxu0 %vm6842_vm1, %v6841_v1  ;;  %v6642_v31 = vld [vmem:[%s7827_s10 + $0x140] sm:$0xff]  }
0x1de2   : > { %4512 = vmatprep.subr.bf16.mxu0 %v6612_v11  ;;  %v6655_v11 = vld [vmem:[%s7827_s10 + $0x130] sm:$0xff]  }
0x1de8   : > { %6239 = vmatmul.mubr.msk.bf16.vlgmr.msra.gmra.mrb[88].mxu0 %vm978_vm2, %v4193_v33  ;;  %v6645_v33 = vld [vmem:[%s7827_s10 + $0x108] sm:$0xff]  }
0x1de9   : > { %4544 = vmatprep.mubr.bf16.mxu0 %v6843_v49  ;;  %v6607_v49 = vld [vmem:[%s6911_s24 + $0xa8] sm:$0xff]   ;;  %4513 = vmatpush1.bf16.msra.mxu0 %v6610_v8  ;;  %v6654_v8 = vld [vmem:[%s7827_s10 + $0x170] sm:$0xff]  }
0x1dea   : > { %6253 = vmatpush3.bf16.msra.mxu1 %v6607_v49  ;;  %4514 = vmatprep.subr.bf16.mxu0 %v6615_v52  ;;  %v6651_v49 = vld [vmem:[%s7827_s10 + $0x120] sm:$0xff]   ;;  %v6656_v52 = vld [vmem:[%s7827_s10 + $0x178] sm:$0xff]  }
0x1deb   : > { %6254 = vmatprep.subr.bf16.mxu1 %v6841_v1 }
0x1ded   : > { %4515 = vmatpush1.bf16.msra.mxu0 %v6613_v12  ;;  %v6657_v12 = vld [vmem:[%s7827_s10 + $0x138] sm:$0xff]  }
0x1dee   : > { %6255 = vmatpush3.bf16.msra.mxu1 %v6608_v41  ;;  %4516 = vmatprep.subr.bf16.mxu0 %v6618_v13  ;;  %v6652_v41 = vld [vmem:[%s7827_s10 + $0x168] sm:$0xff]   ;;  %v5691_v13 = vld [vmem:[%s7830_s5 + $0x4] sm:$0x3] }
0x1def   : > { %6256 = vmatprep.subr.bf16.mxu1 %v6841_v1 }
0x1df1   : > { %4517 = vmatpush1.bf16.msra.mxu0 %v6616_v14  ;;  %v4425_v14 = vrot.slane %v5691_v13, %v7128_v4 }
0x1df2   : > { %6257 = vmatpush3.bf16.msra.mxu1 %v6609_v27  ;;  %4518 = vmatprep.subr.bf16.mxu0 %v6621_v18 }
0x1df3   : > { %5938 = vmatprep.subr.bf16.mxu1 %v6642_v31 }
0x1df5   : > { %4519 = vmatpush1.bf16.msra.mxu0 %v6619_v19 }
0x1df6   : > { %4520 = vmatprep.subr.bf16.mxu0 %v6624_v20 }
0x1df9   : > { %4521 = vmatpush1.bf16.msra.mxu0 %v6622_v21 }
0x1dfa   : > { %4522 = vmatprep.subr.bf16.mxu0 %v6627_v22 }
0x1dfd   : > { %4523 = vmatpush1.bf16.msra.mxu0 %v6625_v23 }
0x1dfe   : > { %4524 = vmatprep.subr.bf16.mxu0 %v6630_v26 }
0x1e01   : > { %4525 = vmatpush1.bf16.msra.mxu0 %v6628_v28 }
0x1e02   : > { %4526 = vmatprep.subr.bf16.mxu0 %v6633_v29 }
0x1e05   : > { %4527 = vmatpush1.bf16.msra.mxu0 %v6631_v30 }
0x1e06   : > { %6262 = vmatprep.subr.bf16.mxu0 %v6841_v1 }
0x1eab   : > { %v4016_v43 = vpop.f32.mrb[80].mxu0 }
0x1eac   : > { %4243 = vrot.lane.b32.xlu1 %v4016_v43, %s7833_s17  ;;  %v6216_v44 = vpop.f32.mrb[81].mxu0  ;;  %v6653_v43 = vld [vmem:[%s7827_s10 + $0x128] sm:$0xff]   ;;  %s7835_s17 = sld [smem:[#allocation17_spill]] }
0x1ead   : > { %v4019_v46 = vpop.f32.mrb[82].mxu0 }
0x1eae   : > { %v6217_v25 = vpop.f32.mrb[83].mxu0 }
0x1eb3   : > { %v4126_v47 = vpop.f32.mrb[84].mxu0 }
0x1eb4   : > { %4247 = vrot.lane.b32.xlu1 %v4126_v47, %s7832_s13  ;;  %v6228_v48 = vpop.f32.mrb[85].mxu0  ;;  %v5673_v47 = vld [vmem:[%s7828_s7 + $0x2] ss:$0 sm:$0xff]  ;;  %s7834_s13 = sld [smem:[#allocation16_spill]] }
0x1eb5   : > { %v4129_v50 = vpop.f32.mrb[86].mxu0 }
0x1eb6   : > { %v6229_v53 = vpop.f32.mrb[87].mxu0  ;;  %v5674_v50 = vld [vmem:[%s7829_s1 + $0x2] ss:$0 sm:$0xff]  ;;  %s7838_s1 = sld [smem:[#allocation19_spill]] }
0x1eba   : > { %v6658_v23 = vld [vmem:[%s7834_s13] sm:$0xff]   ;;  %v6659_v4 = vld [vmem:[%s7834_s13 + $0x8] sm:$0xff]   ;;  %v6660_v30 = vld [vmem:[%s7834_s13 + $0x10] sm:$0xff]  }
0x1ebb   : > { %v4236_v54 = vpop.f32.mrb[88].mxu0  ;;  %v6661_v31 = vld [vmem:[%s7834_s13 + $0x18] sm:$0xff]  }
0x1ebc   : > { %4251 = vrot.lane.b32.xlu0 %v4236_v54, %s7826_s18  ;;  %v6240_v55 = vpop.f32.mrb[89].mxu0  ;;  %s7836_s18 = sld [smem:[#allocation20_spill]] }
0x1ebd   : > { %v4239_v57 = vpop.f32.mrb[90].mxu0  ;;  %v6634_v55 = vld [vmem:[%s7818_s4] sm:$0xff]  }
0x1ebe   : > { %v6241_v36 = vpop.f32.mrb[91].mxu0 }
0x1ebf   : > { %v6635_v36 = vld [vmem:[%s7818_s4 + $0x8] sm:$0xff]  }
0x1f1e   : > { %v4244_v37 = vpop.permute.xlu1 %4243 }
0x1f1f   : > { %v4254_v60 = vsel %vm1364_vm3, %v7556_v56, %v4244_v37  ;;  %v4755_v37 = vrot.slane %v7080_v24, 4 }
0x1f26   : > { %v4248_v59 = vpop.permute.xlu1 %4247 }
0x1f27   : > { %v4255_v61 = vsel %vm1815_vm8, %v4254_v60, %v4248_v59  ;;  %v6636_v59 = vld [vmem:[%s7818_s4 + $0x10] sm:$0xff]   ;;  %v4756_v60 = vadd.f32 %v4755_v37, %v7080_v24 }
0x1f28   : > { %v6640_v24 = vld [vmem:[%s7818_s4 + $0x30] sm:$0xff]  }
0x1f2e   : > { %v4252_v62 = vpop.permute.xlu0 %4251 }
0x1f2f   : > { %v4256_v63 = vsel %vm1817_vm9, %v4255_v61, %v4252_v62  ;;  %v6637_v61 = vld [vmem:[%s7818_s4 + $0x18] sm:$0xff]   ;;  %v4757_v62 = vrot.slane %v4756_v60, 2 }
0x1f30   : > { %v4257_v51 = vpack.c.bf16 %v4256_v63, %v4256_v63  ;;  %v6638_v63 = vld [vmem:[%s7818_s4 + $0x20] sm:$0xff]  }
0x1f32   : > { %6259 = vmatmul.mubr.bf16.vlgmr.msra.gmra.mrb[56].mxu1 %v4257_v51  ;;  %v4758_v51 = vadd.f32 %v4757_v62, %v4756_v60 }
0x1f33   : > { %5939 = vmatpush3.bf16.msra.mxu1 %v6643_v32  ;;  %v6662_v32 = vld [vmem:[%s7834_s13 + $0x20] sm:$0xff]  }
0x1f34   : > { %5940 = vmatprep.subr.bf16.mxu1 %v6644_v42  ;;  %v6663_v42 = vld [vmem:[%s7834_s13 + $0x28] sm:$0xff]  }
0x1f37   : > { %5941 = vmatpush3.bf16.msra.mxu1 %v6645_v33  ;;  %v6664_v33 = vld [vmem:[%s7834_s13 + $0x30] sm:$0xff]  }
0x1f38   : > { %5942 = vmatprep.subr.bf16.mxu1 %v6646_v34  ;;  %v6665_v34 = vld [vmem:[%s7834_s13 + $0x38] sm:$0xff]  }
0x1f3b   : > { %5943 = vmatpush3.bf16.msra.mxu1 %v6647_v35 }
0x1f3c   : > { %5944 = vmatprep.subr.bf16.mxu1 %v6648_v38 }
0x1f3f   : > { %5945 = vmatpush3.bf16.msra.mxu1 %v6649_v39  ;;  %v5741_v39 = vld [vmem:[%s7831_s9 + $0x2] ss:$0 sm:$0xff] }
0x1f40   : > { %5946 = vmatprep.subr.bf16.mxu1 %v6650_v40 }
0x1f43   : > { %5947 = vmatpush3.bf16.msra.mxu1 %v6651_v49 }
0x1f44   : > { %5948 = vmatprep.subr.bf16.mxu1 %v6652_v41 }
0x1f47   : > { %5949 = vmatpush3.bf16.msra.mxu1 %v6653_v43 }
0x1f48   : > { %5950 = vmatprep.subr.bf16.mxu1 %v6654_v8  ;;  %v6667_v8 = vld [vmem:[%s7836_s18 + $0x8] sm:$0xff]  }
0x1f4b   : > { %5951 = vmatpush3.bf16.msra.mxu1 %v6655_v11  ;;  %v6668_v11 = vld [vmem:[%s7836_s18 + $0x10] sm:$0xff]  }
0x1f4c   : > { %5952 = vmatprep.subr.bf16.mxu1 %v6656_v52  ;;  %v6669_v52 = vld [vmem:[%s7836_s18 + $0x18] sm:$0xff]  }
0x1f4f   : > { %5953 = vmatpush3.bf16.msra.mxu1 %v6657_v12  ;;  %v6670_v12 = vld [vmem:[%s7836_s18 + $0x20] sm:$0xff]  }
0x1f50   : > { %6282 = vmatprep.subr.bf16.mxu1 %v6841_v1 }
0x2005   : > { %v4365_v2 = vpop.f32.mrb[56].mxu1 }
0x2006   : > { %v4366_v3 = vadd.f32 %v5662_v0, %v4365_v2  ;;  %v6260_v5 = vpop.f32.mrb[57].mxu1  ;;  %v6639_v0 = vld [vmem:[%s7818_s4 + $0x28] sm:$0xff]   ;;  %v4759_v2 = vrot.slane %v4758_v51, 1 }
0x2007   : > { %v4368_v10 = vpop.f32.mrb[58].mxu1  ;;  %v6641_v5 = vld [vmem:[%s7818_s4 + $0x38] sm:$0xff]   ;;  %s7840_s4 = sld [smem:[#allocation24_spill]] }
0x2008   : > { %v7606_v45 = vadd.f32 %v4366_v3, %v7468_v7  ;;  %v6261_v56 = vpop.f32.mrb[59].mxu1  ;;  %v4760_v3 = vadd.f32 %v4759_v2, %v4758_v51  ;;  %v6666_v2 = vld [vmem:[%s7836_s18] sm:$0xff]  }
0x200a   : > { %4376 = vadd.xlane.f32.xlu1 %v7606_v45  ;;  %v4762_v10 = vmul.f32 0.125, %v4760_v3 }
0x200c   : > { %v4763_v56 = vpack.c.bf16 %v4762_v10, %v4762_v10 }
0x2097   : > { %v4377_v7 = vpop.xlane.xlu1 %4376 }
0x2098   : > { %v4378_v58 = vmul.f32 0.0078125, %v4377_v7  ;;  %v4429_v7 = vrot.slane %v5691_v13, %v7131_v6  ;;  %v6671_v13 = vld [vmem:[%s7836_s18 + $0x28] sm:$0xff]  }
0x209a   : > { %v4379_v15 = vsub.f32 %v7606_v45, %v4378_v58 }
0x209c   : > { %v4380_v16 = vmul.f32 %v4379_v15, %v4379_v15 }
0x209e   : > { %4381 = vadd.xlane.f32.xlu0 %v4380_v16 }
0x20a2   : > { %4750 = vadd.xlane.f32.xlu0 %v4749_v17 }
0x20b8   : > { %4740 = vbcast.lane.b32.xlu0 %v4738_v9, 256 }
0x212b   : > { %v4382_v44 = vpop.xlane.xlu0 %4381 }
0x212c   : > { %v4383_v46 = vmul.f32 0.0078125, %v4382_v44 }
0x212e   : > { %v4384_v25 = vadd.f32 1e-05, %v4383_v46 }
0x212f   : > { %v4751_v38 = vpop.xlane.xlu0 %4750 }
0x2130   : > { %6738 = vrsqrt.f32 %v4384_v25  ;;  %v4752_v25 = vmax.f32 %v4751_v38, 1.0 }
0x2132   : > { %6740 = vrcp.f32 %v4752_v25 }
0x213a   : > { %v6739_v27 = vpop.eup %6738 }
0x213b   : > { %v4386_v48 = vmul.f32 %v6739_v27, %v4379_v15  ;;  %v4741_v27 = vpop.permute.xlu0 %4740 }
0x213d   : > { %v4393_v53 = vmul.f32 %v5673_v47, %v4386_v48 }
0x213f   : > { %v4400_v54 = vadd.f32 %v5674_v50, %v4393_v53 }
0x2141   : > { %v4401_v57 = vpack.c.bf16 %v4400_v54, %v4400_v54 }
0x2143   : > { %4545 = vmatmul.mubr.bf16.vlgmr.msra.gmra.mrb[92].mxu0 %v4401_v57 }
0x2144   : > { %6263 = vmatpush3.bf16.msra.mxu0 %v6634_v55  ;;  %6278 = vmatprep.mubr.msk.bf16.mxu0 %vm6842_vm1, %v6841_v1 }
0x2145   : > { %6264 = vmatprep.subr.bf16.mxu0 %v6841_v1 }
0x2148   : > { %6265 = vmatpush3.bf16.msra.mxu0 %v6635_v36  ;;  %v6741_v36 = vpop.eup %6740 }
0x2149   : > { %6266 = vmatprep.subr.bf16.mxu0 %v6841_v1 }
0x214c   : > { %6267 = vmatpush3.bf16.msra.mxu0 %v6636_v59 }
0x214d   : > { %6268 = vmatprep.subr.bf16.mxu0 %v6841_v1 }
0x2150   : > { %6269 = vmatpush3.bf16.msra.mxu0 %v6637_v61 }
0x2151   : > { %6270 = vmatprep.subr.bf16.mxu0 %v6841_v1 }
0x2154   : > { %6271 = vmatpush3.bf16.msra.mxu0 %v6638_v63 }
0x2155   : > { %6272 = vmatprep.subr.bf16.mxu0 %v6841_v1 }
0x2158   : > { %6273 = vmatpush3.bf16.msra.mxu0 %v6639_v0 }
0x2159   : > { %6274 = vmatprep.subr.bf16.mxu0 %v6841_v1 }
0x215c   : > { %6275 = vmatpush3.bf16.msra.mxu0 %v6640_v24 }
0x215d   : > { %6276 = vmatprep.subr.bf16.mxu0 %v6841_v1 }
0x2160   : > { %6277 = vmatpush3.bf16.msra.mxu0 %v6641_v5 }
0x2161   : > { %6302 = vmatprep.subr.bf16.mxu0 %v6841_v1 }
0x2163   : > { %6279 = vmatmul.mubr.bf16.vlgmr.msra.gmra.mrb[96].mxu0 %v4763_v56 }
0x2164   : > { %6318 = vmatprep.mubr.msk.bf16.mxu0 %vm6842_vm1, %v6841_v1  ;;  %6303 = vmatpush3.bf16.msra.mxu0 %v6666_v2 }
0x2165   : > { %6304 = vmatprep.subr.bf16.mxu0 %v6841_v1 }
0x2168   : > { %6305 = vmatpush3.bf16.msra.mxu0 %v6667_v8 }
0x2169   : > { %6306 = vmatprep.subr.bf16.mxu0 %v6841_v1 }
0x216c   : > { %6307 = vmatpush3.bf16.msra.mxu0 %v6668_v11 }
0x216d   : > { %6308 = vmatprep.subr.bf16.mxu0 %v6841_v1 }
0x2170   : > { %6309 = vmatpush3.bf16.msra.mxu0 %v6669_v52 }
0x2171   : > { %6310 = vmatprep.subr.bf16.mxu0 %v6841_v1 }
0x2174   : > { %6311 = vmatpush3.bf16.msra.mxu0 %v6670_v12 }
0x2175   : > { %6312 = vmatprep.subr.bf16.mxu0 %v6841_v1 }
0x2178   : > { %6313 = vmatpush3.bf16.msra.mxu0 %v6671_v13 }
0x2179   : > { %6314 = vmatprep.subr.bf16.mxu0 %v6841_v1 }
0x2216   : > { %v4546_v58 = vpop.f32.mrb[92].mxu0 }
0x2217   : > { %v4547_v15 = vadd.f32 %v4546_v58, %v4425_v14  ;;  %v4548_v16 = vpop.f32.mrb[93].mxu0  ;;  %v6672_v14 = vld [vmem:[%s7836_s18 + $0x30] sm:$0xff]  }
0x2218   : > { %v4549_v17 = vadd.f32 %v4548_v16, %v4429_v7  ;;  %v4550_v18 = vpop.f32.mrb[94].mxu0  ;;  %6315 = vmatpush3.bf16.msra.mxu0 %v6672_v14  ;;  %v6673_v7 = vld [vmem:[%s7836_s18 + $0x38] sm:$0xff]  }
0x2219   : > { %v4553_v19 = vmax.f32 %v4547_v15, 0.0  ;;  %v4551_v20 = vpop.f32.mrb[95].mxu0  ;;  %6316 = vmatprep.subr.bf16.mxu0 %v6841_v1 }
0x221a   : > { %v4554_v21 = vmax.f32 %v4549_v17, 0.0  ;;  %v4976_v20 = vld [vmem:[%s7838_s1] sm:$0x1]  ;;  %s7841_s1 = sld [smem:[#allocation22_spill]] }
0x221b   : > { %v4555_v26 = vpack.c.bf16 %v4553_v19, %v4553_v19 }
0x221c   : > { %v4556_v22 = vpack.c.bf16 %v4554_v21, %v4554_v21  ;;  %6317 = vmatpush3.bf16.msra.mxu0 %v6673_v7 }
0x221e   : > { %4726 = vmatprep.mubr.bf16.mxu1 %v4556_v22  ;;  %v4780_v22 = vld [vmem:[%s7006_s12] sm:$0x1] }
0x221f   : > { %4727 = vmatmul.mubr.bf16.vlgmr.msra.gmra.mrb[60].mxu1 %v4555_v26 }
0x2220   : > { %6283 = vmatpush3.bf16.msra.mxu1 %v6658_v23  ;;  %6298 = vmatprep.mubr.msk.bf16.mxu1 %vm6842_vm1, %v6841_v1 }
0x2221   : > { %6284 = vmatprep.subr.bf16.mxu1 %v6841_v1 }
0x2224   : > { %6285 = vmatpush3.bf16.msra.mxu1 %v6659_v4 }
0x2225   : > { %6286 = vmatprep.subr.bf16.mxu1 %v6841_v1 }
0x2228   : > { %6287 = vmatpush3.bf16.msra.mxu1 %v6660_v30 }
0x2229   : > { %6288 = vmatprep.subr.bf16.mxu1 %v6841_v1 }
0x222c   : > { %6289 = vmatpush3.bf16.msra.mxu1 %v6661_v31 }
0x222d   : > { %6290 = vmatprep.subr.bf16.mxu1 %v6841_v1 }
0x2230   : > { %6291 = vmatpush3.bf16.msra.mxu1 %v6662_v32 }
0x2231   : > { %6292 = vmatprep.subr.bf16.mxu1 %v6841_v1 }
0x2234   : > { %6293 = vmatpush3.bf16.msra.mxu1 %v6663_v42 }
0x2235   : > { %6294 = vmatprep.subr.bf16.mxu1 %v6841_v1 }
0x2236   : > { %v7681_v6 = vpop.f32.mrb[96].mxu0 }
0x2237   : > { %v6280_v9 = vpop.f32.mrb[97].mxu0  ;;  %v4864_v26 = vadd.f32 %v7681_v6, %v4780_v22 }
0x2238   : > { %v4866_v28 = vpop.f32.mrb[98].mxu0  ;;  %6295 = vmatpush3.bf16.msra.mxu1 %v6664_v33 }
0x2239   : > { %v6281_v29 = vpop.f32.mrb[99].mxu0  ;;  %6296 = vmatprep.subr.bf16.mxu1 %v6841_v1 }
0x223a   : > { %v5012_v29 = vld [vmem:[%s7839_s3] sm:$0x1]  ;;  %s7842_s3 = sld [smem:[#allocation23_spill]] }
0x223c   : > { %6297 = vmatpush3.bf16.msra.mxu1 %v6665_v34 }
0x223d   : > { %6322 = vmatprep.subr.bf16.mxu1 %v6841_v1 }
0x22f2   : > { %v5954_v35 = vpop.f32.mrb[60].mxu1 }
0x22f3   : > { %v5955_v40 = vpop.f32.mrb[61].mxu1 }
0x22f4   : > { %v5956_v49 = vadd.f32 %v5955_v40, %v5954_v35  ;;  %v5957_v41 = vpop.f32.mrb[62].mxu1 }
0x22f5   : > { %v5958_v43 = vpop.f32.mrb[63].mxu1  ;;  %v6675_v41 = vld [vmem:[%s7840_s4 + $0x8] sm:$0xff]  }
0x22f6   : > { %v4729_v44 = vadd.f32 %v5956_v49, %v5741_v39  ;;  %v6674_v49 = vld [vmem:[%s7840_s4] sm:$0xff]   ;;  %v6676_v43 = vld [vmem:[%s7840_s4 + $0x10] sm:$0xff]  }
0x22f8   : > { %v4734_v46 = vadd.f32 %v4729_v44, %v7606_v45  ;;  %v4886_v45 = vld [vmem:[%s7835_s17] sm:$0x1]  ;;  %s7837_s17 = sld [smem:[#allocation18_spill]]  ;;  %v6677_v44 = vld [vmem:[%s7840_s4 + $0x18] sm:$0xff]   ;;  %s5787_s4 = sshll.u32 %s7034_s0, 4 }
0x22f9   : > { %s7734_s8 = scalar_lea.hbm %s7011_s6, %s5787_s4  ;;  %s6847_s0 = smov [#allocation2]  }
0x22fa   : > { %v4742_v47 = vmul.f32 %v4741_v27, %v4734_v46  ;;  %s6750_s9 = sshll.u32 %s6847_s0, 4  ;;  %s6751_s9 = int_to_ptr.vmem [resolvable:$false] %s6750_s9 }
0x22fb   : > { %s6752_s10 = scalar_lea.vmem %s6751_s9, 32 }
0x22fc   : > { %v4743_v48 = vrot.slane %v4742_v47, 4 }
0x22fe   : > { %v4744_v50 = vadd.f32 %v4743_v48, %v4742_v47  ;;  %v4975_v18 = vld [vmem:[%s7837_s17] sm:$0x1]  ;;  %s958_s17 = sand.u32 1, %s6800_s23  }
0x22ff   : > { %v5101_v48 = vld [vmem:[%s7841_s1] sm:$0x1]  ;;  %s959_s5 = scalar_lea.vmem [#allocation2], %s958_s17  ;;  %s5200_s1 = scalar_lea.sflag [#allocation3], %s958_s17 }
0x2300   : > { %v4745_v53 = vrot.slane %v4744_v50, 2  ;;  %s5212_s7 = sshll.u32 %s959_s5, 4  ;;  %s7736_s7 = int_to_ptr.vmem [resolvable:$true] %s5212_s7 }
0x2301   : > { %p6753_p0 = scmp.lt.s32.totalorder %s7736_s7, %s6751_s9 }
0x2302   : > { %v4746_v54 = vadd.f32 %v4745_v53, %v4744_v50  ;;  %v5102_v53 = vld [vmem:[%s7842_s3] sm:$0x1]  ;;  %s6746_s3 = scalar_lea.vmem %s7736_s7, 16 }
0x2303   : > { %p6747_p11 = scmp.ne.s32.totalorder %s7736_s7, %s6746_s3  ;;  %p6754_p1 = scmp.lt.s32.totalorder %s6752_s10, %s6746_s3 }
0x2304   : > { %v4747_v55 = vrot.slane %v4746_v54, 1 }
0x2305   : > { %p6748_p12 = pnand %p6747_p11, %p7051_p5  ;;  %p6755_p2 = por %p6754_p1, %p6753_p0 }
0x2306   : > { %v4748_v57 = vadd.f32 %v4747_v55, %v4746_v54 }
0x2307   : > { %p6749_p13 = pneg %p6748_p12 }
0x2308   : > { %v4754_v37 = vmul.f32 %v6741_v36, %v4748_v57 }
0x2309   : > { %p6756_p3 = pnand %p6755_p2, %p6749_p13 }
0x230a   : > { %v4869_v59 = vpack.c.bf16 %v4754_v37, %v4754_v37 }
0x230c   : > { %6299 = vmatmul.mubr.bf16.vlgmr.msra.gmra.mrb[64].mxu1 %v4869_v59 }
0x230d   : > { %6330 = vmatprep.mubr.msk.bf16.mxu1 %vm6842_vm1, %v6841_v1  ;;  %6323 = vmatpush3.bf16.msra.mxu1 %v6674_v49 }
0x230e   : > { %6324 = vmatprep.subr.bf16.mxu1 %v6841_v1 }
0x2311   : > { %6325 = vmatpush3.bf16.msra.mxu1 %v6675_v41 }
0x2312   : > { %6326 = vmatprep.subr.bf16.mxu1 %v6841_v1 }
0x2315   : > { %6327 = vmatpush3.bf16.msra.mxu1 %v6676_v43 }
0x2316   : > { %6328 = vmatprep.subr.bf16.mxu1 %v6841_v1  ;;  %v5130_v1 = vld [vmem:[%s6996_s27] sm:$0x1] }
0x2319   : > { %6329 = vmatpush3.bf16.msra.mxu1 %v6677_v44 }
0x23df   : > { %v4969_v60 = vpop.f32.mrb[64].mxu1 }
0x23e0   : > { %v4970_v61 = vadd.f32 %v4969_v60, %v4886_v45  ;;  %v6300_v62 = vpop.f32.mrb[65].mxu1 }
0x23e1   : > { %v4972_v63 = vpop.f32.mrb[66].mxu1 }
0x23e2   : > { %v6301_v51 = vpop.f32.mrb[67].mxu1  ;;  %v4978_v0 = vsel %vm4977_vm10, %v4970_v61, 0.0 }
0x23e3   : > { %4979 = vadd.xlane.f32.xlu1 %v4978_v0 }
0x2470   : > { %v4980_v24 = vpop.xlane.xlu1 %4979 }
0x2471   : > { %v4981_v3 = vmul.f32 0.0078125, %v4980_v24 }
0x2473   : > { %v4982_v5 = vsub.f32 %v4970_v61, %v4981_v3 }
0x2475   : > { %v4983_v10 = vmul.f32 %v4982_v5, %v4982_v5 }
0x2477   : > { %v4984_v56 = vsel %vm4977_vm10, %v4983_v10, 0.0 }
0x2478   : > { %4985 = vadd.xlane.f32.xlu1 %v4984_v56 }
0x2505   : > { %v4986_v58 = vpop.xlane.xlu1 %4985 }
0x2506   : > { %v4987_v15 = vmul.f32 0.0078125, %v4986_v58 }
0x2508   : > { %v4988_v16 = vadd.f32 1e-05, %v4987_v15 }
0x250a   : > { %6742 = vrsqrt.f32 %v4988_v16 }
0x2514   : > { %v6743_v17 = vpop.eup %6742 }
0x2515   : > { %v4990_v19 = vmul.f32 %v6743_v17, %v4982_v5 }
0x2517   : > { %v4991_v21 = vmul.f32 %v4990_v19, %v4975_v18 }
0x2519   : > { %v4992_v23 = vadd.f32 %v4991_v21, %v4976_v20 }
0x251b   : > { %v4993_v4 = vmax.f32 %v4992_v23, 0.0 }
0x251d   : > { %v4994_v9 = vadd.f32 %v4993_v4, %v4864_v26 }
0x251f   : > { %v4995_v28 = vpack.c.bf16 %v4994_v9, %v4994_v9 }
0x2521   : > { %6319 = vmatmul.mubr.bf16.vlgmr.msra.gmra.mrb[100].mxu0 %v4995_v28 }
0x25f4   : > { %v5095_v30 = vpop.f32.mrb[100].mxu0 }
0x25f5   : > { %v5096_v31 = vadd.f32 %v5095_v30, %v5012_v29  ;;  %v6320_v32 = vpop.f32.mrb[101].mxu0 }
0x25f6   : > { %v5098_v42 = vpop.f32.mrb[102].mxu0 }
0x25f7   : > { %v6321_v33 = vpop.f32.mrb[103].mxu0  ;;  %v5104_v34 = vsel %vm5103_vm11, %v5096_v31, 0.0 }
0x25f8   : > { %5105 = vadd.xlane.f32.xlu1 %v5104_v34 }
0x2685   : > { %v5106_v35 = vpop.xlane.xlu1 %5105 }
0x2686   : > { %v5108_v38 = vmul.f32 0.015625, %v5106_v35 }
0x2688   : > { %v5109_v6 = vsub.f32 %v5096_v31, %v5108_v38 }
0x268a   : > { %v5110_v39 = vmul.f32 %v5109_v6, %v5109_v6 }
0x268c   : > { %v5111_v40 = vsel %vm5103_vm11, %v5110_v39, 0.0 }
0x268d   : > { %5112 = vadd.xlane.f32.xlu1 %v5111_v40 }
0x271a   : > { %v5113_v46 = vpop.xlane.xlu1 %5112 }
0x271b   : > { %v5114_v25 = vmul.f32 0.015625, %v5113_v46 }
0x271d   : > { %v5115_v27 = vadd.f32 1e-05, %v5114_v25 }
0x271f   : > { %6744 = vrsqrt.f32 %v5115_v27 }
0x2729   : > { %v6745_v47 = vpop.eup %6744 }
0x272a   : > { %v5117_v50 = vmul.f32 %v6745_v47, %v5109_v6 }
0x272c   : > { %v5118_v54 = vmul.f32 %v5117_v50, %v5101_v48 }
0x272e   : > { %v5119_v55 = vadd.f32 %v5118_v54, %v5102_v53 }
0x2730   : > { %v5120_v57 = vmax.f32 %v5119_v55, 0.0 }
0x2732   : > { %v5121_v36 = vpack.c.bf16 %v5120_v57, %v5120_v57 }
0x2734   : > { %6331 = vmatmul.mubr.msk.bf16.vlgmr.msra.gmra.mrb[68].mxu1 %vm1815_vm8, %v5121_v36 }
0x2807   : > { %v5192_v37 = vpop.f32.mrb[68].mxu1 }
0x2808   : > { %v5193_v59 = vadd.f32 %v5192_v37, %v5130_v1  ;;  %v6332_v45 = vpop.f32.mrb[69].mxu1 }
0x2809   : > { %v5195_v60 = vpop.f32.mrb[70].mxu1 }
0x280a   : > { %5198 = vst [vmem:[%s959_s5] sm:$0x1] %v5193_v59  ;;  %v6333_v61 = vpop.f32.mrb[71].mxu1 }
0x280b   : > { %6759 = shalt.err (!%p6756_p3)
}
0x280c   : > { %s6760_s5 = scalar_lea.hbm %s7734_s8, 16  ;;  %s6764_s4 = scalar_lea.hbm %s7011_s6, 32 }
0x280d   : > { %p6761_p4 = scmp.ne.s32.totalorder %s7734_s8, %s6760_s5  ;;  %p6765_p9 = scmp.lt.u32.totalorder %s7734_s8, %s7011_s6 }
0x280e   : > { %p6766_p10 = scmp.lt.u32.totalorder %s6764_s4, %s6760_s5  ;;  %p6768_p12 = scmp.lt.u32.totalorder %s6760_s5, %s7734_s8 }
0x280f   : > { %p6762_p7 = pnand %p6761_p4, %p7051_p5 }
0x2810   : > { %p6767_p11 = por %p6766_p10, %p6765_p9 }
0x2811   : > { %p6763_p8 = pneg %p6762_p7 }
0x2812   : > { %p6769_p0 = por %p6768_p12, %p6767_p11 }
0x2814   : > { %p6770_p13 = pnand %p6769_p0, %p6763_p8 }
0x2816   : > { %6773 = shalt.err (!%p6770_p13)
}
0x2817   : > { %6334 = dma.vmem_to_hbm [thread:$0]  (%p7051_p5), %s7736_s7, 16, %s7734_s8, %s5200_s1  }
0x2818 PF: > { %p6340_p1 = scmp.ge.s32.totalorder %s6808_s28, 2  ;;  %s5224_s9 = sand.u32 1, %s6796_s22  }
0x2819   : > { %s5225_s10 = scalar_lea.sflag [#allocation3], %s5224_s9 }
0x281a   : > { %p6337_p2 = pnand %p6340_p1, %p7055_p6 }
0x281c   : > { %6791 = dma.done.wait (!%p6337_p2), %s5225_s10, 16  }
0x281d   : > { %6793 = vsyncadd (!%p6337_p2), %s5225_s10, 4294967280  ;;  %p73_p3 = scmp.ge.s32.totalorder %s7038_s2, 4   ;;  %s7843_s22 = smov %s6800_s23 }
0x281e   : > { %s7844_s23 = smov %s6804_s26  ;;  %s7845_s26 = smov %s7049_s11 }
0x281f   : > { %s7846_s28 = smov %s7038_s2  ;;  %75 = sbr.rel (!%p73_p3) target bundleno = 62 (0x3e), region = 237 }
0x2826   :  { %5229 = vsyncpa [#allocation3], 1 }
0x2827   :  { %5231 = vsyncpa [#allocation3 + $0x1], 1 }

</bundles_post_ra>
